<compile_context>
chip_gen: v7x
topology: tpu7x:2x2x1
jax: 0.10.0
libtpu: 0.0.40
codegen_flags: <defaults>
</compile_context>

<pallas_src>
import jax
import jax.numpy as jnp
import numpy as np
from jax import lax
from jax.experimental import pallas as pl
from jax.experimental.pallas import tpu as pltpu

HIDDEN = 32        # args.hidden_size
INPUT = 32         # args.input_size
SEQ = 8            # sequence length
BATCH = 2
N_NER = 5          # len(ner2idx)
N_REL = 4          # len(rel2idx)
LANES = 128        # lane width for packed encoder output / padded tag dim
DROPCONNECT = 0.1  # args.dropconnect (eval-mode scaling only)


def _full_spec(shape):
    nd = len(shape)
    return pl.BlockSpec(tuple(shape), lambda *_: (0,) * nd)


def _task_spec(shape):
    rest = tuple(shape[1:])
    zeros = (0,) * len(rest)
    return pl.BlockSpec((1,) + rest, lambda t: (t,) + zeros)


# ----------------------------------------------------------------------------
# Encoder (recurrent pfn_unit) kernel: single grid step, fully unrolled time loop
# ----------------------------------------------------------------------------
def encoder_kernel(x_ref, w_in_ref, b5_ref, w_hid_ref, w_tr_ref, b_tr_ref, msc_ref,
                   out_ref):
    S, B, In = x_ref.shape
    H = w_hid_ref.shape[0]
    H4 = 4 * H

    # (1) Hoisted input projection for ALL timesteps: one (S*B, In) @ (In, 5H) matmul.
    #     Kept as a register value (no VMEM scratch); indexed statically per step.
    x_all = x_ref[...].reshape(S * B, In)
    gx = (jnp.dot(x_all, w_in_ref[...], preferred_element_type=jnp.float32)
          + b5_ref[...]).reshape(S, B, 5 * H)

    # Loop-invariant weights / constants, loaded & built once (no per-iter broadcast).
    w_hid = w_hid_ref[...]          # (H, 5H)
    w_tr = w_tr_ref[...]            # (3H, H)
    b_tr = b_tr_ref[...]            # (1, H)
    msc = msc_ref[...]              # (4H, 8H): [block-sum | block-cumsum] matrix
    pad = jnp.zeros((B, LANES - 2 * H), jnp.float32)

    h = jnp.zeros((B, H), jnp.float32)
    c_prev = jnp.zeros((B, H), jnp.float32)

    for t in range(S):              # static unroll; S is tiny, vreg pressure is fine
        # One fused gate matmul per step: (B, H) @ (H, 5H).
        gates = gx[t] + jnp.dot(h, w_hid, preferred_element_type=jnp.float32)
        c_g = gates[:, :H]
        g4 = gates[:, H:]           # (B, 4H) = [eg_cin | rg_cin | eg_c | rg_c]

        # Per-block (per-H) max for numerical stability (matches the reference
        # softmax and avoids 0/0 when one block underflows under a global max).
        e = jnp.concatenate(
            [jnp.exp(g4[:, k * H:(k + 1) * H]
                     - jnp.max(g4[:, k * H:(k + 1) * H], axis=-1, keepdims=True))
             for k in range(4)], axis=-1)                               # (B, 4H)

        # Fused cumsoftmax over the 4 gate blocks in ONE matmul:
        # per-block softmax + cumsum == (e @ tri_block) / (e @ ones_block).
        sc = jnp.dot(e, msc, preferred_element_type=jnp.float32)        # (B, 8H)
        cs = sc[:, H4:] / sc[:, :H4]

        eg_cin = 1.0 - cs[:, 0 * H:1 * H]
        rg_cin = cs[:, 1 * H:2 * H]
        eg_c = 1.0 - cs[:, 2 * H:3 * H]
        rg_c = cs[:, 3 * H:4 * H]
        c = jnp.tanh(c_g)

        overlap_c = rg_c * eg_c
        upper_c = rg_c - overlap_c
        downer_c = eg_c - overlap_c
        overlap_cin = rg_cin * eg_cin
        upper_cin = rg_cin - overlap_cin
        downer_cin = eg_cin - overlap_cin

        share = overlap_cin * c_prev + overlap_c * c
        c_re = upper_cin * c_prev + upper_c * c + share
        c_ner = downer_cin * c_prev + downer_c * c + share

        # Lane-dense packed rows (128 lanes each); stores are off the serial chain.
        hs_t = jnp.tanh(share)
        out_ref[0, :, t, :] = jnp.concatenate([hs_t, jnp.tanh(c_ner), pad], axis=-1)
        out_ref[1, :, t, :] = jnp.concatenate([hs_t, jnp.tanh(c_re), pad], axis=-1)

        # transform(cat(c_re, c_ner, c_share)): one (B, 3H) @ (3H, H) matmul.
        cat = jnp.concatenate([c_re, c_ner, share], axis=-1)
        c_out = jnp.dot(cat, w_tr, preferred_element_type=jnp.float32) + b_tr
        h = jnp.tanh(c_out)
        c_prev = c_out


def run_encoder(x, pk):
    S, B, _ = x.shape
    weights = (pk['w_in'], pk['b5'], pk['w_hid'], pk['w_tr'], pk['b_tr'], pk['m_sumcum'])
    return pl.pallas_call(
        encoder_kernel,
        out_shape=jax.ShapeDtypeStruct((2, B, S, LANES), jnp.float32),
        grid=(1,),
        in_specs=[_full_spec(x.shape)] + [_full_spec(w.shape) for w in weights],
        out_specs=_full_spec((2, B, S, LANES)),
        compiler_params=pltpu.CompilerParams(dimension_semantics=("arbitrary",)),
    )(x, *weights)


# ----------------------------------------------------------------------------
# Fused pair scorer kernel (NER = task 0, RE = task 1), grid=(2,), "parallel"
# (2-TC task split on v7x; single extra grid step on single-TC v5e/v6e)
# ----------------------------------------------------------------------------
def pair_kernel(packed_ref, mask_ref,
                wcat_ref, bn_ref, w12_ref, w3_ref, bhh_ref,
                gamma_ref, beta_ref, wtag_ref, btag_ref,
                score_ref, g_ref):
    _, B, L, _ = packed_ref.shape
    H = wcat_ref.shape[-1]
    task = pl.program_id(0)

    packed = packed_ref[0]                               # (B, L, 128) = [hs | ht | pad]
    sh_ht = packed[..., :2 * H].reshape(B * L, 2 * H)    # contiguous [h_share | h_task]
    ht2 = packed[..., H:2 * H].reshape(B * L, H)         # h_task

    # h_global = tanh([h_share | h_task] @ Wn^T + bn): one fused (B*L, 2H) @ (2H, H) dot.
    g2 = jnp.tanh(jnp.dot(sh_ht, wcat_ref[0], preferred_element_type=jnp.float32)
                  + bn_ref[0])
    g_blh = g2.reshape(B, L, H)
    g_ref[0] = g_blh
    # TODO(synk): max is taken over the full sequence incl. padded positions (matches
    # the PyTorch reference); mask before the max if padded-batch semantics change.
    h_global = jnp.max(g_blh, axis=1)                    # (B, H)

    # hid2hid(cat(st, en, h_global)): fused (w1|w2) matmul + broadcast add.
    ab = jnp.dot(ht2, w12_ref[0], preferred_element_type=jnp.float32)   # (B*L, 2H)
    a_c = ab[:, :H].reshape(B, L, 1, H)
    b_c = ab[:, H:].reshape(B, 1, L, H)
    g_c = (jnp.dot(h_global, w3_ref[0], preferred_element_type=jnp.float32)
           + bhh_ref[0]).reshape(B, 1, 1, H)
    pre = a_c + b_c + g_c                                # (B, L, L, H)

    # LayerNorm over the hidden dim + ELU (dropout is identity in eval mode).
    mu = jnp.mean(pre, axis=-1, keepdims=True)
    var = jnp.mean((pre - mu) ** 2, axis=-1, keepdims=True)
    xn = (pre - mu) * lax.rsqrt(var + 1e-5)
    xn = xn * gamma_ref[0] + beta_ref[0]
    act = jnp.where(xn > 0, xn, jnp.exp(xn) - 1.0)

    # hid2tag with 128-lane padded tag dim: dense matmul + dense lane store.
    logits = (jnp.dot(act.reshape(B * L * L, H), wtag_ref[0],
                      preferred_element_type=jnp.float32) + btag_ref[0])
    score = pl.reciprocal(1.0 + jnp.exp(-logits), approx=True).reshape(B, L, L, LANES)

    # Pairwise mask built in-kernel from the (B, L) token mask (+ triu for NER only).
    m = mask_ref[...]                                    # (B, L)
    mprod = m[:, :, None] * m[:, None, :]                # (B, L, L)
    ri = lax.broadcasted_iota(jnp.int32, (L, L), 0)
    ci = lax.broadcasted_iota(jnp.int32, (L, L), 1)
    triu = jnp.logical_or(ri <= ci, task != 0).astype(jnp.float32)
    score_ref[0] = score * (mprod * triu[None, :, :])[:, :, :, None]


def run_pair(packed, mask_b, pk):
    _, B, L, _ = packed.shape
    H = HIDDEN
    task_args = (pk['p_wcat'], pk['p_bn'], pk['p_w12'], pk['p_w3'], pk['p_bhh'],
                 pk['p_gamma'], pk['p_beta'], pk['p_wtag'], pk['p_btag'])
    in_specs = ([_task_spec(packed.shape), _full_spec(mask_b.shape)]
                + [_task_spec(a.shape) for a in task_args])
    out_specs = (pl.BlockSpec((1, B, L, L, LANES), lambda t: (t, 0, 0, 0, 0)),
                 pl.BlockSpec((1, B, L, H), lambda t: (t, 0, 0, 0)))
    return pl.pallas_call(
        pair_kernel,
        out_shape=(jax.ShapeDtypeStruct((2, B, L, L, LANES), jnp.float32),
                   jax.ShapeDtypeStruct((2, B, L, H), jnp.float32)),
        grid=(2,),
        in_specs=in_specs,
        out_specs=out_specs,
        compiler_params=pltpu.CompilerParams(dimension_semantics=("parallel",)),
    )(packed, mask_b, *task_args)


# ----------------------------------------------------------------------------
# Parameter packing (done ONCE at load time) + full forward
# ----------------------------------------------------------------------------
def pack_params(params):
    H = HIDDEN
    pk = {}
    # encoder weights
    pk['w_in'] = params['enc_w_in'].T                                        # (In, 5H)
    pk['b5'] = (params['enc_b_in'] + params['enc_b_hid']).reshape(1, 5 * H)  # (1, 5H)
    pk['w_hid'] = (params['enc_w_hid'] * (1.0 - DROPCONNECT)).T              # (H, 5H)
    pk['w_tr'] = params['enc_w_tr'].T                                        # (3H, H)
    pk['b_tr'] = params['enc_b_tr'].reshape(1, H)

    # fused [block-sum | block-cumsum] matrix for the 4 cumsoftmax gate blocks
    H4 = 4 * H
    i = np.arange(H4)[:, None]
    j = np.arange(2 * H4)[None, :]
    jj = j % H4
    same_block = (i // H) == (jj // H)
    keep = (j < H4) | ((i % H) <= (jj % H))
    pk['m_sumcum'] = jnp.asarray((same_block & keep).astype(np.float32))     # (4H, 8H)

    # pair-scorer weights, stacked per task: index 0 = NER, index 1 = RE
    def per_task(fn):
        return jnp.stack([fn('ner', N_NER), fn('re', N_REL)])

    pk['p_wcat'] = per_task(lambda p, n: params[p + '_w_n'].T)               # (2, 2H, H)
    pk['p_bn'] = per_task(lambda p, n: params[p + '_b_n'].reshape(1, H))

    def _w12(p, n):
        whh = params[p + '_w_hh']
        return jnp.concatenate([whh[:, :H].T, whh[:, H:2 * H].T], axis=1)    # (H, 2H)
    pk['p_w12'] = per_task(_w12)
    pk['p_w3'] = per_task(lambda p, n: params[p + '_w_hh'][:, 2 * H:].T)     # (2, H, H)
    pk['p_bhh'] = per_task(lambda p, n: params[p + '_b_hh'].reshape(1, H))
    pk['p_gamma'] = per_task(lambda p, n: params[p + '_ln_g'].reshape(1, H))
    pk['p_beta'] = per_task(lambda p, n: params[p + '_ln_b'].reshape(1, H))

    def _wtag(p, n):
        w = params[p + '_w_tag']                                             # (n, H)
        return jnp.zeros((LANES, H), jnp.float32).at[:n, :].set(w).T         # (H, 128)
    pk['p_wtag'] = per_task(_wtag)

    def _btag(p, n):
        return jnp.zeros((1, LANES), jnp.float32).at[0, :n].set(params[p + '_b_tag'])
    pk['p_btag'] = per_task(_btag)
    return pk


@jax.jit
def pfn_forward(x_emb, mask, pk):
    packed = run_encoder(x_emb, pk)                       # (2, B, S, 128), batch-major
    mask_b = jnp.transpose(mask, (1, 0))                  # (B, L)
    score_all, g_all = run_pair(packed, mask_b, pk)
    ner_score = jnp.transpose(score_all[0, ..., :N_NER], (1, 2, 0, 3))   # (L, L, B, 5)
    re_score = jnp.transpose(score_all[1, ..., :N_REL], (1, 2, 0, 3))    # (L, L, B, 4)
    re_global = jnp.transpose(g_all[1], (1, 0, 2))                        # (L, B, H)
    return ner_score, re_score, re_global


# ----------------------------------------------------------------------------
# Pure-JAX reference (mirrors the PyTorch code) for a correctness check
# ----------------------------------------------------------------------------
def ref_encoder(x, params):
    S, B, _ = x.shape
    H = HIDDEN
    w_in, b_in = params['enc_w_in'], params['enc_b_in']
    w_hid = params['enc_w_hid'] * (1.0 - DROPCONNECT)
    b_hid = params['enc_b_hid']
    w_tr, b_tr = params['enc_w_tr'], params['enc_b_tr']
    csm = lambda v: jnp.cumsum(jax.nn.softmax(v, -1), -1)
    h = jnp.zeros((B, H)); c_prev = jnp.zeros((B, H))
    hn, hr, hs = [], [], []
    for t in range(S):
        gates = x[t] @ w_in.T + b_in + h @ w_hid.T + b_hid
        c_g, eg_cin, rg_cin, eg_c, rg_c = jnp.split(gates, 5, axis=1)
        eg_cin = 1 - csm(eg_cin); rg_cin = csm(rg_cin)
        eg_c = 1 - csm(eg_c); rg_c = csm(rg_c)
        c = jnp.tanh(c_g)
        overlap_c = rg_c * eg_c; upper_c = rg_c - overlap_c; downer_c = eg_c - overlap_c
        overlap_cin = rg_cin * eg_cin; upper_cin = rg_cin - overlap_cin; downer_cin = eg_cin - overlap_cin
        share = overlap_cin * c_prev + overlap_c * c
        c_re = upper_cin * c_prev + upper_c * c + share
        c_ner = downer_cin * c_prev + downer_c * c + share
        hn.append(jnp.tanh(c_ner)); hr.append(jnp.tanh(c_re)); hs.append(jnp.tanh(share))
        c_out = jnp.concatenate([c_re, c_ner, share], -1) @ w_tr.T + b_tr
        h = jnp.tanh(c_out); c_prev = c_out
    return jnp.stack(hn), jnp.stack(hr), jnp.stack(hs)


def ref_pair(h_task, h_share, mask, prefix, params, n_tags, use_diag):
    L, B, H = h_task.shape
    w_n, b_n = params[prefix + '_w_n'], params[prefix + '_b_n']
    whh, bhh = params[prefix + '_w_hh'], params[prefix + '_b_hh']
    gam, bet = params[prefix + '_ln_g'], params[prefix + '_ln_b']
    wt, btag = params[prefix + '_w_tag'], params[prefix + '_b_tag']
    hg = jnp.tanh(jnp.concatenate([h_share, h_task], -1) @ w_n.T + b_n)
    h_global = jnp.max(hg, axis=0)
    hg4 = jnp.broadcast_to(h_global[None, None], (L, L, B, H))
    st = jnp.broadcast_to(h_task[:, None], (L, L, B, H))
    en = jnp.broadcast_to(h_task[None, :], (L, L, B, H))
    z = jnp.concatenate([st, en, hg4], -1) @ whh.T + bhh
    mu = z.mean(-1, keepdims=True); var = ((z - mu) ** 2).mean(-1, keepdims=True)
    z = (z - mu) / jnp.sqrt(var + 1e-5) * gam + bet
    z = jnp.where(z > 0, z, jnp.exp(z) - 1.0)
    s = jax.nn.sigmoid(z @ wt.T + btag)
    mprod = mask[:, None, :] * mask[None, :, :]
    if use_diag:
        mprod = mprod * jnp.triu(jnp.ones((L, L), jnp.float32))[:, :, None]
    return s * mprod[..., None], hg


# ----------------------------------------------------------------------------
# Deterministic parameter init (synthetic; no checkpoint loading)
# ----------------------------------------------------------------------------
def init_params(key):
    H, In = HIDDEN, INPUT
    ks = list(jax.random.split(key, 20))
    u = lambda k, shape, s=0.2: jax.random.uniform(k, shape, jnp.float32, -s, s)
    p = {}
    p['enc_w_in'] = u(ks[0], (5 * H, In))
    p['enc_b_in'] = u(ks[1], (5 * H,))
    p['enc_w_hid'] = u(ks[2], (5 * H, H))
    p['enc_b_hid'] = u(ks[3], (5 * H,))
    p['enc_w_tr'] = u(ks[4], (H, 3 * H))
    p['enc_b_tr'] = u(ks[5], (H,))

    def pair_params(prefix, n_tags, off):
        p[prefix + '_w_n'] = u(ks[off], (H, 2 * H))
        p[prefix + '_b_n'] = u(ks[off + 1], (H,))
        p[prefix + '_w_hh'] = u(ks[off + 2], (H, 3 * H))
        p[prefix + '_b_hh'] = u(ks[off + 3], (H,))
        p[prefix + '_ln_g'] = jnp.ones((H,), jnp.float32)
        p[prefix + '_ln_b'] = jnp.zeros((H,), jnp.float32)
        p[prefix + '_w_tag'] = u(ks[off + 4], (n_tags, H))
        p[prefix + '_b_tag'] = u(ks[off + 5], (n_tags,))

    pair_params('ner', N_NER, 6)
    pair_params('re', N_REL, 12)
    return p


if __name__ == "__main__":
    key = jax.random.PRNGKey(0)
    kp, kx, km = jax.random.split(key, 3)
    params = init_params(kp)
    packed = pack_params(params)     # weight repacking done once, not per forward

    # Synthetic "BERT embeddings", already time-major (seq, batch, input_size).
    x_emb = jax.random.normal(kx, (SEQ, BATCH, INPUT), jnp.float32)
    # Token mask, shape (seq, batch) as used by ner_unit / re_unit.
    mask = (jax.random.uniform(km, (SEQ, BATCH)) > 0.2).astype(jnp.float32)

    ner_score, re_score, re_global = pfn_forward(x_emb, mask, packed)
    jax.block_until_ready((ner_score, re_score, re_global))

    # correctness check against a pure-JAX reference of the PyTorch forward
    hn_r, hr_r, hs_r = ref_encoder(x_emb, params)
    ner_r, _ = ref_pair(hn_r, hs_r, mask, 'ner', params, N_NER, use_diag=True)
    re_r, reg_r = ref_pair(hr_r, hs_r, mask, 're', params, N_REL, use_diag=False)
    np.testing.assert_allclose(np.asarray(ner_score), np.asarray(ner_r), rtol=3e-3, atol=3e-3)
    np.testing.assert_allclose(np.asarray(re_score), np.asarray(re_r), rtol=3e-3, atol=3e-3)
    np.testing.assert_allclose(np.asarray(re_global), np.asarray(reg_r), rtol=3e-3, atol=3e-3)

    print("KERNEL_OK")
</pallas_src>

<mosaic_0001>
module attributes {stable_mosaic.version = 11 : i64} {
  func.func @pair_kernel(%arg0: i32, %arg1: memref<1x2x8x128xf32, #tpu.memory_space<vmem>>, %arg2: memref<2x8xf32, #tpu.memory_space<vmem>>, %arg3: memref<1x64x32xf32, #tpu.memory_space<vmem>>, %arg4: memref<1x1x32xf32, #tpu.memory_space<vmem>>, %arg5: memref<1x32x64xf32, #tpu.memory_space<vmem>>, %arg6: memref<1x32x32xf32, #tpu.memory_space<vmem>>, %arg7: memref<1x1x32xf32, #tpu.memory_space<vmem>>, %arg8: memref<1x1x32xf32, #tpu.memory_space<vmem>>, %arg9: memref<1x1x32xf32, #tpu.memory_space<vmem>>, %arg10: memref<1x32x128xf32, #tpu.memory_space<vmem>>, %arg11: memref<1x1x128xf32, #tpu.memory_space<vmem>>, %arg12: memref<1x2x8x8x128xf32, #tpu.memory_space<vmem>>, %arg13: memref<1x2x8x32xf32, #tpu.memory_space<vmem>>) attributes {dimension_semantics = [#tpu.dimension_semantics<parallel>], iteration_bounds = array<i64: 2>, scalar_prefetch = 0 : i64, scratch_operands = 0 : i64, tpu.core_type = #tpu.core_type<tc>, window_params = [{transform_indices = @transform_0, window_bounds = array<i64: 1, 2, 8, 128>}, {pipeline_mode = #tpu.pipeline_mode<synchronous>, transform_indices = @transform_1, window_bounds = array<i64: 2, 8>}, {transform_indices = @transform_2, window_bounds = array<i64: 1, 64, 32>}, {transform_indices = @transform_3, window_bounds = array<i64: 1, 1, 32>}, {transform_indices = @transform_4, window_bounds = array<i64: 1, 32, 64>}, {transform_indices = @transform_5, window_bounds = array<i64: 1, 32, 32>}, {transform_indices = @transform_6, window_bounds = array<i64: 1, 1, 32>}, {transform_indices = @transform_7, window_bounds = array<i64: 1, 1, 32>}, {transform_indices = @transform_8, window_bounds = array<i64: 1, 1, 32>}, {transform_indices = @transform_9, window_bounds = array<i64: 1, 32, 128>}, {transform_indices = @transform_10, window_bounds = array<i64: 1, 1, 128>}, {transform_indices = @transform_11, window_bounds = array<i64: 1, 2, 8, 8, 128>}, {transform_indices = @transform_12, window_bounds = array<i64: 1, 2, 8, 32>}]} {
    %c0 = arith.constant 0 : index
    %c0_0 = arith.constant 0 : index
    %c0_1 = arith.constant 0 : index
    %c0_2 = arith.constant 0 : index
    %0 = vector.load %arg1[%c0, %c0_0, %c0_1, %c0_2] : memref<1x2x8x128xf32, #tpu.memory_space<vmem>>, vector<1x2x8x128xf32>
    %1 = vector.shape_cast %0 : vector<1x2x8x128xf32> to vector<2x8x128xf32>
    %2 = vector.extract_strided_slice %1 {offsets = [0, 0, 0], sizes = [2, 8, 64], strides = [1, 1, 1]} : vector<2x8x128xf32> to vector<2x8x64xf32>
    %3 = vector.shape_cast %2 : vector<2x8x64xf32> to vector<16x64xf32>
    %4 = vector.extract_strided_slice %1 {offsets = [0, 0, 32], sizes = [2, 8, 32], strides = [1, 1, 1]} : vector<2x8x128xf32> to vector<2x8x32xf32>
    %5 = vector.shape_cast %4 : vector<2x8x32xf32> to vector<16x32xf32>
    %c0_3 = arith.constant 0 : index
    %c0_4 = arith.constant 0 : index
    %c0_5 = arith.constant 0 : index
    %6 = vector.load %arg3[%c0_3, %c0_4, %c0_5] : memref<1x64x32xf32, #tpu.memory_space<vmem>>, vector<1x64x32xf32>
    %7 = vector.shape_cast %6 : vector<1x64x32xf32> to vector<64x32xf32>
    %cst = arith.constant dense<0.000000e+00> : vector<16x32xf32>
    %8 = tpu.matmul %3, %7, %cst {dimension_numbers = #tpu.dot_dimension_numbers<[1], [0], [0], [1], [0, 0, 1, 1], [], []>} : vector<16x64xf32>, vector<64x32xf32>, vector<16x32xf32> -> vector<16x32xf32>
    %c0_6 = arith.constant 0 : index
    %c0_7 = arith.constant 0 : index
    %c0_8 = arith.constant 0 : index
    %9 = vector.load %arg4[%c0_6, %c0_7, %c0_8] : memref<1x1x32xf32, #tpu.memory_space<vmem>>, vector<1x1x32xf32>
    %10 = vector.shape_cast %9 : vector<1x1x32xf32> to vector<1x32xf32>
    %11 = vector.broadcast %10 : vector<1x32xf32> to vector<16x32xf32>
    %12 = arith.addf %8, %11 : vector<16x32xf32>
    %13 = math.tanh %12 : vector<16x32xf32>
    %14 = vector.shape_cast %13 : vector<16x32xf32> to vector<2x8x32xf32>
    %c0_9 = arith.constant 0 : index
    %c0_10 = arith.constant 0 : index
    %c0_11 = arith.constant 0 : index
    %c0_12 = arith.constant 0 : index
    %15 = vector.load %arg13[%c0_9, %c0_10, %c0_11, %c0_12] : memref<1x2x8x32xf32, #tpu.memory_space<vmem>>, vector<1x2x8x32xf32>
    %16 = vector.shape_cast %15 : vector<1x2x8x32xf32> to vector<2x8x32xf32>
    %17 = vector.shape_cast %14 : vector<2x8x32xf32> to vector<1x2x8x32xf32>
    tpu.vector_store %arg13[%c0_9, %c0_10, %c0_11, %c0_12], %17 {strides = array<i32>} : memref<1x2x8x32xf32, #tpu.memory_space<vmem>>, vector<1x2x8x32xf32>,
    %cst_13 = arith.constant dense<0xFF800000> : vector<2x32xf32>
    %18 = vector.multi_reduction <maximumf>, %14, %cst_13 [1] : vector<2x8x32xf32> to vector<2x32xf32>
    %c0_14 = arith.constant 0 : index
    %c0_15 = arith.constant 0 : index
    %c0_16 = arith.constant 0 : index
    %19 = vector.load %arg5[%c0_14, %c0_15, %c0_16] : memref<1x32x64xf32, #tpu.memory_space<vmem>>, vector<1x32x64xf32>
    %20 = vector.shape_cast %19 : vector<1x32x64xf32> to vector<32x64xf32>
    %cst_17 = arith.constant dense<0.000000e+00> : vector<16x64xf32>
    %21 = tpu.matmul %5, %20, %cst_17 {dimension_numbers = #tpu.dot_dimension_numbers<[1], [0], [0], [1], [0, 0, 1, 1], [], []>} : vector<16x32xf32>, vector<32x64xf32>, vector<16x64xf32> -> vector<16x64xf32>
    %22 = vector.extract_strided_slice %21 {offsets = [0, 0], sizes = [16, 32], strides = [1, 1]} : vector<16x64xf32> to vector<16x32xf32>
    %23 = vector.shape_cast %22 : vector<16x32xf32> to vector<2x8x1x32xf32>
    %24 = vector.extract_strided_slice %21 {offsets = [0, 32], sizes = [16, 32], strides = [1, 1]} : vector<16x64xf32> to vector<16x32xf32>
    %25 = vector.shape_cast %24 : vector<16x32xf32> to vector<2x1x8x32xf32>
    %c0_18 = arith.constant 0 : index
    %c0_19 = arith.constant 0 : index
    %c0_20 = arith.constant 0 : index
    %26 = vector.load %arg6[%c0_18, %c0_19, %c0_20] : memref<1x32x32xf32, #tpu.memory_space<vmem>>, vector<1x32x32xf32>
    %27 = vector.shape_cast %26 : vector<1x32x32xf32> to vector<32x32xf32>
    %cst_21 = arith.constant dense<0.000000e+00> : vector<2x32xf32>
    %28 = tpu.matmul %18, %27, %cst_21 {dimension_numbers = #tpu.dot_dimension_numbers<[1], [0], [0], [1], [0, 0, 1, 1], [], []>} : vector<2x32xf32>, vector<32x32xf32>, vector<2x32xf32> -> vector<2x32xf32>
    %c0_22 = arith.constant 0 : index
    %c0_23 = arith.constant 0 : index
    %c0_24 = arith.constant 0 : index
    %29 = vector.load %arg7[%c0_22, %c0_23, %c0_24] : memref<1x1x32xf32, #tpu.memory_space<vmem>>, vector<1x1x32xf32>
    %30 = vector.shape_cast %29 : vector<1x1x32xf32> to vector<1x32xf32>
    %31 = vector.broadcast %30 : vector<1x32xf32> to vector<2x32xf32>
    %32 = arith.addf %28, %31 : vector<2x32xf32>
    %33 = vector.shape_cast %32 : vector<2x32xf32> to vector<2x1x1x32xf32>
    %34 = vector.broadcast %23 : vector<2x8x1x32xf32> to vector<2x8x8x32xf32>
    %35 = vector.broadcast %25 : vector<2x1x8x32xf32> to vector<2x8x8x32xf32>
    %36 = arith.addf %34, %35 : vector<2x8x8x32xf32>
    %37 = vector.broadcast %33 : vector<2x1x1x32xf32> to vector<2x8x8x32xf32>
    %38 = arith.addf %36, %37 : vector<2x8x8x32xf32>
    %cst_25 = arith.constant dense<0.000000e+00> : vector<2x8x8xf32>
    %39 = vector.multi_reduction <add>, %38, %cst_25 [3] : vector<2x8x8x32xf32> to vector<2x8x8xf32>
    %40 = vector.shape_cast %39 : vector<2x8x8xf32> to vector<2x8x8x1xf32>
    %cst_26 = arith.constant 3.200000e+01 : f32
    %41 = vector.broadcast %cst_26 : f32 to vector<2x8x8x1xf32>
    %42 = arith.divf %40, %41 : vector<2x8x8x1xf32>
    %43 = vector.broadcast %42 : vector<2x8x8x1xf32> to vector<2x8x8x32xf32>
    %44 = arith.subf %38, %43 : vector<2x8x8x32xf32>
    %45 = arith.mulf %44, %44 : vector<2x8x8x32xf32>
    %cst_27 = arith.constant dense<0.000000e+00> : vector<2x8x8xf32>
    %46 = vector.multi_reduction <add>, %45, %cst_27 [3] : vector<2x8x8x32xf32> to vector<2x8x8xf32>
    %47 = vector.shape_cast %46 : vector<2x8x8xf32> to vector<2x8x8x1xf32>
    %cst_28 = arith.constant 3.200000e+01 : f32
    %48 = vector.broadcast %cst_28 : f32 to vector<2x8x8x1xf32>
    %49 = arith.divf %47, %48 : vector<2x8x8x1xf32>
    %50 = vector.broadcast %42 : vector<2x8x8x1xf32> to vector<2x8x8x32xf32>
    %51 = arith.subf %38, %50 : vector<2x8x8x32xf32>
    %cst_29 = arith.constant 9.99999974E-6 : f32
    %52 = vector.broadcast %cst_29 : f32 to vector<2x8x8x1xf32>
    %53 = arith.addf %49, %52 : vector<2x8x8x1xf32>
    %54 = math.rsqrt %53 : vector<2x8x8x1xf32>
    %55 = vector.broadcast %54 : vector<2x8x8x1xf32> to vector<2x8x8x32xf32>
    %56 = arith.mulf %51, %55 : vector<2x8x8x32xf32>
    %c0_30 = arith.constant 0 : index
    %c0_31 = arith.constant 0 : index
    %c0_32 = arith.constant 0 : index
    %57 = vector.load %arg8[%c0_30, %c0_31, %c0_32] : memref<1x1x32xf32, #tpu.memory_space<vmem>>, vector<1x1x32xf32>
    %58 = vector.shape_cast %57 : vector<1x1x32xf32> to vector<1x32xf32>
    %59 = vector.shape_cast %58 : vector<1x32xf32> to vector<1x1x1x32xf32>
    %60 = vector.broadcast %59 : vector<1x1x1x32xf32> to vector<2x8x8x32xf32>
    %61 = arith.mulf %56, %60 : vector<2x8x8x32xf32>
    %c0_33 = arith.constant 0 : index
    %c0_34 = arith.constant 0 : index
    %c0_35 = arith.constant 0 : index
    %62 = vector.load %arg9[%c0_33, %c0_34, %c0_35] : memref<1x1x32xf32, #tpu.memory_space<vmem>>, vector<1x1x32xf32>
    %63 = vector.shape_cast %62 : vector<1x1x32xf32> to vector<1x32xf32>
    %64 = vector.shape_cast %63 : vector<1x32xf32> to vector<1x1x1x32xf32>
    %65 = vector.broadcast %64 : vector<1x1x1x32xf32> to vector<2x8x8x32xf32>
    %66 = arith.addf %61, %65 : vector<2x8x8x32xf32>
    %cst_36 = arith.constant 0.000000e+00 : f32
    %67 = vector.broadcast %cst_36 : f32 to vector<2x8x8x32xf32>
    %68 = arith.cmpf ogt, %66, %67 : vector<2x8x8x32xf32>
    %69 = math.exp %66 : vector<2x8x8x32xf32>
    %cst_37 = arith.constant 1.000000e+00 : f32
    %70 = vector.broadcast %cst_37 : f32 to vector<2x8x8x32xf32>
    %71 = arith.subf %69, %70 : vector<2x8x8x32xf32>
    %72 = arith.select %68, %66, %71 : vector<2x8x8x32xi1>, vector<2x8x8x32xf32>
    %73 = vector.shape_cast %72 : vector<2x8x8x32xf32> to vector<128x32xf32>
    %c0_38 = arith.constant 0 : index
    %c0_39 = arith.constant 0 : index
    %c0_40 = arith.constant 0 : index
    %74 = vector.load %arg10[%c0_38, %c0_39, %c0_40] : memref<1x32x128xf32, #tpu.memory_space<vmem>>, vector<1x32x128xf32>
    %75 = vector.shape_cast %74 : vector<1x32x128xf32> to vector<32x128xf32>
    %cst_41 = arith.constant dense<0.000000e+00> : vector<128x128xf32>
    %76 = tpu.matmul %73, %75, %cst_41 {dimension_numbers = #tpu.dot_dimension_numbers<[1], [0], [0], [1], [0, 0, 1, 1], [], []>} : vector<128x32xf32>, vector<32x128xf32>, vector<128x128xf32> -> vector<128x128xf32>
    %c0_42 = arith.constant 0 : index
    %c0_43 = arith.constant 0 : index
    %c0_44 = arith.constant 0 : index
    %77 = vector.load %arg11[%c0_42, %c0_43, %c0_44] : memref<1x1x128xf32, #tpu.memory_space<vmem>>, vector<1x1x128xf32>
    %78 = vector.shape_cast %77 : vector<1x1x128xf32> to vector<1x128xf32>
    %79 = vector.broadcast %78 : vector<1x128xf32> to vector<128x128xf32>
    %80 = arith.addf %76, %79 : vector<128x128xf32>
    %cst_45 = arith.constant 0.000000e+00 : f32
    %81 = vector.broadcast %cst_45 : f32 to vector<128x128xf32>
    %82 = arith.subf %81, %80 : vector<128x128xf32>
    %83 = math.exp %82 : vector<128x128xf32>
    %cst_46 = arith.constant 1.000000e+00 : f32
    %84 = vector.broadcast %cst_46 : f32 to vector<128x128xf32>
    %85 = arith.addf %84, %83 : vector<128x128xf32>
    %86 = tpu.reciprocal %85 {approx = true} : vector<128x128xf32> -> vector<128x128xf32>
    %87 = vector.shape_cast %86 : vector<128x128xf32> to vector<2x8x8x128xf32>
    %c0_47 = arith.constant 0 : index
    %c0_48 = arith.constant 0 : index
    %88 = vector.load %arg2[%c0_47, %c0_48] : memref<2x8xf32, #tpu.memory_space<vmem>>, vector<2x8xf32>
    %89 = vector.shape_cast %88 : vector<2x8xf32> to vector<2x8x1xf32>
    %90 = vector.shape_cast %88 : vector<2x8xf32> to vector<2x1x8xf32>
    %91 = vector.broadcast %89 : vector<2x8x1xf32> to vector<2x8x8xf32>
    %92 = vector.broadcast %90 : vector<2x1x8xf32> to vector<2x8x8xf32>
    %93 = arith.mulf %91, %92 : vector<2x8x8xf32>
    %94 = tpu.iota {dimensions = array<i32: 0>} : vector<8x8xi32>
    %95 = tpu.iota {dimensions = array<i32: 1>} : vector<8x8xi32>
    %96 = arith.cmpi sle, %94, %95 : vector<8x8xi32>
    %c0_i32 = arith.constant 0 : i32
    %97 = arith.cmpi ne, %arg0, %c0_i32 : i32
    %98 = vector.broadcast %97 : i1 to vector<8x8xi1>
    %99 = arith.ori %96, %98 : vector<8x8xi1>
    %100 = arith.extui %99 : vector<8x8xi1> to vector<8x8xi32>
    %101 = arith.sitofp %100 : vector<8x8xi32> to vector<8x8xf32>
    %102 = vector.shape_cast %101 : vector<8x8xf32> to vector<1x8x8xf32>
    %103 = vector.broadcast %102 : vector<1x8x8xf32> to vector<2x8x8xf32>
    %104 = arith.mulf %93, %103 : vector<2x8x8xf32>
    %105 = vector.shape_cast %104 : vector<2x8x8xf32> to vector<2x8x8x1xf32>
    %106 = vector.broadcast %105 : vector<2x8x8x1xf32> to vector<2x8x8x128xf32>
    %107 = arith.mulf %87, %106 : vector<2x8x8x128xf32>
    %c0_49 = arith.constant 0 : index
    %c0_50 = arith.constant 0 : index
    %c0_51 = arith.constant 0 : index
    %c0_52 = arith.constant 0 : index
    %c0_53 = arith.constant 0 : index
    %108 = vector.load %arg12[%c0_49, %c0_50, %c0_51, %c0_52, %c0_53] : memref<1x2x8x8x128xf32, #tpu.memory_space<vmem>>, vector<1x2x8x8x128xf32>
    %109 = vector.shape_cast %108 : vector<1x2x8x8x128xf32> to vector<2x8x8x128xf32>
    %110 = vector.shape_cast %107 : vector<2x8x8x128xf32> to vector<1x2x8x8x128xf32>
    tpu.vector_store %arg12[%c0_49, %c0_50, %c0_51, %c0_52, %c0_53], %110 {strides = array<i32>} : memref<1x2x8x8x128xf32, #tpu.memory_space<vmem>>, vector<1x2x8x8x128xf32>,
    return
  }
  func.func @transform_0(%arg0: i32) -> (i32, i32, i32, i32) {
    %c0_i32 = arith.constant 0 : i32
    %c0_i32_0 = arith.constant 0 : i32
    %c0_i32_1 = arith.constant 0 : i32
    %c0_i32_2 = arith.constant 0 : i32
    return %arg0, %c0_i32, %c0_i32_0, %c0_i32_1 : i32, i32, i32, i32
  }
  func.func @transform_1(%arg0: i32) -> (i32, i32) {
    %c0_i32 = arith.constant 0 : i32
    %c0_i32_0 = arith.constant 0 : i32
    %c0_i32_1 = arith.constant 0 : i32
    return %c0_i32, %c0_i32_0 : i32, i32
  }
  func.func @transform_2(%arg0: i32) -> (i32, i32, i32) {
    %c0_i32 = arith.constant 0 : i32
    %c0_i32_0 = arith.constant 0 : i32
    %c0_i32_1 = arith.constant 0 : i32
    return %arg0, %c0_i32, %c0_i32_0 : i32, i32, i32
  }
  func.func @transform_3(%arg0: i32) -> (i32, i32, i32) {
    %c0_i32 = arith.constant 0 : i32
    %c0_i32_0 = arith.constant 0 : i32
    %c0_i32_1 = arith.constant 0 : i32
    return %arg0, %c0_i32, %c0_i32_0 : i32, i32, i32
  }
  func.func @transform_4(%arg0: i32) -> (i32, i32, i32) {
    %c0_i32 = arith.constant 0 : i32
    %c0_i32_0 = arith.constant 0 : i32
    %c0_i32_1 = arith.constant 0 : i32
    return %arg0, %c0_i32, %c0_i32_0 : i32, i32, i32
  }
  func.func @transform_5(%arg0: i32) -> (i32, i32, i32) {
    %c0_i32 = arith.constant 0 : i32
    %c0_i32_0 = arith.constant 0 : i32
    %c0_i32_1 = arith.constant 0 : i32
    return %arg0, %c0_i32, %c0_i32_0 : i32, i32, i32
  }
  func.func @transform_6(%arg0: i32) -> (i32, i32, i32) {
    %c0_i32 = arith.constant 0 : i32
    %c0_i32_0 = arith.constant 0 : i32
    %c0_i32_1 = arith.constant 0 : i32
    return %arg0, %c0_i32, %c0_i32_0 : i32, i32, i32
  }
  func.func @transform_7(%arg0: i32) -> (i32, i32, i32) {
    %c0_i32 = arith.constant 0 : i32
    %c0_i32_0 = arith.constant 0 : i32
    %c0_i32_1 = arith.constant 0 : i32
    return %arg0, %c0_i32, %c0_i32_0 : i32, i32, i32
  }
  func.func @transform_8(%arg0: i32) -> (i32, i32, i32) {
    %c0_i32 = arith.constant 0 : i32
    %c0_i32_0 = arith.constant 0 : i32
    %c0_i32_1 = arith.constant 0 : i32
    return %arg0, %c0_i32, %c0_i32_0 : i32, i32, i32
  }
  func.func @transform_9(%arg0: i32) -> (i32, i32, i32) {
    %c0_i32 = arith.constant 0 : i32
    %c0_i32_0 = arith.constant 0 : i32
    %c0_i32_1 = arith.constant 0 : i32
    return %arg0, %c0_i32, %c0_i32_0 : i32, i32, i32
  }
  func.func @transform_10(%arg0: i32) -> (i32, i32, i32) {
    %c0_i32 = arith.constant 0 : i32
    %c0_i32_0 = arith.constant 0 : i32
    %c0_i32_1 = arith.constant 0 : i32
    return %arg0, %c0_i32, %c0_i32_0 : i32, i32, i32
  }
  func.func @transform_11(%arg0: i32) -> (i32, i32, i32, i32, i32) {
    %c0_i32 = arith.constant 0 : i32
    %c0_i32_0 = arith.constant 0 : i32
    %c0_i32_1 = arith.constant 0 : i32
    %c0_i32_2 = arith.constant 0 : i32
    %c0_i32_3 = arith.constant 0 : i32
    return %arg0, %c0_i32, %c0_i32_0, %c0_i32_1, %c0_i32_2 : i32, i32, i32, i32, i32
  }
  func.func @transform_12(%arg0: i32) -> (i32, i32, i32, i32) {
    %c0_i32 = arith.constant 0 : i32
    %c0_i32_0 = arith.constant 0 : i32
    %c0_i32_1 = arith.constant 0 : i32
    %c0_i32_2 = arith.constant 0 : i32
    return %arg0, %c0_i32, %c0_i32_0, %c0_i32_1 : i32, i32, i32, i32
  }
}

module attributes {stable_mosaic.version = 11 : i64} {
  func.func @encoder_kernel(%arg0: i32, %arg1: memref<8x2x32xf32, #tpu.memory_space<vmem>>, %arg2: memref<32x160xf32, #tpu.memory_space<vmem>>, %arg3: memref<1x160xf32, #tpu.memory_space<vmem>>, %arg4: memref<32x160xf32, #tpu.memory_space<vmem>>, %arg5: memref<96x32xf32, #tpu.memory_space<vmem>>, %arg6: memref<1x32xf32, #tpu.memory_space<vmem>>, %arg7: memref<128x256xf32, #tpu.memory_space<vmem>>, %arg8: memref<2x2x8x128xf32, #tpu.memory_space<vmem>>) attributes {dimension_semantics = [#tpu.dimension_semantics<arbitrary>], iteration_bounds = array<i64: 1>, scalar_prefetch = 0 : i64, scratch_operands = 0 : i64, tpu.core_type = #tpu.core_type<tc>, window_params = [{pipeline_mode = #tpu.pipeline_mode<synchronous>, transform_indices = @transform_0, window_bounds = array<i64: 8, 2, 32>}, {pipeline_mode = #tpu.pipeline_mode<synchronous>, transform_indices = @transform_1, window_bounds = array<i64: 32, 160>}, {pipeline_mode = #tpu.pipeline_mode<synchronous>, transform_indices = @transform_2, window_bounds = array<i64: 1, 160>}, {pipeline_mode = #tpu.pipeline_mode<synchronous>, transform_indices = @transform_3, window_bounds = array<i64: 32, 160>}, {pipeline_mode = #tpu.pipeline_mode<synchronous>, transform_indices = @transform_4, window_bounds = array<i64: 96, 32>}, {pipeline_mode = #tpu.pipeline_mode<synchronous>, transform_indices = @transform_5, window_bounds = array<i64: 1, 32>}, {pipeline_mode = #tpu.pipeline_mode<synchronous>, transform_indices = @transform_6, window_bounds = array<i64: 128, 256>}, {pipeline_mode = #tpu.pipeline_mode<synchronous>, transform_indices = @transform_7, window_bounds = array<i64: 2, 2, 8, 128>}]} {
    %c0 = arith.constant 0 : index
    %c0_0 = arith.constant 0 : index
    %c0_1 = arith.constant 0 : index
    %0 = vector.load %arg1[%c0, %c0_0, %c0_1] : memref<8x2x32xf32, #tpu.memory_space<vmem>>, vector<8x2x32xf32>
    %1 = vector.shape_cast %0 : vector<8x2x32xf32> to vector<16x32xf32>
    %c0_2 = arith.constant 0 : index
    %c0_3 = arith.constant 0 : index
    %2 = vector.load %arg2[%c0_2, %c0_3] : memref<32x160xf32, #tpu.memory_space<vmem>>, vector<32x160xf32>
    %cst = arith.constant dense<0.000000e+00> : vector<16x160xf32>
    %3 = tpu.matmul %1, %2, %cst {dimension_numbers = #tpu.dot_dimension_numbers<[1], [0], [0], [1], [0, 0, 1, 1], [], []>} : vector<16x32xf32>, vector<32x160xf32>, vector<16x160xf32> -> vector<16x160xf32>
    %c0_4 = arith.constant 0 : index
    %c0_5 = arith.constant 0 : index
    %4 = vector.load %arg3[%c0_4, %c0_5] : memref<1x160xf32, #tpu.memory_space<vmem>>, vector<1x160xf32>
    %5 = vector.broadcast %4 : vector<1x160xf32> to vector<16x160xf32>
    %6 = arith.addf %3, %5 : vector<16x160xf32>
    %7 = vector.shape_cast %6 : vector<16x160xf32> to vector<8x2x160xf32>
    %c0_6 = arith.constant 0 : index
    %c0_7 = arith.constant 0 : index
    %8 = vector.load %arg4[%c0_6, %c0_7] : memref<32x160xf32, #tpu.memory_space<vmem>>, vector<32x160xf32>
    %c0_8 = arith.constant 0 : index
    %c0_9 = arith.constant 0 : index
    %9 = vector.load %arg5[%c0_8, %c0_9] : memref<96x32xf32, #tpu.memory_space<vmem>>, vector<96x32xf32>
    %c0_10 = arith.constant 0 : index
    %c0_11 = arith.constant 0 : index
    %10 = vector.load %arg6[%c0_10, %c0_11] : memref<1x32xf32, #tpu.memory_space<vmem>>, vector<1x32xf32>
    %c0_12 = arith.constant 0 : index
    %c0_13 = arith.constant 0 : index
    %11 = vector.load %arg7[%c0_12, %c0_13] : memref<128x256xf32, #tpu.memory_space<vmem>>, vector<128x256xf32>
    %cst_14 = arith.constant 0.000000e+00 : f32
    %12 = vector.broadcast %cst_14 : f32 to vector<2x64xf32>
    %cst_15 = arith.constant 0.000000e+00 : f32
    %13 = vector.broadcast %cst_15 : f32 to vector<2x32xf32>
    %cst_16 = arith.constant 0.000000e+00 : f32
    %14 = vector.broadcast %cst_16 : f32 to vector<2x32xf32>
    %15 = vector.extract_strided_slice %7 {offsets = [0, 0, 0], sizes = [1, 2, 160], strides = [1, 1, 1]} : vector<8x2x160xf32> to vector<1x2x160xf32>
    %16 = vector.shape_cast %15 : vector<1x2x160xf32> to vector<2x160xf32>
    %cst_17 = arith.constant dense<0.000000e+00> : vector<2x160xf32>
    %17 = tpu.matmul %13, %8, %cst_17 {dimension_numbers = #tpu.dot_dimension_numbers<[1], [0], [0], [1], [0, 0, 1, 1], [], []>} : vector<2x32xf32>, vector<32x160xf32>, vector<2x160xf32> -> vector<2x160xf32>
    %18 = arith.addf %16, %17 : vector<2x160xf32>
    %19 = vector.extract_strided_slice %18 {offsets = [0, 0], sizes = [2, 32], strides = [1, 1]} : vector<2x160xf32> to vector<2x32xf32>
    %20 = vector.extract_strided_slice %18 {offsets = [0, 32], sizes = [2, 128], strides = [1, 1]} : vector<2x160xf32> to vector<2x128xf32>
    %21 = vector.extract_strided_slice %20 {offsets = [0, 0], sizes = [2, 32], strides = [1, 1]} : vector<2x128xf32> to vector<2x32xf32>
    %22 = vector.extract_strided_slice %20 {offsets = [0, 0], sizes = [2, 32], strides = [1, 1]} : vector<2x128xf32> to vector<2x32xf32>
    %cst_18 = arith.constant dense<0xFF800000> : vector<2xf32>
    %23 = vector.multi_reduction <maximumf>, %22, %cst_18 [1] : vector<2x32xf32> to vector<2xf32>
    %24 = vector.shape_cast %23 : vector<2xf32> to vector<2x1xf32>
    %25 = vector.broadcast %24 : vector<2x1xf32> to vector<2x32xf32>
    %26 = arith.subf %21, %25 : vector<2x32xf32>
    %27 = math.exp %26 : vector<2x32xf32>
    %28 = vector.extract_strided_slice %20 {offsets = [0, 32], sizes = [2, 32], strides = [1, 1]} : vector<2x128xf32> to vector<2x32xf32>
    %29 = vector.extract_strided_slice %20 {offsets = [0, 32], sizes = [2, 32], strides = [1, 1]} : vector<2x128xf32> to vector<2x32xf32>
    %cst_19 = arith.constant dense<0xFF800000> : vector<2xf32>
    %30 = vector.multi_reduction <maximumf>, %29, %cst_19 [1] : vector<2x32xf32> to vector<2xf32>
    %31 = vector.shape_cast %30 : vector<2xf32> to vector<2x1xf32>
    %32 = vector.broadcast %31 : vector<2x1xf32> to vector<2x32xf32>
    %33 = arith.subf %28, %32 : vector<2x32xf32>
    %34 = math.exp %33 : vector<2x32xf32>
    %35 = vector.extract_strided_slice %20 {offsets = [0, 64], sizes = [2, 32], strides = [1, 1]} : vector<2x128xf32> to vector<2x32xf32>
    %36 = vector.extract_strided_slice %20 {offsets = [0, 64], sizes = [2, 32], strides = [1, 1]} : vector<2x128xf32> to vector<2x32xf32>
    %cst_20 = arith.constant dense<0xFF800000> : vector<2xf32>
    %37 = vector.multi_reduction <maximumf>, %36, %cst_20 [1] : vector<2x32xf32> to vector<2xf32>
    %38 = vector.shape_cast %37 : vector<2xf32> to vector<2x1xf32>
    %39 = vector.broadcast %38 : vector<2x1xf32> to vector<2x32xf32>
    %40 = arith.subf %35, %39 : vector<2x32xf32>
    %41 = math.exp %40 : vector<2x32xf32>
    %42 = vector.extract_strided_slice %20 {offsets = [0, 96], sizes = [2, 32], strides = [1, 1]} : vector<2x128xf32> to vector<2x32xf32>
    %43 = vector.extract_strided_slice %20 {offsets = [0, 96], sizes = [2, 32], strides = [1, 1]} : vector<2x128xf32> to vector<2x32xf32>
    %cst_21 = arith.constant dense<0xFF800000> : vector<2xf32>
    %44 = vector.multi_reduction <maximumf>, %43, %cst_21 [1] : vector<2x32xf32> to vector<2xf32>
    %45 = vector.shape_cast %44 : vector<2xf32> to vector<2x1xf32>
    %46 = vector.broadcast %45 : vector<2x1xf32> to vector<2x32xf32>
    %47 = arith.subf %42, %46 : vector<2x32xf32>
    %48 = math.exp %47 : vector<2x32xf32>
    %49 = tpu.concatenate %27, %34, %41, %48 in 1 : vector<2x32xf32>, vector<2x32xf32>, vector<2x32xf32>, vector<2x32xf32> -> vector<2x128xf32>
    %cst_22 = arith.constant dense<0.000000e+00> : vector<2x256xf32>
    %50 = tpu.matmul %49, %11, %cst_22 {dimension_numbers = #tpu.dot_dimension_numbers<[1], [0], [0], [1], [0, 0, 1, 1], [], []>} : vector<2x128xf32>, vector<128x256xf32>, vector<2x256xf32> -> vector<2x256xf32>
    %51 = vector.extract_strided_slice %50 {offsets = [0, 128], sizes = [2, 128], strides = [1, 1]} : vector<2x256xf32> to vector<2x128xf32>
    %52 = vector.extract_strided_slice %50 {offsets = [0, 0], sizes = [2, 128], strides = [1, 1]} : vector<2x256xf32> to vector<2x128xf32>
    %53 = arith.divf %51, %52 : vector<2x128xf32>
    %54 = vector.extract_strided_slice %53 {offsets = [0, 0], sizes = [2, 32], strides = [1, 1]} : vector<2x128xf32> to vector<2x32xf32>
    %cst_23 = arith.constant 1.000000e+00 : f32
    %55 = vector.broadcast %cst_23 : f32 to vector<2x32xf32>
    %56 = arith.subf %55, %54 : vector<2x32xf32>
    %57 = vector.extract_strided_slice %53 {offsets = [0, 32], sizes = [2, 32], strides = [1, 1]} : vector<2x128xf32> to vector<2x32xf32>
    %58 = vector.extract_strided_slice %53 {offsets = [0, 64], sizes = [2, 32], strides = [1, 1]} : vector<2x128xf32> to vector<2x32xf32>
    %cst_24 = arith.constant 1.000000e+00 : f32
    %59 = vector.broadcast %cst_24 : f32 to vector<2x32xf32>
    %60 = arith.subf %59, %58 : vector<2x32xf32>
    %61 = vector.extract_strided_slice %53 {offsets = [0, 96], sizes = [2, 32], strides = [1, 1]} : vector<2x128xf32> to vector<2x32xf32>
    %62 = math.tanh %19 : vector<2x32xf32>
    %63 = arith.mulf %61, %60 : vector<2x32xf32>
    %64 = arith.subf %61, %63 : vector<2x32xf32>
    %65 = arith.subf %60, %63 : vector<2x32xf32>
    %66 = arith.mulf %57, %56 : vector<2x32xf32>
    %67 = arith.subf %57, %66 : vector<2x32xf32>
    %68 = arith.subf %56, %66 : vector<2x32xf32>
    %69 = arith.mulf %66, %14 : vector<2x32xf32>
    %70 = arith.mulf %63, %62 : vector<2x32xf32>
    %71 = arith.addf %69, %70 : vector<2x32xf32>
    %72 = arith.mulf %67, %14 : vector<2x32xf32>
    %73 = arith.mulf %64, %62 : vector<2x32xf32>
    %74 = arith.addf %72, %73 : vector<2x32xf32>
    %75 = arith.addf %74, %71 : vector<2x32xf32>
    %76 = arith.mulf %68, %14 : vector<2x32xf32>
    %77 = arith.mulf %65, %62 : vector<2x32xf32>
    %78 = arith.addf %76, %77 : vector<2x32xf32>
    %79 = arith.addf %78, %71 : vector<2x32xf32>
    %80 = math.tanh %71 : vector<2x32xf32>
    %81 = math.tanh %79 : vector<2x32xf32>
    %82 = tpu.concatenate %80, %81, %12 in 1 : vector<2x32xf32>, vector<2x32xf32>, vector<2x64xf32> -> vector<2x128xf32>
    %c0_25 = arith.constant 0 : index
    %c0_26 = arith.constant 0 : index
    %c0_27 = arith.constant 0 : index
    %c0_28 = arith.constant 0 : index
    %83 = vector.load %arg8[%c0_25, %c0_26, %c0_27, %c0_28] : memref<2x2x8x128xf32, #tpu.memory_space<vmem>>, vector<1x2x1x128xf32>
    %84 = vector.shape_cast %83 : vector<1x2x1x128xf32> to vector<2x128xf32>
    %85 = vector.shape_cast %82 : vector<2x128xf32> to vector<1x2x1x128xf32>
    tpu.vector_store %arg8[%c0_25, %c0_26, %c0_27, %c0_28], %85 {strides = array<i32>} : memref<2x2x8x128xf32, #tpu.memory_space<vmem>>, vector<1x2x1x128xf32>,
    %86 = math.tanh %75 : vector<2x32xf32>
    %87 = tpu.concatenate %80, %86, %12 in 1 : vector<2x32xf32>, vector<2x32xf32>, vector<2x64xf32> -> vector<2x128xf32>
    %c1 = arith.constant 1 : index
    %c0_29 = arith.constant 0 : index
    %c0_30 = arith.constant 0 : index
    %c0_31 = arith.constant 0 : index
    %88 = vector.load %arg8[%c1, %c0_29, %c0_30, %c0_31] : memref<2x2x8x128xf32, #tpu.memory_space<vmem>>, vector<1x2x1x128xf32>
    %89 = vector.shape_cast %88 : vector<1x2x1x128xf32> to vector<2x128xf32>
    %90 = vector.shape_cast %87 : vector<2x128xf32> to vector<1x2x1x128xf32>
    tpu.vector_store %arg8[%c1, %c0_29, %c0_30, %c0_31], %90 {strides = array<i32>} : memref<2x2x8x128xf32, #tpu.memory_space<vmem>>, vector<1x2x1x128xf32>,
    %91 = tpu.concatenate %75, %79, %71 in 1 : vector<2x32xf32>, vector<2x32xf32>, vector<2x32xf32> -> vector<2x96xf32>
    %cst_32 = arith.constant dense<0.000000e+00> : vector<2x32xf32>
    %92 = tpu.matmul %91, %9, %cst_32 {dimension_numbers = #tpu.dot_dimension_numbers<[1], [0], [0], [1], [0, 0, 1, 1], [], []>} : vector<2x96xf32>, vector<96x32xf32>, vector<2x32xf32> -> vector<2x32xf32>
    %93 = vector.broadcast %10 : vector<1x32xf32> to vector<2x32xf32>
    %94 = arith.addf %92, %93 : vector<2x32xf32>
    %95 = math.tanh %94 : vector<2x32xf32>
    %96 = vector.extract_strided_slice %7 {offsets = [1, 0, 0], sizes = [1, 2, 160], strides = [1, 1, 1]} : vector<8x2x160xf32> to vector<1x2x160xf32>
    %97 = vector.shape_cast %96 : vector<1x2x160xf32> to vector<2x160xf32>
    %cst_33 = arith.constant dense<0.000000e+00> : vector<2x160xf32>
    %98 = tpu.matmul %95, %8, %cst_33 {dimension_numbers = #tpu.dot_dimension_numbers<[1], [0], [0], [1], [0, 0, 1, 1], [], []>} : vector<2x32xf32>, vector<32x160xf32>, vector<2x160xf32> -> vector<2x160xf32>
    %99 = arith.addf %97, %98 : vector<2x160xf32>
    %100 = vector.extract_strided_slice %99 {offsets = [0, 0], sizes = [2, 32], strides = [1, 1]} : vector<2x160xf32> to vector<2x32xf32>
    %101 = vector.extract_strided_slice %99 {offsets = [0, 32], sizes = [2, 128], strides = [1, 1]} : vector<2x160xf32> to vector<2x128xf32>
    %102 = vector.extract_strided_slice %101 {offsets = [0, 0], sizes = [2, 32], strides = [1, 1]} : vector<2x128xf32> to vector<2x32xf32>
    %103 = vector.extract_strided_slice %101 {offsets = [0, 0], sizes = [2, 32], strides = [1, 1]} : vector<2x128xf32> to vector<2x32xf32>
    %cst_34 = arith.constant dense<0xFF800000> : vector<2xf32>
    %104 = vector.multi_reduction <maximumf>, %103, %cst_34 [1] : vector<2x32xf32> to vector<2xf32>
    %105 = vector.shape_cast %104 : vector<2xf32> to vector<2x1xf32>
    %106 = vector.broadcast %105 : vector<2x1xf32> to vector<2x32xf32>
    %107 = arith.subf %102, %106 : vector<2x32xf32>
    %108 = math.exp %107 : vector<2x32xf32>
    %109 = vector.extract_strided_slice %101 {offsets = [0, 32], sizes = [2, 32], strides = [1, 1]} : vector<2x128xf32> to vector<2x32xf32>
    %110 = vector.extract_strided_slice %101 {offsets = [0, 32], sizes = [2, 32], strides = [1, 1]} : vector<2x128xf32> to vector<2x32xf32>
    %cst_35 = arith.constant dense<0xFF800000> : vector<2xf32>
    %111 = vector.multi_reduction <maximumf>, %110, %cst_35 [1] : vector<2x32xf32> to vector<2xf32>
    %112 = vector.shape_cast %111 : vector<2xf32> to vector<2x1xf32>
    %113 = vector.broadcast %112 : vector<2x1xf32> to vector<2x32xf32>
    %114 = arith.subf %109, %113 : vector<2x32xf32>
    %115 = math.exp %114 : vector<2x32xf32>
    %116 = vector.extract_strided_slice %101 {offsets = [0, 64], sizes = [2, 32], strides = [1, 1]} : vector<2x128xf32> to vector<2x32xf32>
    %117 = vector.extract_strided_slice %101 {offsets = [0, 64], sizes = [2, 32], strides = [1, 1]} : vector<2x128xf32> to vector<2x32xf32>
    %cst_36 = arith.constant dense<0xFF800000> : vector<2xf32>
    %118 = vector.multi_reduction <maximumf>, %117, %cst_36 [1] : vector<2x32xf32> to vector<2xf32>
    %119 = vector.shape_cast %118 : vector<2xf32> to vector<2x1xf32>
    %120 = vector.broadcast %119 : vector<2x1xf32> to vector<2x32xf32>
    %121 = arith.subf %116, %120 : vector<2x32xf32>
    %122 = math.exp %121 : vector<2x32xf32>
    %123 = vector.extract_strided_slice %101 {offsets = [0, 96], sizes = [2, 32], strides = [1, 1]} : vector<2x128xf32> to vector<2x32xf32>
    %124 = vector.extract_strided_slice %101 {offsets = [0, 96], sizes = [2, 32], strides = [1, 1]} : vector<2x128xf32> to vector<2x32xf32>
    %cst_37 = arith.constant dense<0xFF800000> : vector<2xf32>
    %125 = vector.multi_reduction <maximumf>, %124, %cst_37 [1] : vector<2x32xf32> to vector<2xf32>
    %126 = vector.shape_cast %125 : vector<2xf32> to vector<2x1xf32>
    %127 = vector.broadcast %126 : vector<2x1xf32> to vector<2x32xf32>
    %128 = arith.subf %123, %127 : vector<2x32xf32>
    %129 = math.exp %128 : vector<2x32xf32>
    %130 = tpu.concatenate %108, %115, %122, %129 in 1 : vector<2x32xf32>, vector<2x32xf32>, vector<2x32xf32>, vector<2x32xf32> -> vector<2x128xf32>
    %cst_38 = arith.constant dense<0.000000e+00> : vector<2x256xf32>
    %131 = tpu.matmul %130, %11, %cst_38 {dimension_numbers = #tpu.dot_dimension_numbers<[1], [0], [0], [1], [0, 0, 1, 1], [], []>} : vector<2x128xf32>, vector<128x256xf32>, vector<2x256xf32> -> vector<2x256xf32>
    %132 = vector.extract_strided_slice %131 {offsets = [0, 128], sizes = [2, 128], strides = [1, 1]} : vector<2x256xf32> to vector<2x128xf32>
    %133 = vector.extract_strided_slice %131 {offsets = [0, 0], sizes = [2, 128], strides = [1, 1]} : vector<2x256xf32> to vector<2x128xf32>
    %134 = arith.divf %132, %133 : vector<2x128xf32>
    %135 = vector.extract_strided_slice %134 {offsets = [0, 0], sizes = [2, 32], strides = [1, 1]} : vector<2x128xf32> to vector<2x32xf32>
    %cst_39 = arith.constant 1.000000e+00 : f32
    %136 = vector.broadcast %cst_39 : f32 to vector<2x32xf32>
    %137 = arith.subf %136, %135 : vector<2x32xf32>
    %138 = vector.extract_strided_slice %134 {offsets = [0, 32], sizes = [2, 32], strides = [1, 1]} : vector<2x128xf32> to vector<2x32xf32>
    %139 = vector.extract_strided_slice %134 {offsets = [0, 64], sizes = [2, 32], strides = [1, 1]} : vector<2x128xf32> to vector<2x32xf32>
    %cst_40 = arith.constant 1.000000e+00 : f32
    %140 = vector.broadcast %cst_40 : f32 to vector<2x32xf32>
    %141 = arith.subf %140, %139 : vector<2x32xf32>
    %142 = vector.extract_strided_slice %134 {offsets = [0, 96], sizes = [2, 32], strides = [1, 1]} : vector<2x128xf32> to vector<2x32xf32>
    %143 = math.tanh %100 : vector<2x32xf32>
    %144 = arith.mulf %142, %141 : vector<2x32xf32>
    %145 = arith.subf %142, %144 : vector<2x32xf32>
    %146 = arith.subf %141, %144 : vector<2x32xf32>
    %147 = arith.mulf %138, %137 : vector<2x32xf32>
    %148 = arith.subf %138, %147 : vector<2x32xf32>
    %149 = arith.subf %137, %147 : vector<2x32xf32>
    %150 = arith.mulf %147, %94 : vector<2x32xf32>
    %151 = arith.mulf %144, %143 : vector<2x32xf32>
    %152 = arith.addf %150, %151 : vector<2x32xf32>
    %153 = arith.mulf %148, %94 : vector<2x32xf32>
    %154 = arith.mulf %145, %143 : vector<2x32xf32>
    %155 = arith.addf %153, %154 : vector<2x32xf32>
    %156 = arith.addf %155, %152 : vector<2x32xf32>
    %157 = arith.mulf %149, %94 : vector<2x32xf32>
    %158 = arith.mulf %146, %143 : vector<2x32xf32>
    %159 = arith.addf %157, %158 : vector<2x32xf32>
    %160 = arith.addf %159, %152 : vector<2x32xf32>
    %161 = math.tanh %152 : vector<2x32xf32>
    %162 = math.tanh %160 : vector<2x32xf32>
    %163 = tpu.concatenate %161, %162, %12 in 1 : vector<2x32xf32>, vector<2x32xf32>, vector<2x64xf32> -> vector<2x128xf32>
    %c0_41 = arith.constant 0 : index
    %c0_42 = arith.constant 0 : index
    %c1_43 = arith.constant 1 : index
    %c0_44 = arith.constant 0 : index
    %164 = vector.load %arg8[%c0_41, %c0_42, %c1_43, %c0_44] : memref<2x2x8x128xf32, #tpu.memory_space<vmem>>, vector<1x2x1x128xf32>
    %165 = vector.shape_cast %164 : vector<1x2x1x128xf32> to vector<2x128xf32>
    %166 = vector.shape_cast %163 : vector<2x128xf32> to vector<1x2x1x128xf32>
    tpu.vector_store %arg8[%c0_41, %c0_42, %c1_43, %c0_44], %166 {strides = array<i32>} : memref<2x2x8x128xf32, #tpu.memory_space<vmem>>, vector<1x2x1x128xf32>,
    %167 = math.tanh %156 : vector<2x32xf32>
    %168 = tpu.concatenate %161, %167, %12 in 1 : vector<2x32xf32>, vector<2x32xf32>, vector<2x64xf32> -> vector<2x128xf32>
    %c1_45 = arith.constant 1 : index
    %c0_46 = arith.constant 0 : index
    %c1_47 = arith.constant 1 : index
    %c0_48 = arith.constant 0 : index
    %169 = vector.load %arg8[%c1_45, %c0_46, %c1_47, %c0_48] : memref<2x2x8x128xf32, #tpu.memory_space<vmem>>, vector<1x2x1x128xf32>
    %170 = vector.shape_cast %169 : vector<1x2x1x128xf32> to vector<2x128xf32>
    %171 = vector.shape_cast %168 : vector<2x128xf32> to vector<1x2x1x128xf32>
    tpu.vector_store %arg8[%c1_45, %c0_46, %c1_47, %c0_48], %171 {strides = array<i32>} : memref<2x2x8x128xf32, #tpu.memory_space<vmem>>, vector<1x2x1x128xf32>,
    %172 = tpu.concatenate %156, %160, %152 in 1 : vector<2x32xf32>, vector<2x32xf32>, vector<2x32xf32> -> vector<2x96xf32>
    %cst_49 = arith.constant dense<0.000000e+00> : vector<2x32xf32>
    %173 = tpu.matmul %172, %9, %cst_49 {dimension_numbers = #tpu.dot_dimension_numbers<[1], [0], [0], [1], [0, 0, 1, 1], [], []>} : vector<2x96xf32>, vector<96x32xf32>, vector<2x32xf32> -> vector<2x32xf32>
    %174 = vector.broadcast %10 : vector<1x32xf32> to vector<2x32xf32>
    %175 = arith.addf %173, %174 : vector<2x32xf32>
    %176 = math.tanh %175 : vector<2x32xf32>
    %177 = vector.extract_strided_slice %7 {offsets = [2, 0, 0], sizes = [1, 2, 160], strides = [1, 1, 1]} : vector<8x2x160xf32> to vector<1x2x160xf32>
    %178 = vector.shape_cast %177 : vector<1x2x160xf32> to vector<2x160xf32>
    %cst_50 = arith.constant dense<0.000000e+00> : vector<2x160xf32>
    %179 = tpu.matmul %176, %8, %cst_50 {dimension_numbers = #tpu.dot_dimension_numbers<[1], [0], [0], [1], [0, 0, 1, 1], [], []>} : vector<2x32xf32>, vector<32x160xf32>, vector<2x160xf32> -> vector<2x160xf32>
    %180 = arith.addf %178, %179 : vector<2x160xf32>
    %181 = vector.extract_strided_slice %180 {offsets = [0, 0], sizes = [2, 32], strides = [1, 1]} : vector<2x160xf32> to vector<2x32xf32>
    %182 = vector.extract_strided_slice %180 {offsets = [0, 32], sizes = [2, 128], strides = [1, 1]} : vector<2x160xf32> to vector<2x128xf32>
    %183 = vector.extract_strided_slice %182 {offsets = [0, 0], sizes = [2, 32], strides = [1, 1]} : vector<2x128xf32> to vector<2x32xf32>
    %184 = vector.extract_strided_slice %182 {offsets = [0, 0], sizes = [2, 32], strides = [1, 1]} : vector<2x128xf32> to vector<2x32xf32>
    %cst_51 = arith.constant dense<0xFF800000> : vector<2xf32>
    %185 = vector.multi_reduction <maximumf>, %184, %cst_51 [1] : vector<2x32xf32> to vector<2xf32>
    %186 = vector.shape_cast %185 : vector<2xf32> to vector<2x1xf32>
    %187 = vector.broadcast %186 : vector<2x1xf32> to vector<2x32xf32>
    %188 = arith.subf %183, %187 : vector<2x32xf32>
    %189 = math.exp %188 : vector<2x32xf32>
    %190 = vector.extract_strided_slice %182 {offsets = [0, 32], sizes = [2, 32], strides = [1, 1]} : vector<2x128xf32> to vector<2x32xf32>
    %191 = vector.extract_strided_slice %182 {offsets = [0, 32], sizes = [2, 32], strides = [1, 1]} : vector<2x128xf32> to vector<2x32xf32>
    %cst_52 = arith.constant dense<0xFF800000> : vector<2xf32>
    %192 = vector.multi_reduction <maximumf>, %191, %cst_52 [1] : vector<2x32xf32> to vector<2xf32>
    %193 = vector.shape_cast %192 : vector<2xf32> to vector<2x1xf32>
    %194 = vector.broadcast %193 : vector<2x1xf32> to vector<2x32xf32>
    %195 = arith.subf %190, %194 : vector<2x32xf32>
    %196 = math.exp %195 : vector<2x32xf32>
    %197 = vector.extract_strided_slice %182 {offsets = [0, 64], sizes = [2, 32], strides = [1, 1]} : vector<2x128xf32> to vector<2x32xf32>
    %198 = vector.extract_strided_slice %182 {offsets = [0, 64], sizes = [2, 32], strides = [1, 1]} : vector<2x128xf32> to vector<2x32xf32>
    %cst_53 = arith.constant dense<0xFF800000> : vector<2xf32>
    %199 = vector.multi_reduction <maximumf>, %198, %cst_53 [1] : vector<2x32xf32> to vector<2xf32>
    %200 = vector.shape_cast %199 : vector<2xf32> to vector<2x1xf32>
    %201 = vector.broadcast %200 : vector<2x1xf32> to vector<2x32xf32>
    %202 = arith.subf %197, %201 : vector<2x32xf32>
    %203 = math.exp %202 : vector<2x32xf32>
    %204 = vector.extract_strided_slice %182 {offsets = [0, 96], sizes = [2, 32], strides = [1, 1]} : vector<2x128xf32> to vector<2x32xf32>
    %205 = vector.extract_strided_slice %182 {offsets = [0, 96], sizes = [2, 32], strides = [1, 1]} : vector<2x128xf32> to vector<2x32xf32>
    %cst_54 = arith.constant dense<0xFF800000> : vector<2xf32>
    %206 = vector.multi_reduction <maximumf>, %205, %cst_54 [1] : vector<2x32xf32> to vector<2xf32>
    %207 = vector.shape_cast %206 : vector<2xf32> to vector<2x1xf32>
    %208 = vector.broadcast %207 : vector<2x1xf32> to vector<2x32xf32>
    %209 = arith.subf %204, %208 : vector<2x32xf32>
    %210 = math.exp %209 : vector<2x32xf32>
    %211 = tpu.concatenate %189, %196, %203, %210 in 1 : vector<2x32xf32>, vector<2x32xf32>, vector<2x32xf32>, vector<2x32xf32> -> vector<2x128xf32>
    %cst_55 = arith.constant dense<0.000000e+00> : vector<2x256xf32>
    %212 = tpu.matmul %211, %11, %cst_55 {dimension_numbers = #tpu.dot_dimension_numbers<[1], [0], [0], [1], [0, 0, 1, 1], [], []>} : vector<2x128xf32>, vector<128x256xf32>, vector<2x256xf32> -> vector<2x256xf32>
    %213 = vector.extract_strided_slice %212 {offsets = [0, 128], sizes = [2, 128], strides = [1, 1]} : vector<2x256xf32> to vector<2x128xf32>
    %214 = vector.extract_strided_slice %212 {offsets = [0, 0], sizes = [2, 128], strides = [1, 1]} : vector<2x256xf32> to vector<2x128xf32>
    %215 = arith.divf %213, %214 : vector<2x128xf32>
    %216 = vector.extract_strided_slice %215 {offsets = [0, 0], sizes = [2, 32], strides = [1, 1]} : vector<2x128xf32> to vector<2x32xf32>
    %cst_56 = arith.constant 1.000000e+00 : f32
    %217 = vector.broadcast %cst_56 : f32 to vector<2x32xf32>
    %218 = arith.subf %217, %216 : vector<2x32xf32>
    %219 = vector.extract_strided_slice %215 {offsets = [0, 32], sizes = [2, 32], strides = [1, 1]} : vector<2x128xf32> to vector<2x32xf32>
    %220 = vector.extract_strided_slice %215 {offsets = [0, 64], sizes = [2, 32], strides = [1, 1]} : vector<2x128xf32> to vector<2x32xf32>
    %cst_57 = arith.constant 1.000000e+00 : f32
    %221 = vector.broadcast %cst_57 : f32 to vector<2x32xf32>
    %222 = arith.subf %221, %220 : vector<2x32xf32>
    %223 = vector.extract_strided_slice %215 {offsets = [0, 96], sizes = [2, 32], strides = [1, 1]} : vector<2x128xf32> to vector<2x32xf32>
    %224 = math.tanh %181 : vector<2x32xf32>
    %225 = arith.mulf %223, %222 : vector<2x32xf32>
    %226 = arith.subf %223, %225 : vector<2x32xf32>
    %227 = arith.subf %222, %225 : vector<2x32xf32>
    %228 = arith.mulf %219, %218 : vector<2x32xf32>
    %229 = arith.subf %219, %228 : vector<2x32xf32>
    %230 = arith.subf %218, %228 : vector<2x32xf32>
    %231 = arith.mulf %228, %175 : vector<2x32xf32>
    %232 = arith.mulf %225, %224 : vector<2x32xf32>
    %233 = arith.addf %231, %232 : vector<2x32xf32>
    %234 = arith.mulf %229, %175 : vector<2x32xf32>
    %235 = arith.mulf %226, %224 : vector<2x32xf32>
    %236 = arith.addf %234, %235 : vector<2x32xf32>
    %237 = arith.addf %236, %233 : vector<2x32xf32>
    %238 = arith.mulf %230, %175 : vector<2x32xf32>
    %239 = arith.mulf %227, %224 : vector<2x32xf32>
    %240 = arith.addf %238, %239 : vector<2x32xf32>
    %241 = arith.addf %240, %233 : vector<2x32xf32>
    %242 = math.tanh %233 : vector<2x32xf32>
    %243 = math.tanh %241 : vector<2x32xf32>
    %244 = tpu.concatenate %242, %243, %12 in 1 : vector<2x32xf32>, vector<2x32xf32>, vector<2x64xf32> -> vector<2x128xf32>
    %c0_58 = arith.constant 0 : index
    %c0_59 = arith.constant 0 : index
    %c2 = arith.constant 2 : index
    %c0_60 = arith.constant 0 : index
    %245 = vector.load %arg8[%c0_58, %c0_59, %c2, %c0_60] : memref<2x2x8x128xf32, #tpu.memory_space<vmem>>, vector<1x2x1x128xf32>
    %246 = vector.shape_cast %245 : vector<1x2x1x128xf32> to vector<2x128xf32>
    %247 = vector.shape_cast %244 : vector<2x128xf32> to vector<1x2x1x128xf32>
    tpu.vector_store %arg8[%c0_58, %c0_59, %c2, %c0_60], %247 {strides = array<i32>} : memref<2x2x8x128xf32, #tpu.memory_space<vmem>>, vector<1x2x1x128xf32>,
    %248 = math.tanh %237 : vector<2x32xf32>
    %249 = tpu.concatenate %242, %248, %12 in 1 : vector<2x32xf32>, vector<2x32xf32>, vector<2x64xf32> -> vector<2x128xf32>
    %c1_61 = arith.constant 1 : index
    %c0_62 = arith.constant 0 : index
    %c2_63 = arith.constant 2 : index
    %c0_64 = arith.constant 0 : index
    %250 = vector.load %arg8[%c1_61, %c0_62, %c2_63, %c0_64] : memref<2x2x8x128xf32, #tpu.memory_space<vmem>>, vector<1x2x1x128xf32>
    %251 = vector.shape_cast %250 : vector<1x2x1x128xf32> to vector<2x128xf32>
    %252 = vector.shape_cast %249 : vector<2x128xf32> to vector<1x2x1x128xf32>
    tpu.vector_store %arg8[%c1_61, %c0_62, %c2_63, %c0_64], %252 {strides = array<i32>} : memref<2x2x8x128xf32, #tpu.memory_space<vmem>>, vector<1x2x1x128xf32>,
    %253 = tpu.concatenate %237, %241, %233 in 1 : vector<2x32xf32>, vector<2x32xf32>, vector<2x32xf32> -> vector<2x96xf32>
    %cst_65 = arith.constant dense<0.000000e+00> : vector<2x32xf32>
    %254 = tpu.matmul %253, %9, %cst_65 {dimension_numbers = #tpu.dot_dimension_numbers<[1], [0], [0], [1], [0, 0, 1, 1], [], []>} : vector<2x96xf32>, vector<96x32xf32>, vector<2x32xf32> -> vector<2x32xf32>
    %255 = vector.broadcast %10 : vector<1x32xf32> to vector<2x32xf32>
    %256 = arith.addf %254, %255 : vector<2x32xf32>
    %257 = math.tanh %256 : vector<2x32xf32>
    %258 = vector.extract_strided_slice %7 {offsets = [3, 0, 0], sizes = [1, 2, 160], strides = [1, 1, 1]} : vector<8x2x160xf32> to vector<1x2x160xf32>
    %259 = vector.shape_cast %258 : vector<1x2x160xf32> to vector<2x160xf32>
    %cst_66 = arith.constant dense<0.000000e+00> : vector<2x160xf32>
    %260 = tpu.matmul %257, %8, %cst_66 {dimension_numbers = #tpu.dot_dimension_numbers<[1], [0], [0], [1], [0, 0, 1, 1], [], []>} : vector<2x32xf32>, vector<32x160xf32>, vector<2x160xf32> -> vector<2x160xf32>
    %261 = arith.addf %259, %260 : vector<2x160xf32>
    %262 = vector.extract_strided_slice %261 {offsets = [0, 0], sizes = [2, 32], strides = [1, 1]} : vector<2x160xf32> to vector<2x32xf32>
    %263 = vector.extract_strided_slice %261 {offsets = [0, 32], sizes = [2, 128], strides = [1, 1]} : vector<2x160xf32> to vector<2x128xf32>
    %264 = vector.extract_strided_slice %263 {offsets = [0, 0], sizes = [2, 32], strides = [1, 1]} : vector<2x128xf32> to vector<2x32xf32>
    %265 = vector.extract_strided_slice %263 {offsets = [0, 0], sizes = [2, 32], strides = [1, 1]} : vector<2x128xf32> to vector<2x32xf32>
    %cst_67 = arith.constant dense<0xFF800000> : vector<2xf32>
    %266 = vector.multi_reduction <maximumf>, %265, %cst_67 [1] : vector<2x32xf32> to vector<2xf32>
    %267 = vector.shape_cast %266 : vector<2xf32> to vector<2x1xf32>
    %268 = vector.broadcast %267 : vector<2x1xf32> to vector<2x32xf32>
    %269 = arith.subf %264, %268 : vector<2x32xf32>
    %270 = math.exp %269 : vector<2x32xf32>
    %271 = vector.extract_strided_slice %263 {offsets = [0, 32], sizes = [2, 32], strides = [1, 1]} : vector<2x128xf32> to vector<2x32xf32>
    %272 = vector.extract_strided_slice %263 {offsets = [0, 32], sizes = [2, 32], strides = [1, 1]} : vector<2x128xf32> to vector<2x32xf32>
    %cst_68 = arith.constant dense<0xFF800000> : vector<2xf32>
    %273 = vector.multi_reduction <maximumf>, %272, %cst_68 [1] : vector<2x32xf32> to vector<2xf32>
    %274 = vector.shape_cast %273 : vector<2xf32> to vector<2x1xf32>
    %275 = vector.broadcast %274 : vector<2x1xf32> to vector<2x32xf32>
    %276 = arith.subf %271, %275 : vector<2x32xf32>
    %277 = math.exp %276 : vector<2x32xf32>
    %278 = vector.extract_strided_slice %263 {offsets = [0, 64], sizes = [2, 32], strides = [1, 1]} : vector<2x128xf32> to vector<2x32xf32>
    %279 = vector.extract_strided_slice %263 {offsets = [0, 64], sizes = [2, 32], strides = [1, 1]} : vector<2x128xf32> to vector<2x32xf32>
    %cst_69 = arith.constant dense<0xFF800000> : vector<2xf32>
    %280 = vector.multi_reduction <maximumf>, %279, %cst_69 [1] : vector<2x32xf32> to vector<2xf32>
    %281 = vector.shape_cast %280 : vector<2xf32> to vector<2x1xf32>
    %282 = vector.broadcast %281 : vector<2x1xf32> to vector<2x32xf32>
    %283 = arith.subf %278, %282 : vector<2x32xf32>
    %284 = math.exp %283 : vector<2x32xf32>
    %285 = vector.extract_strided_slice %263 {offsets = [0, 96], sizes = [2, 32], strides = [1, 1]} : vector<2x128xf32> to vector<2x32xf32>
    %286 = vector.extract_strided_slice %263 {offsets = [0, 96], sizes = [2, 32], strides = [1, 1]} : vector<2x128xf32> to vector<2x32xf32>
    %cst_70 = arith.constant dense<0xFF800000> : vector<2xf32>
    %287 = vector.multi_reduction <maximumf>, %286, %cst_70 [1] : vector<2x32xf32> to vector<2xf32>
    %288 = vector.shape_cast %287 : vector<2xf32> to vector<2x1xf32>
    %289 = vector.broadcast %288 : vector<2x1xf32> to vector<2x32xf32>
    %290 = arith.subf %285, %289 : vector<2x32xf32>
    %291 = math.exp %290 : vector<2x32xf32>
    %292 = tpu.concatenate %270, %277, %284, %291 in 1 : vector<2x32xf32>, vector<2x32xf32>, vector<2x32xf32>, vector<2x32xf32> -> vector<2x128xf32>
    %cst_71 = arith.constant dense<0.000000e+00> : vector<2x256xf32>
    %293 = tpu.matmul %292, %11, %cst_71 {dimension_numbers = #tpu.dot_dimension_numbers<[1], [0], [0], [1], [0, 0, 1, 1], [], []>} : vector<2x128xf32>, vector<128x256xf32>, vector<2x256xf32> -> vector<2x256xf32>
    %294 = vector.extract_strided_slice %293 {offsets = [0, 128], sizes = [2, 128], strides = [1, 1]} : vector<2x256xf32> to vector<2x128xf32>
    %295 = vector.extract_strided_slice %293 {offsets = [0, 0], sizes = [2, 128], strides = [1, 1]} : vector<2x256xf32> to vector<2x128xf32>
    %296 = arith.divf %294, %295 : vector<2x128xf32>
    %297 = vector.extract_strided_slice %296 {offsets = [0, 0], sizes = [2, 32], strides = [1, 1]} : vector<2x128xf32> to vector<2x32xf32>
    %cst_72 = arith.constant 1.000000e+00 : f32
    %298 = vector.broadcast %cst_72 : f32 to vector<2x32xf32>
    %299 = arith.subf %298, %297 : vector<2x32xf32>
    %300 = vector.extract_strided_slice %296 {offsets = [0, 32], sizes = [2, 32], strides = [1, 1]} : vector<2x128xf32> to vector<2x32xf32>
    %301 = vector.extract_strided_slice %296 {offsets = [0, 64], sizes = [2, 32], strides = [1, 1]} : vector<2x128xf32> to vector<2x32xf32>
    %cst_73 = arith.constant 1.000000e+00 : f32
    %302 = vector.broadcast %cst_73 : f32 to vector<2x32xf32>
    %303 = arith.subf %302, %301 : vector<2x32xf32>
    %304 = vector.extract_strided_slice %296 {offsets = [0, 96], sizes = [2, 32], strides = [1, 1]} : vector<2x128xf32> to vector<2x32xf32>
    %305 = math.tanh %262 : vector<2x32xf32>
    %306 = arith.mulf %304, %303 : vector<2x32xf32>
    %307 = arith.subf %304, %306 : vector<2x32xf32>
    %308 = arith.subf %303, %306 : vector<2x32xf32>
    %309 = arith.mulf %300, %299 : vector<2x32xf32>
    %310 = arith.subf %300, %309 : vector<2x32xf32>
    %311 = arith.subf %299, %309 : vector<2x32xf32>
    %312 = arith.mulf %309, %256 : vector<2x32xf32>
    %313 = arith.mulf %306, %305 : vector<2x32xf32>
    %314 = arith.addf %312, %313 : vector<2x32xf32>
    %315 = arith.mulf %310, %256 : vector<2x32xf32>
    %316 = arith.mulf %307, %305 : vector<2x32xf32>
    %317 = arith.addf %315, %316 : vector<2x32xf32>
    %318 = arith.addf %317, %314 : vector<2x32xf32>
    %319 = arith.mulf %311, %256 : vector<2x32xf32>
    %320 = arith.mulf %308, %305 : vector<2x32xf32>
    %321 = arith.addf %319, %320 : vector<2x32xf32>
    %322 = arith.addf %321, %314 : vector<2x32xf32>
    %323 = math.tanh %314 : vector<2x32xf32>
    %324 = math.tanh %322 : vector<2x32xf32>
    %325 = tpu.concatenate %323, %324, %12 in 1 : vector<2x32xf32>, vector<2x32xf32>, vector<2x64xf32> -> vector<2x128xf32>
    %c0_74 = arith.constant 0 : index
    %c0_75 = arith.constant 0 : index
    %c3 = arith.constant 3 : index
    %c0_76 = arith.constant 0 : index
    %326 = vector.load %arg8[%c0_74, %c0_75, %c3, %c0_76] : memref<2x2x8x128xf32, #tpu.memory_space<vmem>>, vector<1x2x1x128xf32>
    %327 = vector.shape_cast %326 : vector<1x2x1x128xf32> to vector<2x128xf32>
    %328 = vector.shape_cast %325 : vector<2x128xf32> to vector<1x2x1x128xf32>
    tpu.vector_store %arg8[%c0_74, %c0_75, %c3, %c0_76], %328 {strides = array<i32>} : memref<2x2x8x128xf32, #tpu.memory_space<vmem>>, vector<1x2x1x128xf32>,
    %329 = math.tanh %318 : vector<2x32xf32>
    %330 = tpu.concatenate %323, %329, %12 in 1 : vector<2x32xf32>, vector<2x32xf32>, vector<2x64xf32> -> vector<2x128xf32>
    %c1_77 = arith.constant 1 : index
    %c0_78 = arith.constant 0 : index
    %c3_79 = arith.constant 3 : index
    %c0_80 = arith.constant 0 : index
    %331 = vector.load %arg8[%c1_77, %c0_78, %c3_79, %c0_80] : memref<2x2x8x128xf32, #tpu.memory_space<vmem>>, vector<1x2x1x128xf32>
    %332 = vector.shape_cast %331 : vector<1x2x1x128xf32> to vector<2x128xf32>
    %333 = vector.shape_cast %330 : vector<2x128xf32> to vector<1x2x1x128xf32>
    tpu.vector_store %arg8[%c1_77, %c0_78, %c3_79, %c0_80], %333 {strides = array<i32>} : memref<2x2x8x128xf32, #tpu.memory_space<vmem>>, vector<1x2x1x128xf32>,
    %334 = tpu.concatenate %318, %322, %314 in 1 : vector<2x32xf32>, vector<2x32xf32>, vector<2x32xf32> -> vector<2x96xf32>
    %cst_81 = arith.constant dense<0.000000e+00> : vector<2x32xf32>
    %335 = tpu.matmul %334, %9, %cst_81 {dimension_numbers = #tpu.dot_dimension_numbers<[1], [0], [0], [1], [0, 0, 1, 1], [], []>} : vector<2x96xf32>, vector<96x32xf32>, vector<2x32xf32> -> vector<2x32xf32>
    %336 = vector.broadcast %10 : vector<1x32xf32> to vector<2x32xf32>
    %337 = arith.addf %335, %336 : vector<2x32xf32>
    %338 = math.tanh %337 : vector<2x32xf32>
    %339 = vector.extract_strided_slice %7 {offsets = [4, 0, 0], sizes = [1, 2, 160], strides = [1, 1, 1]} : vector<8x2x160xf32> to vector<1x2x160xf32>
    %340 = vector.shape_cast %339 : vector<1x2x160xf32> to vector<2x160xf32>
    %cst_82 = arith.constant dense<0.000000e+00> : vector<2x160xf32>
    %341 = tpu.matmul %338, %8, %cst_82 {dimension_numbers = #tpu.dot_dimension_numbers<[1], [0], [0], [1], [0, 0, 1, 1], [], []>} : vector<2x32xf32>, vector<32x160xf32>, vector<2x160xf32> -> vector<2x160xf32>
    %342 = arith.addf %340, %341 : vector<2x160xf32>
    %343 = vector.extract_strided_slice %342 {offsets = [0, 0], sizes = [2, 32], strides = [1, 1]} : vector<2x160xf32> to vector<2x32xf32>
    %344 = vector.extract_strided_slice %342 {offsets = [0, 32], sizes = [2, 128], strides = [1, 1]} : vector<2x160xf32> to vector<2x128xf32>
    %345 = vector.extract_strided_slice %344 {offsets = [0, 0], sizes = [2, 32], strides = [1, 1]} : vector<2x128xf32> to vector<2x32xf32>
    %346 = vector.extract_strided_slice %344 {offsets = [0, 0], sizes = [2, 32], strides = [1, 1]} : vector<2x128xf32> to vector<2x32xf32>
    %cst_83 = arith.constant dense<0xFF800000> : vector<2xf32>
    %347 = vector.multi_reduction <maximumf>, %346, %cst_83 [1] : vector<2x32xf32> to vector<2xf32>
    %348 = vector.shape_cast %347 : vector<2xf32> to vector<2x1xf32>
    %349 = vector.broadcast %348 : vector<2x1xf32> to vector<2x32xf32>
    %350 = arith.subf %345, %349 : vector<2x32xf32>
    %351 = math.exp %350 : vector<2x32xf32>
    %352 = vector.extract_strided_slice %344 {offsets = [0, 32], sizes = [2, 32], strides = [1, 1]} : vector<2x128xf32> to vector<2x32xf32>
    %353 = vector.extract_strided_slice %344 {offsets = [0, 32], sizes = [2, 32], strides = [1, 1]} : vector<2x128xf32> to vector<2x32xf32>
    %cst_84 = arith.constant dense<0xFF800000> : vector<2xf32>
    %354 = vector.multi_reduction <maximumf>, %353, %cst_84 [1] : vector<2x32xf32> to vector<2xf32>
    %355 = vector.shape_cast %354 : vector<2xf32> to vector<2x1xf32>
    %356 = vector.broadcast %355 : vector<2x1xf32> to vector<2x32xf32>
    %357 = arith.subf %352, %356 : vector<2x32xf32>
    %358 = math.exp %357 : vector<2x32xf32>
    %359 = vector.extract_strided_slice %344 {offsets = [0, 64], sizes = [2, 32], strides = [1, 1]} : vector<2x128xf32> to vector<2x32xf32>
    %360 = vector.extract_strided_slice %344 {offsets = [0, 64], sizes = [2, 32], strides = [1, 1]} : vector<2x128xf32> to vector<2x32xf32>
    %cst_85 = arith.constant dense<0xFF800000> : vector<2xf32>
    %361 = vector.multi_reduction <maximumf>, %360, %cst_85 [1] : vector<2x32xf32> to vector<2xf32>
    %362 = vector.shape_cast %361 : vector<2xf32> to vector<2x1xf32>
    %363 = vector.broadcast %362 : vector<2x1xf32> to vector<2x32xf32>
    %364 = arith.subf %359, %363 : vector<2x32xf32>
    %365 = math.exp %364 : vector<2x32xf32>
    %366 = vector.extract_strided_slice %344 {offsets = [0, 96], sizes = [2, 32], strides = [1, 1]} : vector<2x128xf32> to vector<2x32xf32>
    %367 = vector.extract_strided_slice %344 {offsets = [0, 96], sizes = [2, 32], strides = [1, 1]} : vector<2x128xf32> to vector<2x32xf32>
    %cst_86 = arith.constant dense<0xFF800000> : vector<2xf32>
    %368 = vector.multi_reduction <maximumf>, %367, %cst_86 [1] : vector<2x32xf32> to vector<2xf32>
    %369 = vector.shape_cast %368 : vector<2xf32> to vector<2x1xf32>
    %370 = vector.broadcast %369 : vector<2x1xf32> to vector<2x32xf32>
    %371 = arith.subf %366, %370 : vector<2x32xf32>
    %372 = math.exp %371 : vector<2x32xf32>
    %373 = tpu.concatenate %351, %358, %365, %372 in 1 : vector<2x32xf32>, vector<2x32xf32>, vector<2x32xf32>, vector<2x32xf32> -> vector<2x128xf32>
    %cst_87 = arith.constant dense<0.000000e+00> : vector<2x256xf32>
    %374 = tpu.matmul %373, %11, %cst_87 {dimension_numbers = #tpu.dot_dimension_numbers<[1], [0], [0], [1], [0, 0, 1, 1], [], []>} : vector<2x128xf32>, vector<128x256xf32>, vector<2x256xf32> -> vector<2x256xf32>
    %375 = vector.extract_strided_slice %374 {offsets = [0, 128], sizes = [2, 128], strides = [1, 1]} : vector<2x256xf32> to vector<2x128xf32>
    %376 = vector.extract_strided_slice %374 {offsets = [0, 0], sizes = [2, 128], strides = [1, 1]} : vector<2x256xf32> to vector<2x128xf32>
    %377 = arith.divf %375, %376 : vector<2x128xf32>
    %378 = vector.extract_strided_slice %377 {offsets = [0, 0], sizes = [2, 32], strides = [1, 1]} : vector<2x128xf32> to vector<2x32xf32>
    %cst_88 = arith.constant 1.000000e+00 : f32
    %379 = vector.broadcast %cst_88 : f32 to vector<2x32xf32>
    %380 = arith.subf %379, %378 : vector<2x32xf32>
    %381 = vector.extract_strided_slice %377 {offsets = [0, 32], sizes = [2, 32], strides = [1, 1]} : vector<2x128xf32> to vector<2x32xf32>
    %382 = vector.extract_strided_slice %377 {offsets = [0, 64], sizes = [2, 32], strides = [1, 1]} : vector<2x128xf32> to vector<2x32xf32>
    %cst_89 = arith.constant 1.000000e+00 : f32
    %383 = vector.broadcast %cst_89 : f32 to vector<2x32xf32>
    %384 = arith.subf %383, %382 : vector<2x32xf32>
    %385 = vector.extract_strided_slice %377 {offsets = [0, 96], sizes = [2, 32], strides = [1, 1]} : vector<2x128xf32> to vector<2x32xf32>
    %386 = math.tanh %343 : vector<2x32xf32>
    %387 = arith.mulf %385, %384 : vector<2x32xf32>
    %388 = arith.subf %385, %387 : vector<2x32xf32>
    %389 = arith.subf %384, %387 : vector<2x32xf32>
    %390 = arith.mulf %381, %380 : vector<2x32xf32>
    %391 = arith.subf %381, %390 : vector<2x32xf32>
    %392 = arith.subf %380, %390 : vector<2x32xf32>
    %393 = arith.mulf %390, %337 : vector<2x32xf32>
    %394 = arith.mulf %387, %386 : vector<2x32xf32>
    %395 = arith.addf %393, %394 : vector<2x32xf32>
    %396 = arith.mulf %391, %337 : vector<2x32xf32>
    %397 = arith.mulf %388, %386 : vector<2x32xf32>
    %398 = arith.addf %396, %397 : vector<2x32xf32>
    %399 = arith.addf %398, %395 : vector<2x32xf32>
    %400 = arith.mulf %392, %337 : vector<2x32xf32>
    %401 = arith.mulf %389, %386 : vector<2x32xf32>
    %402 = arith.addf %400, %401 : vector<2x32xf32>
    %403 = arith.addf %402, %395 : vector<2x32xf32>
    %404 = math.tanh %395 : vector<2x32xf32>
    %405 = math.tanh %403 : vector<2x32xf32>
    %406 = tpu.concatenate %404, %405, %12 in 1 : vector<2x32xf32>, vector<2x32xf32>, vector<2x64xf32> -> vector<2x128xf32>
    %c0_90 = arith.constant 0 : index
    %c0_91 = arith.constant 0 : index
    %c4 = arith.constant 4 : index
    %c0_92 = arith.constant 0 : index
    %407 = vector.load %arg8[%c0_90, %c0_91, %c4, %c0_92] : memref<2x2x8x128xf32, #tpu.memory_space<vmem>>, vector<1x2x1x128xf32>
    %408 = vector.shape_cast %407 : vector<1x2x1x128xf32> to vector<2x128xf32>
    %409 = vector.shape_cast %406 : vector<2x128xf32> to vector<1x2x1x128xf32>
    tpu.vector_store %arg8[%c0_90, %c0_91, %c4, %c0_92], %409 {strides = array<i32>} : memref<2x2x8x128xf32, #tpu.memory_space<vmem>>, vector<1x2x1x128xf32>,
    %410 = math.tanh %399 : vector<2x32xf32>
    %411 = tpu.concatenate %404, %410, %12 in 1 : vector<2x32xf32>, vector<2x32xf32>, vector<2x64xf32> -> vector<2x128xf32>
    %c1_93 = arith.constant 1 : index
    %c0_94 = arith.constant 0 : index
    %c4_95 = arith.constant 4 : index
    %c0_96 = arith.constant 0 : index
    %412 = vector.load %arg8[%c1_93, %c0_94, %c4_95, %c0_96] : memref<2x2x8x128xf32, #tpu.memory_space<vmem>>, vector<1x2x1x128xf32>
    %413 = vector.shape_cast %412 : vector<1x2x1x128xf32> to vector<2x128xf32>
    %414 = vector.shape_cast %411 : vector<2x128xf32> to vector<1x2x1x128xf32>
    tpu.vector_store %arg8[%c1_93, %c0_94, %c4_95, %c0_96], %414 {strides = array<i32>} : memref<2x2x8x128xf32, #tpu.memory_space<vmem>>, vector<1x2x1x128xf32>,
    %415 = tpu.concatenate %399, %403, %395 in 1 : vector<2x32xf32>, vector<2x32xf32>, vector<2x32xf32> -> vector<2x96xf32>
    %cst_97 = arith.constant dense<0.000000e+00> : vector<2x32xf32>
    %416 = tpu.matmul %415, %9, %cst_97 {dimension_numbers = #tpu.dot_dimension_numbers<[1], [0], [0], [1], [0, 0, 1, 1], [], []>} : vector<2x96xf32>, vector<96x32xf32>, vector<2x32xf32> -> vector<2x32xf32>
    %417 = vector.broadcast %10 : vector<1x32xf32> to vector<2x32xf32>
    %418 = arith.addf %416, %417 : vector<2x32xf32>
    %419 = math.tanh %418 : vector<2x32xf32>
    %420 = vector.extract_strided_slice %7 {offsets = [5, 0, 0], sizes = [1, 2, 160], strides = [1, 1, 1]} : vector<8x2x160xf32> to vector<1x2x160xf32>
    %421 = vector.shape_cast %420 : vector<1x2x160xf32> to vector<2x160xf32>
    %cst_98 = arith.constant dense<0.000000e+00> : vector<2x160xf32>
    %422 = tpu.matmul %419, %8, %cst_98 {dimension_numbers = #tpu.dot_dimension_numbers<[1], [0], [0], [1], [0, 0, 1, 1], [], []>} : vector<2x32xf32>, vector<32x160xf32>, vector<2x160xf32> -> vector<2x160xf32>
    %423 = arith.addf %421, %422 : vector<2x160xf32>
    %424 = vector.extract_strided_slice %423 {offsets = [0, 0], sizes = [2, 32], strides = [1, 1]} : vector<2x160xf32> to vector<2x32xf32>
    %425 = vector.extract_strided_slice %423 {offsets = [0, 32], sizes = [2, 128], strides = [1, 1]} : vector<2x160xf32> to vector<2x128xf32>
    %426 = vector.extract_strided_slice %425 {offsets = [0, 0], sizes = [2, 32], strides = [1, 1]} : vector<2x128xf32> to vector<2x32xf32>
    %427 = vector.extract_strided_slice %425 {offsets = [0, 0], sizes = [2, 32], strides = [1, 1]} : vector<2x128xf32> to vector<2x32xf32>
    %cst_99 = arith.constant dense<0xFF800000> : vector<2xf32>
    %428 = vector.multi_reduction <maximumf>, %427, %cst_99 [1] : vector<2x32xf32> to vector<2xf32>
    %429 = vector.shape_cast %428 : vector<2xf32> to vector<2x1xf32>
    %430 = vector.broadcast %429 : vector<2x1xf32> to vector<2x32xf32>
    %431 = arith.subf %426, %430 : vector<2x32xf32>
    %432 = math.exp %431 : vector<2x32xf32>
    %433 = vector.extract_strided_slice %425 {offsets = [0, 32], sizes = [2, 32], strides = [1, 1]} : vector<2x128xf32> to vector<2x32xf32>
    %434 = vector.extract_strided_slice %425 {offsets = [0, 32], sizes = [2, 32], strides = [1, 1]} : vector<2x128xf32> to vector<2x32xf32>
    %cst_100 = arith.constant dense<0xFF800000> : vector<2xf32>
    %435 = vector.multi_reduction <maximumf>, %434, %cst_100 [1] : vector<2x32xf32> to vector<2xf32>
    %436 = vector.shape_cast %435 : vector<2xf32> to vector<2x1xf32>
    %437 = vector.broadcast %436 : vector<2x1xf32> to vector<2x32xf32>
    %438 = arith.subf %433, %437 : vector<2x32xf32>
    %439 = math.exp %438 : vector<2x32xf32>
    %440 = vector.extract_strided_slice %425 {offsets = [0, 64], sizes = [2, 32], strides = [1, 1]} : vector<2x128xf32> to vector<2x32xf32>
    %441 = vector.extract_strided_slice %425 {offsets = [0, 64], sizes = [2, 32], strides = [1, 1]} : vector<2x128xf32> to vector<2x32xf32>
    %cst_101 = arith.constant dense<0xFF800000> : vector<2xf32>
    %442 = vector.multi_reduction <maximumf>, %441, %cst_101 [1] : vector<2x32xf32> to vector<2xf32>
    %443 = vector.shape_cast %442 : vector<2xf32> to vector<2x1xf32>
    %444 = vector.broadcast %443 : vector<2x1xf32> to vector<2x32xf32>
    %445 = arith.subf %440, %444 : vector<2x32xf32>
    %446 = math.exp %445 : vector<2x32xf32>
    %447 = vector.extract_strided_slice %425 {offsets = [0, 96], sizes = [2, 32], strides = [1, 1]} : vector<2x128xf32> to vector<2x32xf32>
    %448 = vector.extract_strided_slice %425 {offsets = [0, 96], sizes = [2, 32], strides = [1, 1]} : vector<2x128xf32> to vector<2x32xf32>
    %cst_102 = arith.constant dense<0xFF800000> : vector<2xf32>
    %449 = vector.multi_reduction <maximumf>, %448, %cst_102 [1] : vector<2x32xf32> to vector<2xf32>
    %450 = vector.shape_cast %449 : vector<2xf32> to vector<2x1xf32>
    %451 = vector.broadcast %450 : vector<2x1xf32> to vector<2x32xf32>
    %452 = arith.subf %447, %451 : vector<2x32xf32>
    %453 = math.exp %452 : vector<2x32xf32>
    %454 = tpu.concatenate %432, %439, %446, %453 in 1 : vector<2x32xf32>, vector<2x32xf32>, vector<2x32xf32>, vector<2x32xf32> -> vector<2x128xf32>
    %cst_103 = arith.constant dense<0.000000e+00> : vector<2x256xf32>
    %455 = tpu.matmul %454, %11, %cst_103 {dimension_numbers = #tpu.dot_dimension_numbers<[1], [0], [0], [1], [0, 0, 1, 1], [], []>} : vector<2x128xf32>, vector<128x256xf32>, vector<2x256xf32> -> vector<2x256xf32>
    %456 = vector.extract_strided_slice %455 {offsets = [0, 128], sizes = [2, 128], strides = [1, 1]} : vector<2x256xf32> to vector<2x128xf32>
    %457 = vector.extract_strided_slice %455 {offsets = [0, 0], sizes = [2, 128], strides = [1, 1]} : vector<2x256xf32> to vector<2x128xf32>
    %458 = arith.divf %456, %457 : vector<2x128xf32>
    %459 = vector.extract_strided_slice %458 {offsets = [0, 0], sizes = [2, 32], strides = [1, 1]} : vector<2x128xf32> to vector<2x32xf32>
    %cst_104 = arith.constant 1.000000e+00 : f32
    %460 = vector.broadcast %cst_104 : f32 to vector<2x32xf32>
    %461 = arith.subf %460, %459 : vector<2x32xf32>
    %462 = vector.extract_strided_slice %458 {offsets = [0, 32], sizes = [2, 32], strides = [1, 1]} : vector<2x128xf32> to vector<2x32xf32>
    %463 = vector.extract_strided_slice %458 {offsets = [0, 64], sizes = [2, 32], strides = [1, 1]} : vector<2x128xf32> to vector<2x32xf32>
    %cst_105 = arith.constant 1.000000e+00 : f32
    %464 = vector.broadcast %cst_105 : f32 to vector<2x32xf32>
    %465 = arith.subf %464, %463 : vector<2x32xf32>
    %466 = vector.extract_strided_slice %458 {offsets = [0, 96], sizes = [2, 32], strides = [1, 1]} : vector<2x128xf32> to vector<2x32xf32>
    %467 = math.tanh %424 : vector<2x32xf32>
    %468 = arith.mulf %466, %465 : vector<2x32xf32>
    %469 = arith.subf %466, %468 : vector<2x32xf32>
    %470 = arith.subf %465, %468 : vector<2x32xf32>
    %471 = arith.mulf %462, %461 : vector<2x32xf32>
    %472 = arith.subf %462, %471 : vector<2x32xf32>
    %473 = arith.subf %461, %471 : vector<2x32xf32>
    %474 = arith.mulf %471, %418 : vector<2x32xf32>
    %475 = arith.mulf %468, %467 : vector<2x32xf32>
    %476 = arith.addf %474, %475 : vector<2x32xf32>
    %477 = arith.mulf %472, %418 : vector<2x32xf32>
    %478 = arith.mulf %469, %467 : vector<2x32xf32>
    %479 = arith.addf %477, %478 : vector<2x32xf32>
    %480 = arith.addf %479, %476 : vector<2x32xf32>
    %481 = arith.mulf %473, %418 : vector<2x32xf32>
    %482 = arith.mulf %470, %467 : vector<2x32xf32>
    %483 = arith.addf %481, %482 : vector<2x32xf32>
    %484 = arith.addf %483, %476 : vector<2x32xf32>
    %485 = math.tanh %476 : vector<2x32xf32>
    %486 = math.tanh %484 : vector<2x32xf32>
    %487 = tpu.concatenate %485, %486, %12 in 1 : vector<2x32xf32>, vector<2x32xf32>, vector<2x64xf32> -> vector<2x128xf32>
    %c0_106 = arith.constant 0 : index
    %c0_107 = arith.constant 0 : index
    %c5 = arith.constant 5 : index
    %c0_108 = arith.constant 0 : index
    %488 = vector.load %arg8[%c0_106, %c0_107, %c5, %c0_108] : memref<2x2x8x128xf32, #tpu.memory_space<vmem>>, vector<1x2x1x128xf32>
    %489 = vector.shape_cast %488 : vector<1x2x1x128xf32> to vector<2x128xf32>
    %490 = vector.shape_cast %487 : vector<2x128xf32> to vector<1x2x1x128xf32>
    tpu.vector_store %arg8[%c0_106, %c0_107, %c5, %c0_108], %490 {strides = array<i32>} : memref<2x2x8x128xf32, #tpu.memory_space<vmem>>, vector<1x2x1x128xf32>,
    %491 = math.tanh %480 : vector<2x32xf32>
    %492 = tpu.concatenate %485, %491, %12 in 1 : vector<2x32xf32>, vector<2x32xf32>, vector<2x64xf32> -> vector<2x128xf32>
    %c1_109 = arith.constant 1 : index
    %c0_110 = arith.constant 0 : index
    %c5_111 = arith.constant 5 : index
    %c0_112 = arith.constant 0 : index
    %493 = vector.load %arg8[%c1_109, %c0_110, %c5_111, %c0_112] : memref<2x2x8x128xf32, #tpu.memory_space<vmem>>, vector<1x2x1x128xf32>
    %494 = vector.shape_cast %493 : vector<1x2x1x128xf32> to vector<2x128xf32>
    %495 = vector.shape_cast %492 : vector<2x128xf32> to vector<1x2x1x128xf32>
    tpu.vector_store %arg8[%c1_109, %c0_110, %c5_111, %c0_112], %495 {strides = array<i32>} : memref<2x2x8x128xf32, #tpu.memory_space<vmem>>, vector<1x2x1x128xf32>,
    %496 = tpu.concatenate %480, %484, %476 in 1 : vector<2x32xf32>, vector<2x32xf32>, vector<2x32xf32> -> vector<2x96xf32>
    %cst_113 = arith.constant dense<0.000000e+00> : vector<2x32xf32>
    %497 = tpu.matmul %496, %9, %cst_113 {dimension_numbers = #tpu.dot_dimension_numbers<[1], [0], [0], [1], [0, 0, 1, 1], [], []>} : vector<2x96xf32>, vector<96x32xf32>, vector<2x32xf32> -> vector<2x32xf32>
    %498 = vector.broadcast %10 : vector<1x32xf32> to vector<2x32xf32>
    %499 = arith.addf %497, %498 : vector<2x32xf32>
    %500 = math.tanh %499 : vector<2x32xf32>
    %501 = vector.extract_strided_slice %7 {offsets = [6, 0, 0], sizes = [1, 2, 160], strides = [1, 1, 1]} : vector<8x2x160xf32> to vector<1x2x160xf32>
    %502 = vector.shape_cast %501 : vector<1x2x160xf32> to vector<2x160xf32>
    %cst_114 = arith.constant dense<0.000000e+00> : vector<2x160xf32>
    %503 = tpu.matmul %500, %8, %cst_114 {dimension_numbers = #tpu.dot_dimension_numbers<[1], [0], [0], [1], [0, 0, 1, 1], [], []>} : vector<2x32xf32>, vector<32x160xf32>, vector<2x160xf32> -> vector<2x160xf32>
    %504 = arith.addf %502, %503 : vector<2x160xf32>
    %505 = vector.extract_strided_slice %504 {offsets = [0, 0], sizes = [2, 32], strides = [1, 1]} : vector<2x160xf32> to vector<2x32xf32>
    %506 = vector.extract_strided_slice %504 {offsets = [0, 32], sizes = [2, 128], strides = [1, 1]} : vector<2x160xf32> to vector<2x128xf32>
    %507 = vector.extract_strided_slice %506 {offsets = [0, 0], sizes = [2, 32], strides = [1, 1]} : vector<2x128xf32> to vector<2x32xf32>
    %508 = vector.extract_strided_slice %506 {offsets = [0, 0], sizes = [2, 32], strides = [1, 1]} : vector<2x128xf32> to vector<2x32xf32>
    %cst_115 = arith.constant dense<0xFF800000> : vector<2xf32>
    %509 = vector.multi_reduction <maximumf>, %508, %cst_115 [1] : vector<2x32xf32> to vector<2xf32>
    %510 = vector.shape_cast %509 : vector<2xf32> to vector<2x1xf32>
    %511 = vector.broadcast %510 : vector<2x1xf32> to vector<2x32xf32>
    %512 = arith.subf %507, %511 : vector<2x32xf32>
    %513 = math.exp %512 : vector<2x32xf32>
    %514 = vector.extract_strided_slice %506 {offsets = [0, 32], sizes = [2, 32], strides = [1, 1]} : vector<2x128xf32> to vector<2x32xf32>
    %515 = vector.extract_strided_slice %506 {offsets = [0, 32], sizes = [2, 32], strides = [1, 1]} : vector<2x128xf32> to vector<2x32xf32>
    %cst_116 = arith.constant dense<0xFF800000> : vector<2xf32>
    %516 = vector.multi_reduction <maximumf>, %515, %cst_116 [1] : vector<2x32xf32> to vector<2xf32>
    %517 = vector.shape_cast %516 : vector<2xf32> to vector<2x1xf32>
    %518 = vector.broadcast %517 : vector<2x1xf32> to vector<2x32xf32>
    %519 = arith.subf %514, %518 : vector<2x32xf32>
    %520 = math.exp %519 : vector<2x32xf32>
    %521 = vector.extract_strided_slice %506 {offsets = [0, 64], sizes = [2, 32], strides = [1, 1]} : vector<2x128xf32> to vector<2x32xf32>
    %522 = vector.extract_strided_slice %506 {offsets = [0, 64], sizes = [2, 32], strides = [1, 1]} : vector<2x128xf32> to vector<2x32xf32>
    %cst_117 = arith.constant dense<0xFF800000> : vector<2xf32>
    %523 = vector.multi_reduction <maximumf>, %522, %cst_117 [1] : vector<2x32xf32> to vector<2xf32>
    %524 = vector.shape_cast %523 : vector<2xf32> to vector<2x1xf32>
    %525 = vector.broadcast %524 : vector<2x1xf32> to vector<2x32xf32>
    %526 = arith.subf %521, %525 : vector<2x32xf32>
    %527 = math.exp %526 : vector<2x32xf32>
    %528 = vector.extract_strided_slice %506 {offsets = [0, 96], sizes = [2, 32], strides = [1, 1]} : vector<2x128xf32> to vector<2x32xf32>
    %529 = vector.extract_strided_slice %506 {offsets = [0, 96], sizes = [2, 32], strides = [1, 1]} : vector<2x128xf32> to vector<2x32xf32>
    %cst_118 = arith.constant dense<0xFF800000> : vector<2xf32>
    %530 = vector.multi_reduction <maximumf>, %529, %cst_118 [1] : vector<2x32xf32> to vector<2xf32>
    %531 = vector.shape_cast %530 : vector<2xf32> to vector<2x1xf32>
    %532 = vector.broadcast %531 : vector<2x1xf32> to vector<2x32xf32>
    %533 = arith.subf %528, %532 : vector<2x32xf32>
    %534 = math.exp %533 : vector<2x32xf32>
    %535 = tpu.concatenate %513, %520, %527, %534 in 1 : vector<2x32xf32>, vector<2x32xf32>, vector<2x32xf32>, vector<2x32xf32> -> vector<2x128xf32>
    %cst_119 = arith.constant dense<0.000000e+00> : vector<2x256xf32>
    %536 = tpu.matmul %535, %11, %cst_119 {dimension_numbers = #tpu.dot_dimension_numbers<[1], [0], [0], [1], [0, 0, 1, 1], [], []>} : vector<2x128xf32>, vector<128x256xf32>, vector<2x256xf32> -> vector<2x256xf32>
    %537 = vector.extract_strided_slice %536 {offsets = [0, 128], sizes = [2, 128], strides = [1, 1]} : vector<2x256xf32> to vector<2x128xf32>
    %538 = vector.extract_strided_slice %536 {offsets = [0, 0], sizes = [2, 128], strides = [1, 1]} : vector<2x256xf32> to vector<2x128xf32>
    %539 = arith.divf %537, %538 : vector<2x128xf32>
    %540 = vector.extract_strided_slice %539 {offsets = [0, 0], sizes = [2, 32], strides = [1, 1]} : vector<2x128xf32> to vector<2x32xf32>
    %cst_120 = arith.constant 1.000000e+00 : f32
    %541 = vector.broadcast %cst_120 : f32 to vector<2x32xf32>
    %542 = arith.subf %541, %540 : vector<2x32xf32>
    %543 = vector.extract_strided_slice %539 {offsets = [0, 32], sizes = [2, 32], strides = [1, 1]} : vector<2x128xf32> to vector<2x32xf32>
    %544 = vector.extract_strided_slice %539 {offsets = [0, 64], sizes = [2, 32], strides = [1, 1]} : vector<2x128xf32> to vector<2x32xf32>
    %cst_121 = arith.constant 1.000000e+00 : f32
    %545 = vector.broadcast %cst_121 : f32 to vector<2x32xf32>
    %546 = arith.subf %545, %544 : vector<2x32xf32>
    %547 = vector.extract_strided_slice %539 {offsets = [0, 96], sizes = [2, 32], strides = [1, 1]} : vector<2x128xf32> to vector<2x32xf32>
    %548 = math.tanh %505 : vector<2x32xf32>
    %549 = arith.mulf %547, %546 : vector<2x32xf32>
    %550 = arith.subf %547, %549 : vector<2x32xf32>
    %551 = arith.subf %546, %549 : vector<2x32xf32>
    %552 = arith.mulf %543, %542 : vector<2x32xf32>
    %553 = arith.subf %543, %552 : vector<2x32xf32>
    %554 = arith.subf %542, %552 : vector<2x32xf32>
    %555 = arith.mulf %552, %499 : vector<2x32xf32>
    %556 = arith.mulf %549, %548 : vector<2x32xf32>
    %557 = arith.addf %555, %556 : vector<2x32xf32>
    %558 = arith.mulf %553, %499 : vector<2x32xf32>
    %559 = arith.mulf %550, %548 : vector<2x32xf32>
    %560 = arith.addf %558, %559 : vector<2x32xf32>
    %561 = arith.addf %560, %557 : vector<2x32xf32>
    %562 = arith.mulf %554, %499 : vector<2x32xf32>
    %563 = arith.mulf %551, %548 : vector<2x32xf32>
    %564 = arith.addf %562, %563 : vector<2x32xf32>
    %565 = arith.addf %564, %557 : vector<2x32xf32>
    %566 = math.tanh %557 : vector<2x32xf32>
    %567 = math.tanh %565 : vector<2x32xf32>
    %568 = tpu.concatenate %566, %567, %12 in 1 : vector<2x32xf32>, vector<2x32xf32>, vector<2x64xf32> -> vector<2x128xf32>
    %c0_122 = arith.constant 0 : index
    %c0_123 = arith.constant 0 : index
    %c6 = arith.constant 6 : index
    %c0_124 = arith.constant 0 : index
    %569 = vector.load %arg8[%c0_122, %c0_123, %c6, %c0_124] : memref<2x2x8x128xf32, #tpu.memory_space<vmem>>, vector<1x2x1x128xf32>
    %570 = vector.shape_cast %569 : vector<1x2x1x128xf32> to vector<2x128xf32>
    %571 = vector.shape_cast %568 : vector<2x128xf32> to vector<1x2x1x128xf32>
    tpu.vector_store %arg8[%c0_122, %c0_123, %c6, %c0_124], %571 {strides = array<i32>} : memref<2x2x8x128xf32, #tpu.memory_space<vmem>>, vector<1x2x1x128xf32>,
    %572 = math.tanh %561 : vector<2x32xf32>
    %573 = tpu.concatenate %566, %572, %12 in 1 : vector<2x32xf32>, vector<2x32xf32>, vector<2x64xf32> -> vector<2x128xf32>
    %c1_125 = arith.constant 1 : index
    %c0_126 = arith.constant 0 : index
    %c6_127 = arith.constant 6 : index
    %c0_128 = arith.constant 0 : index
    %574 = vector.load %arg8[%c1_125, %c0_126, %c6_127, %c0_128] : memref<2x2x8x128xf32, #tpu.memory_space<vmem>>, vector<1x2x1x128xf32>
    %575 = vector.shape_cast %574 : vector<1x2x1x128xf32> to vector<2x128xf32>
    %576 = vector.shape_cast %573 : vector<2x128xf32> to vector<1x2x1x128xf32>
    tpu.vector_store %arg8[%c1_125, %c0_126, %c6_127, %c0_128], %576 {strides = array<i32>} : memref<2x2x8x128xf32, #tpu.memory_space<vmem>>, vector<1x2x1x128xf32>,
    %577 = tpu.concatenate %561, %565, %557 in 1 : vector<2x32xf32>, vector<2x32xf32>, vector<2x32xf32> -> vector<2x96xf32>
    %cst_129 = arith.constant dense<0.000000e+00> : vector<2x32xf32>
    %578 = tpu.matmul %577, %9, %cst_129 {dimension_numbers = #tpu.dot_dimension_numbers<[1], [0], [0], [1], [0, 0, 1, 1], [], []>} : vector<2x96xf32>, vector<96x32xf32>, vector<2x32xf32> -> vector<2x32xf32>
    %579 = vector.broadcast %10 : vector<1x32xf32> to vector<2x32xf32>
    %580 = arith.addf %578, %579 : vector<2x32xf32>
    %581 = math.tanh %580 : vector<2x32xf32>
    %582 = vector.extract_strided_slice %7 {offsets = [7, 0, 0], sizes = [1, 2, 160], strides = [1, 1, 1]} : vector<8x2x160xf32> to vector<1x2x160xf32>
    %583 = vector.shape_cast %582 : vector<1x2x160xf32> to vector<2x160xf32>
    %cst_130 = arith.constant dense<0.000000e+00> : vector<2x160xf32>
    %584 = tpu.matmul %581, %8, %cst_130 {dimension_numbers = #tpu.dot_dimension_numbers<[1], [0], [0], [1], [0, 0, 1, 1], [], []>} : vector<2x32xf32>, vector<32x160xf32>, vector<2x160xf32> -> vector<2x160xf32>
    %585 = arith.addf %583, %584 : vector<2x160xf32>
    %586 = vector.extract_strided_slice %585 {offsets = [0, 0], sizes = [2, 32], strides = [1, 1]} : vector<2x160xf32> to vector<2x32xf32>
    %587 = vector.extract_strided_slice %585 {offsets = [0, 32], sizes = [2, 128], strides = [1, 1]} : vector<2x160xf32> to vector<2x128xf32>
    %588 = vector.extract_strided_slice %587 {offsets = [0, 0], sizes = [2, 32], strides = [1, 1]} : vector<2x128xf32> to vector<2x32xf32>
    %589 = vector.extract_strided_slice %587 {offsets = [0, 0], sizes = [2, 32], strides = [1, 1]} : vector<2x128xf32> to vector<2x32xf32>
    %cst_131 = arith.constant dense<0xFF800000> : vector<2xf32>
    %590 = vector.multi_reduction <maximumf>, %589, %cst_131 [1] : vector<2x32xf32> to vector<2xf32>
    %591 = vector.shape_cast %590 : vector<2xf32> to vector<2x1xf32>
    %592 = vector.broadcast %591 : vector<2x1xf32> to vector<2x32xf32>
    %593 = arith.subf %588, %592 : vector<2x32xf32>
    %594 = math.exp %593 : vector<2x32xf32>
    %595 = vector.extract_strided_slice %587 {offsets = [0, 32], sizes = [2, 32], strides = [1, 1]} : vector<2x128xf32> to vector<2x32xf32>
    %596 = vector.extract_strided_slice %587 {offsets = [0, 32], sizes = [2, 32], strides = [1, 1]} : vector<2x128xf32> to vector<2x32xf32>
    %cst_132 = arith.constant dense<0xFF800000> : vector<2xf32>
    %597 = vector.multi_reduction <maximumf>, %596, %cst_132 [1] : vector<2x32xf32> to vector<2xf32>
    %598 = vector.shape_cast %597 : vector<2xf32> to vector<2x1xf32>
    %599 = vector.broadcast %598 : vector<2x1xf32> to vector<2x32xf32>
    %600 = arith.subf %595, %599 : vector<2x32xf32>
    %601 = math.exp %600 : vector<2x32xf32>
    %602 = vector.extract_strided_slice %587 {offsets = [0, 64], sizes = [2, 32], strides = [1, 1]} : vector<2x128xf32> to vector<2x32xf32>
    %603 = vector.extract_strided_slice %587 {offsets = [0, 64], sizes = [2, 32], strides = [1, 1]} : vector<2x128xf32> to vector<2x32xf32>
    %cst_133 = arith.constant dense<0xFF800000> : vector<2xf32>
    %604 = vector.multi_reduction <maximumf>, %603, %cst_133 [1] : vector<2x32xf32> to vector<2xf32>
    %605 = vector.shape_cast %604 : vector<2xf32> to vector<2x1xf32>
    %606 = vector.broadcast %605 : vector<2x1xf32> to vector<2x32xf32>
    %607 = arith.subf %602, %606 : vector<2x32xf32>
    %608 = math.exp %607 : vector<2x32xf32>
    %609 = vector.extract_strided_slice %587 {offsets = [0, 96], sizes = [2, 32], strides = [1, 1]} : vector<2x128xf32> to vector<2x32xf32>
    %610 = vector.extract_strided_slice %587 {offsets = [0, 96], sizes = [2, 32], strides = [1, 1]} : vector<2x128xf32> to vector<2x32xf32>
    %cst_134 = arith.constant dense<0xFF800000> : vector<2xf32>
    %611 = vector.multi_reduction <maximumf>, %610, %cst_134 [1] : vector<2x32xf32> to vector<2xf32>
    %612 = vector.shape_cast %611 : vector<2xf32> to vector<2x1xf32>
    %613 = vector.broadcast %612 : vector<2x1xf32> to vector<2x32xf32>
    %614 = arith.subf %609, %613 : vector<2x32xf32>
    %615 = math.exp %614 : vector<2x32xf32>
    %616 = tpu.concatenate %594, %601, %608, %615 in 1 : vector<2x32xf32>, vector<2x32xf32>, vector<2x32xf32>, vector<2x32xf32> -> vector<2x128xf32>
    %cst_135 = arith.constant dense<0.000000e+00> : vector<2x256xf32>
    %617 = tpu.matmul %616, %11, %cst_135 {dimension_numbers = #tpu.dot_dimension_numbers<[1], [0], [0], [1], [0, 0, 1, 1], [], []>} : vector<2x128xf32>, vector<128x256xf32>, vector<2x256xf32> -> vector<2x256xf32>
    %618 = vector.extract_strided_slice %617 {offsets = [0, 128], sizes = [2, 128], strides = [1, 1]} : vector<2x256xf32> to vector<2x128xf32>
    %619 = vector.extract_strided_slice %617 {offsets = [0, 0], sizes = [2, 128], strides = [1, 1]} : vector<2x256xf32> to vector<2x128xf32>
    %620 = arith.divf %618, %619 : vector<2x128xf32>
    %621 = vector.extract_strided_slice %620 {offsets = [0, 0], sizes = [2, 32], strides = [1, 1]} : vector<2x128xf32> to vector<2x32xf32>
    %cst_136 = arith.constant 1.000000e+00 : f32
    %622 = vector.broadcast %cst_136 : f32 to vector<2x32xf32>
    %623 = arith.subf %622, %621 : vector<2x32xf32>
    %624 = vector.extract_strided_slice %620 {offsets = [0, 32], sizes = [2, 32], strides = [1, 1]} : vector<2x128xf32> to vector<2x32xf32>
    %625 = vector.extract_strided_slice %620 {offsets = [0, 64], sizes = [2, 32], strides = [1, 1]} : vector<2x128xf32> to vector<2x32xf32>
    %cst_137 = arith.constant 1.000000e+00 : f32
    %626 = vector.broadcast %cst_137 : f32 to vector<2x32xf32>
    %627 = arith.subf %626, %625 : vector<2x32xf32>
    %628 = vector.extract_strided_slice %620 {offsets = [0, 96], sizes = [2, 32], strides = [1, 1]} : vector<2x128xf32> to vector<2x32xf32>
    %629 = math.tanh %586 : vector<2x32xf32>
    %630 = arith.mulf %628, %627 : vector<2x32xf32>
    %631 = arith.subf %628, %630 : vector<2x32xf32>
    %632 = arith.subf %627, %630 : vector<2x32xf32>
    %633 = arith.mulf %624, %623 : vector<2x32xf32>
    %634 = arith.subf %624, %633 : vector<2x32xf32>
    %635 = arith.subf %623, %633 : vector<2x32xf32>
    %636 = arith.mulf %633, %580 : vector<2x32xf32>
    %637 = arith.mulf %630, %629 : vector<2x32xf32>
    %638 = arith.addf %636, %637 : vector<2x32xf32>
    %639 = arith.mulf %634, %580 : vector<2x32xf32>
    %640 = arith.mulf %631, %629 : vector<2x32xf32>
    %641 = arith.addf %639, %640 : vector<2x32xf32>
    %642 = arith.addf %641, %638 : vector<2x32xf32>
    %643 = arith.mulf %635, %580 : vector<2x32xf32>
    %644 = arith.mulf %632, %629 : vector<2x32xf32>
    %645 = arith.addf %643, %644 : vector<2x32xf32>
    %646 = arith.addf %645, %638 : vector<2x32xf32>
    %647 = math.tanh %638 : vector<2x32xf32>
    %648 = math.tanh %646 : vector<2x32xf32>
    %649 = tpu.concatenate %647, %648, %12 in 1 : vector<2x32xf32>, vector<2x32xf32>, vector<2x64xf32> -> vector<2x128xf32>
    %c0_138 = arith.constant 0 : index
    %c0_139 = arith.constant 0 : index
    %c7 = arith.constant 7 : index
    %c0_140 = arith.constant 0 : index
    %650 = vector.load %arg8[%c0_138, %c0_139, %c7, %c0_140] : memref<2x2x8x128xf32, #tpu.memory_space<vmem>>, vector<1x2x1x128xf32>
    %651 = vector.shape_cast %650 : vector<1x2x1x128xf32> to vector<2x128xf32>
    %652 = vector.shape_cast %649 : vector<2x128xf32> to vector<1x2x1x128xf32>
    tpu.vector_store %arg8[%c0_138, %c0_139, %c7, %c0_140], %652 {strides = array<i32>} : memref<2x2x8x128xf32, #tpu.memory_space<vmem>>, vector<1x2x1x128xf32>,
    %653 = math.tanh %642 : vector<2x32xf32>
    %654 = tpu.concatenate %647, %653, %12 in 1 : vector<2x32xf32>, vector<2x32xf32>, vector<2x64xf32> -> vector<2x128xf32>
    %c1_141 = arith.constant 1 : index
    %c0_142 = arith.constant 0 : index
    %c7_143 = arith.constant 7 : index
    %c0_144 = arith.constant 0 : index
    %655 = vector.load %arg8[%c1_141, %c0_142, %c7_143, %c0_144] : memref<2x2x8x128xf32, #tpu.memory_space<vmem>>, vector<1x2x1x128xf32>
    %656 = vector.shape_cast %655 : vector<1x2x1x128xf32> to vector<2x128xf32>
    %657 = vector.shape_cast %654 : vector<2x128xf32> to vector<1x2x1x128xf32>
    tpu.vector_store %arg8[%c1_141, %c0_142, %c7_143, %c0_144], %657 {strides = array<i32>} : memref<2x2x8x128xf32, #tpu.memory_space<vmem>>, vector<1x2x1x128xf32>,
    return
  }
  func.func @transform_0(%arg0: i32) -> (i32, i32, i32) {
    %c0_i32 = arith.constant 0 : i32
    %c0_i32_0 = arith.constant 0 : i32
    %c0_i32_1 = arith.constant 0 : i32
    %c0_i32_2 = arith.constant 0 : i32
    return %c0_i32, %c0_i32_0, %c0_i32_1 : i32, i32, i32
  }
  func.func @transform_1(%arg0: i32) -> (i32, i32) {
    %c0_i32 = arith.constant 0 : i32
    %c0_i32_0 = arith.constant 0 : i32
    %c0_i32_1 = arith.constant 0 : i32
    return %c0_i32, %c0_i32_0 : i32, i32
  }
  func.func @transform_2(%arg0: i32) -> (i32, i32) {
    %c0_i32 = arith.constant 0 : i32
    %c0_i32_0 = arith.constant 0 : i32
    %c0_i32_1 = arith.constant 0 : i32
    return %c0_i32, %c0_i32_0 : i32, i32
  }
  func.func @transform_3(%arg0: i32) -> (i32, i32) {
    %c0_i32 = arith.constant 0 : i32
    %c0_i32_0 = arith.constant 0 : i32
    %c0_i32_1 = arith.constant 0 : i32
    return %c0_i32, %c0_i32_0 : i32, i32
  }
  func.func @transform_4(%arg0: i32) -> (i32, i32) {
    %c0_i32 = arith.constant 0 : i32
    %c0_i32_0 = arith.constant 0 : i32
    %c0_i32_1 = arith.constant 0 : i32
    return %c0_i32, %c0_i32_0 : i32, i32
  }
  func.func @transform_5(%arg0: i32) -> (i32, i32) {
    %c0_i32 = arith.constant 0 : i32
    %c0_i32_0 = arith.constant 0 : i32
    %c0_i32_1 = arith.constant 0 : i32
    return %c0_i32, %c0_i32_0 : i32, i32
  }
  func.func @transform_6(%arg0: i32) -> (i32, i32) {
    %c0_i32 = arith.constant 0 : i32
    %c0_i32_0 = arith.constant 0 : i32
    %c0_i32_1 = arith.constant 0 : i32
    return %c0_i32, %c0_i32_0 : i32, i32
  }
  func.func @transform_7(%arg0: i32) -> (i32, i32, i32, i32) {
    %c0_i32 = arith.constant 0 : i32
    %c0_i32_0 = arith.constant 0 : i32
    %c0_i32_1 = arith.constant 0 : i32
    %c0_i32_2 = arith.constant 0 : i32
    %c0_i32_3 = arith.constant 0 : i32
    return %c0_i32, %c0_i32_0, %c0_i32_1, %c0_i32_2 : i32, i32, i32, i32
  }
}

</mosaic_0001>

<bundles_post_ra>
// kernel: pfn_forward.3
= control target key start
LH: loop header
LB: loop body
LE: loop exit
PB: predicated region body
PF: predicated region fallthrough
CT: control target
= control target key end

     0   :  { %s2574_s21 = smov 0   ;;  %s3131_s0 = inlined_call_operand.vmem [shape: f32[2,2,8,128], index: 0, kind: input, shape index: {}]   ;;  %s3132_s1 = inlined_call_operand.vmem [shape: f32[2,8], index: 1, kind: input, shape index: {}]   ;;  %s3133_s2 = inlined_call_operand.vmem [shape: f32[2,64,32], index: 2, kind: input, shape index: {}]   ;;  %s3134_s3 = inlined_call_operand.vmem [shape: f32[2,1,32], index: 3, kind: input, shape index: {}]   ;;  %s3135_s4 = inlined_call_operand.vmem [shape: f32[2,32,64], index: 4, kind: input, shape index: {}]   ;;  %s3136_s5 = inlined_call_operand.vmem [shape: f32[2,32,32], index: 5, kind: input, shape index: {}]   ;;  %s3137_s6 = inlined_call_operand.vmem [shape: f32[2,1,32], index: 6, kind: input, shape index: {}]   ;;  %s3138_s7 = inlined_call_operand.vmem [shape: f32[2,1,32], index: 7, kind: input, shape index: {}]   ;;  %s3139_s8 = inlined_call_operand.vmem [shape: f32[2,1,32], index: 8, kind: input, shape index: {}]   ;;  %s3140_s9 = inlined_call_operand.vmem [shape: f32[2,32,128], index: 9, kind: input, shape index: {}]   ;;  %s3141_s10 = inlined_call_operand.vmem [shape: f32[2,1,128], index: 10, kind: input, shape index: {}]   ;;  %s3142_s11 = inlined_call_operand.vmem [shape: f32[2,2,8,8,128], index: 11, kind: output, shape index: {0}]   ;;  %s3143_s12 = inlined_call_operand.vmem [shape: f32[2,2,8,32], index: 12, kind: output, shape index: {1}]  }
   0x1 LB: > { %s2580_s22 = sadd.s32 4294967295, %s2502_s21   ;;  %p2132_p0 = scmp.ge.s32.totalorder %s2502_s21, 1  ;;  %s2502_s21 = sphi %s2574_s21, %s23_s21  }
   0x2   : > { %p445_p1 = scmp.lt.s32.totalorder %s2502_s21, 3 }
   0x4   : > { %p446_p2 = pnand %p2132_p0, %p445_p1 }
   0x5   : > { %p527_p3 = scmp.lt.s32.totalorder (!%p446_p2), %s2580_s22, 1  ;;  %vm594_vm0 = vcmask (!%p446_p2), 523264   ;;  %s2504_s14 = smov (!%p446_p2), 96   ;;  %vm678_vm1 = vcmask (!%p446_p2), 261120   ;;  %v2505_v22 = vmov (!%p446_p2), 0.0|0.0   ;;  %vm2506_vm2 = vmmov (!%p446_p2), 0  }
   0x6   : > { %449 = sbr.rel (%p446_p2) target bundleno = 1107 (0x453), region = 64  ;;  %v2507_v26 = vmov (!%p446_p2), 0.0   ;;  %vm895_vm3 = vcmask (!%p446_p2), 1041409   ;;  %v2508_v54 = vmov (!%p446_p2), 1966171168   ;;  %v788_v56 = vlaneseq (!%p446_p2)  ;;  %p1794_p4 = scmp.ne.s32.totalorder (!%p446_p2), %s2580_s22, 0 }
   0x7   : > { %v786_v55 = vunpack.c.l.s4 (!%p446_p2), %v2508_v54 }
   0x8   : > { %v2633_v58 = vshrl.u32 (!%p446_p2), %v788_v56, 7 }
   0x9   : > { %v787_v57 = vunpack.c.0.s8 (!%p446_p2), %v786_v55 }
   0xb   : > { %v2636_v59 = vsub.s32 (!%p446_p2), %v787_v57, %v2633_v58 }
   0xd   : > { %s2586_s23 = scalar_select %p527_p3, %s2580_s22, 1 }
   0xf   : > { %s2192_s24 = sshll.u32 %s2586_s23, 4  ;;  %s2193_s25 = sshll.u32 %s2586_s23, 6 }
  0x10   : > { %s531_s28 = scalar_lea.vmem %s3131_s0, %s2192_s24  ;;  %s536_s13 = scalar_lea.vmem %s3133_s2, %s2193_s25 }
  0x11   : > { %v577_v0 = vld [vmem:[%s531_s28] sm:$0xff]  ;;  %v580_v2 = vld [vmem:[%s536_s13 + $0x8] sm:$0xff]  ;;  %v581_v3 = vld [vmem:[%s536_s13 + $0x10] sm:$0xff]  ;;  %s2602_s15 = sshll.u32 %s2586_s23, 5  ;;  %s552_s16 = scalar_lea.vmem %s3137_s6, %s2586_s23 }
  0x12   : > { %699 = vrot.lane.b32.xlu0 %v577_v0, %s2504_s14  ;;  %v579_v1 = vld [vmem:[%s536_s13] sm:$0xff]  ;;  %2256 = vmatprep.mubr.msk.f32.mxu1 %vm594_vm0, %v577_v0  ;;  %v578_v5 = vld [vmem:[%s531_s28 + $0x8] sm:$0xff]  ;;  %v582_v6 = vld [vmem:[%s536_s13 + $0x18] sm:$0xff]  ;;  %s544_s18 = scalar_lea.vmem %s3135_s4, %s2602_s15  ;;  %s549_s25 = scalar_lea.vmem %s3136_s5, %s2602_s15 }
  0x13   : > { %v2313_v4 = vpack.c.bf16 %v580_v2, %v579_v1  ;;  %v2317_v7 = vpack.c.bf16 %v582_v6, %v581_v3  ;;  %v583_v8 = vld [vmem:[%s536_s13 + $0x20] sm:$0xff]  ;;  %v584_v9 = vld [vmem:[%s536_s13 + $0x28] sm:$0xff]  ;;  %v585_v11 = vld [vmem:[%s536_s13 + $0x30] sm:$0xff]  ;;  %s539_s28 = scalar_lea.vmem %s3134_s3, %s2586_s23  ;;  %s555_s27 = scalar_lea.vmem %s3138_s7, %s2586_s23 }
  0x14   : > { %v2321_v10 = vpack.c.bf16 %v584_v9, %v583_v8  ;;  %v586_v12 = vld [vmem:[%s536_s13 + $0x38] sm:$0xff]  ;;  %v695_v14 = vld [vmem:[%s544_s18] sm:$0xff]  ;;  %v696_v15 = vld [vmem:[%s544_s18 + $0x8] sm:$0xff]  ;;  %s576_s13 = scalar_lea.vmem %s3143_s12, %s2192_s24  ;;  %v2645_v8 = vsub.s32 0, %v2633_v58  ;;  %s558_s30 = scalar_lea.vmem %s3139_s8, %s2586_s23 }
  0x15   : > { %2314 = vmatprep.subr.bf16.mxu1 %v2313_v4  ;;  %v2325_v13 = vpack.c.bf16 %v586_v12, %v585_v11  ;;  %v2329_v16 = vpack.c.bf16 %v696_v15, %v695_v14  ;;  %v697_v17 = vld [vmem:[%s544_s18 + $0x10] sm:$0xff]  ;;  %v698_v18 = vld [vmem:[%s544_s18 + $0x18] sm:$0xff]  ;;  %v882_v23 = vld [vmem:[%s549_s25] sm:$0xff] }
  0x16   : > { %2316 = vmatpush3.bf16.msra.mxu1 %v2313_v4  ;;  %701 = vrot.lane.b32.xlu0 %v578_v5, %s2504_s14  ;;  %v2333_v19 = vpack.c.bf16 %v698_v18, %v697_v17  ;;  %v883_v24 = vld [vmem:[%s549_s25 + $0x8] sm:$0xff]  ;;  %v884_v25 = vld [vmem:[%s549_s25 + $0x10] sm:$0xff]  ;;  %v885_v28 = vld [vmem:[%s549_s25 + $0x18] sm:$0xff]  ;;  %s563_s25 = scalar_lea.vmem %s3140_s9, %s2602_s15 }
  0x17   : > { %2318 = vmatprep.subr.bf16.mxu1 %v2317_v7  ;;  %v2338_v27 = vpack.c.bf16 %v883_v24, %v882_v23  ;;  %v2341_v29 = vpack.c.bf16 %v885_v28, %v884_v25  ;;  %v2147_v30 = vld [vmem:[%s539_s28] ss:$0 sm:$0xff] }
  0x18   : > { %v2152_v17 = vld [vmem:[%s552_s16] ss:$0 sm:$0xff]  ;;  %s2197_s16 = sshll.u32 %s2586_s23, 7 }
  0x19   : > { %s3107_s19 = scalar_lea.vmem %s3142_s11, %s2197_s16 }
  0x1a   : > { %2320 = vmatpush3.bf16.msra.mxu1 %v2317_v7 }
  0x1b   : > { %2322 = vmatprep.subr.bf16.mxu1 %v2321_v10 }
  0x1e   : > { %2324 = vmatpush3.bf16.msra.mxu1 %v2321_v10 }
  0x1f   : > { %2326 = vmatprep.subr.bf16.mxu1 %v2325_v13 }
  0x22   : > { %2328 = vmatpush3.bf16.msra.mxu1 %v2325_v13 }
  0x23   : > { %2330 = vmatprep.subr.bf16.mxu1 %v2329_v16 }
  0x25   : > { %2257 = vmatmul.mubr.msk.f32.vlgmr.msra.gmra.mrb[0].mxu1 %vm594_vm0, %v578_v5 }
  0x26   : > { %2332 = vmatpush3.bf16.msra.mxu1 %v2329_v16 }
  0x27   : > { %2334 = vmatprep.subr.bf16.mxu1 %v2333_v19 }
  0x2a   : > { %2336 = vmatpush3.bf16.msra.mxu1 %v2333_v19 }
  0x2b   : > { %2337 = vmatprep.subr.bf16.mxu1 %v2505_v22 }
  0x84   : > { %v700_v20 = vpop.permute.xlu0 %699 }
  0x85   : > { %2267 = vmatprep.mubr.msk.f32.mxu1 %vm678_vm1, %v700_v20 }
  0x88   : > { %v702_v21 = vpop.permute.xlu0 %701 }
  0x89   : > { %2268 = vmatmul.mubr.msk.f32.vlgmr.msra.gmra.mrb[2].mxu1 %vm678_vm1, %v702_v21 }
  0x8a   : > { %2278 = vmatprep.mubr.msk.f32.mxu1 %vm2506_vm2, %v2507_v26  ;;  %2339 = vmatpush3.bf16.msra.mxu1 %v2338_v27 }
  0x8b   : > { %2340 = vmatprep.subr.bf16.mxu1 %v2505_v22 }
  0x8e   : > { %2342 = vmatpush3.bf16.msra.mxu1 %v2341_v29 }
  0xf8   : > { %v2258_v31 = vpop.f32.mrb[0].mxu1 }
  0xf9   : > { %v673_v32 = vadd.f32 %v2258_v31, %v2147_v30  ;;  %v667_v33 = vpop.f32.mrb[1].mxu1 }
  0xfa   : > { %v668_v34 = vadd.f32 %v2147_v30, %v667_v33 }
  0xfb   : > { %2364 = vtanh.f32 %v673_v32 }
  0xfc   : > { %2366 = vtanh.f32 %v668_v34 }
 0x105   : > { %v2365_v35 = vpop.eup %2364 }
 0x106   : > { %v2367_v36 = vpop.eup %2366  ;;  %680 = vst.msk [vmem:[%s576_s13 + $0x8] sm:$0xff] %vm678_vm1, %v2365_v35  ;;  %v688_v37 = vsel %vm678_vm1, %v2365_v35, -inf }
 0x107   : > { %v689_v38 = vrot.slane %v688_v37, 4  ;;  %679 = vst.msk [vmem:[%s576_s13] sm:$0xff] %vm678_vm1, %v2367_v36  ;;  %v681_v39 = vsel %vm678_vm1, %v2367_v36, -inf  ;;  %s2876_s13 = scalar_select %p1794_p4, 1, 0 }
 0x108   : > { %v682_v40 = vrot.slane %v681_v39, 4 }
 0x109   : > { %v690_v41 = vmax.f32 %v688_v37, %v689_v38 }
 0x10a   : > { %v683_v42 = vmax.f32 %v681_v39, %v682_v40 }
 0x10b   : > { %v691_v43 = vrot.slane %v690_v41, 2 }
 0x10c   : > { %v684_v44 = vrot.slane %v683_v42, 2 }
 0x10d   : > { %v692_v45 = vmax.f32 %v690_v41, %v691_v43 }
 0x10e   : > { %v685_v46 = vmax.f32 %v683_v42, %v684_v44 }
 0x10f   : > { %v693_v47 = vrot.slane %v692_v45, 1 }
 0x110   : > { %v686_v48 = vrot.slane %v685_v46, 1 }
 0x111   : > { %v694_v49 = vmax.f32 %v692_v45, %v693_v47 }
 0x112   : > { %v687_v50 = vmax.f32 %v685_v46, %v686_v48 }
 0x114   : > { %v896_v51 = vsel %vm895_vm3, %v694_v49, %v687_v50 }
 0x115   : > { %2279 = vmatmul.mubr.msk.f32.vlgmr.msra.gmra.mrb[4].mxu1 %vm678_vm1, %v896_v51 }
 0x15c   : > { %v2269_v52 = vpop.f32.mrb[2].mxu1 }
 0x15d   : > { %v773_v53 = vpop.f32.mrb[3].mxu1  ;;  %v833_v61 = vcombine.high %v2269_v52, %v2269_v52  ;;  %v840_v63 = vrot.slane %v2269_v52, %v2636_v59 }
 0x15e   : > { %1072 = vrot.lane.b32.xlu1 %v773_v53, %s2504_s14  ;;  %v784_v60 = vcombine.high %v773_v53, %v773_v53  ;;  %v791_v62 = vrot.slane %v773_v53, %v2636_v59 }
 0x15f   : > { %v847_v1 = vrot.slane %v833_v61, %v2636_v59  ;;  %v848_v3 = vcombine.high %v840_v63, %v840_v63  ;;  %v856_v6 = vrot.slane %v840_v63, %v2636_v59 }
 0x160   : > { %v798_v0 = vrot.slane %v784_v60, %v2636_v59  ;;  %v799_v2 = vcombine.high %v791_v62, %v791_v62  ;;  %v807_v7 = vrot.slane %v791_v62, %v2636_v59 }
 0x161   : > { %v849_v5 = vcombine.high %v847_v1, %v847_v1  ;;  %v863_v11 = vrot.slane %v847_v1, %v2636_v59  ;;  %v870_v12 = vrot.slane %v848_v3, %v2636_v59  ;;  %v878_v14 = vcombine.high %v856_v6, %v856_v6 }
 0x162   : > { %1074 = vrot.lane.b32.xlu1 %v2269_v52, %s2504_s14  ;;  %v800_v4 = vcombine.high %v798_v0, %v798_v0  ;;  %v814_v9 = vrot.slane %v798_v0, %v2636_v59  ;;  %v821_v10 = vrot.slane %v799_v2, %v2636_v59  ;;  %v829_v16 = vcombine.high %v807_v7, %v807_v7  ;;  %s566_s14 = scalar_lea.vmem %s3141_s10, %s2586_s23 }
 0x163   : > { %v2657_v15 = vrot.slane %v849_v5, %v2636_v59  ;;  %v995_v19 = vrot.slane %v807_v7, %v2645_v8  ;;  %v1027_v23 = vrot.slane %v856_v6, %v2645_v8  ;;  %v880_v25 = vcombine.high %v870_v12, %v870_v12 }
 0x164   : > { %v828_v13 = vrot.slane %v800_v4, %v2636_v59  ;;  %v830_v20 = vcombine.high %v814_v9, %v814_v9  ;;  %v831_v21 = vcombine.high %v821_v10, %v821_v10  ;;  %v879_v27 = vcombine.high %v863_v11, %v863_v11 }
 0x165   : > { %v1035_v30 = vrot.slane %v878_v14, %v2645_v8  ;;  %v1031_v31 = vrot.slane %v870_v12, %v2645_v8  ;;  %v881_v32 = vcombine.high %v2657_v15, %v2657_v15  ;;  %v999_v33 = vrot.slane %v821_v10, %v2645_v8 }
 0x166   : > { %v832_v24 = vcombine.high %v828_v13, %v828_v13  ;;  %v1011_v34 = vrot.slane %v814_v9, %v2645_v8  ;;  %v1003_v35 = vrot.slane %v829_v16, %v2645_v8  ;;  %v1043_v36 = vrot.slane %v863_v11, %v2645_v8 }
 0x167   : > { %v1019_v38 = vrot.slane %v830_v20, %v2645_v8  ;;  %v1007_v39 = vrot.slane %v831_v21, %v2645_v8  ;;  %v1015_v40 = vrot.slane %v828_v13, %v2645_v8  ;;  %v1039_v42 = vrot.slane %v880_v25, %v2645_v8 }
 0x168   : > { %v1023_v41 = vrot.slane %v832_v24, %v2645_v8  ;;  %v1051_v43 = vrot.slane %v879_v27, %v2645_v8  ;;  %v1047_v44 = vrot.slane %v2657_v15, %v2645_v8  ;;  %v1055_v49 = vrot.slane %v881_v32, %v2645_v8 }
 0x1d0   : > { %v1073_v18 = vpop.permute.xlu1 %1072 }
 0x1d1   : > { %v1079_v48 = vadd.f32 %v1073_v18, %v999_v33  ;;  %v1078_v50 = vadd.f32 %v1073_v18, %v995_v19  ;;  %v1082_v51 = vadd.f32 %v1073_v18, %v1011_v34  ;;  %v1080_v52 = vadd.f32 %v1073_v18, %v1003_v35 }
 0x1d2   : > { %v1084_v53 = vadd.f32 %v1073_v18, %v1019_v38  ;;  %v1081_v57 = vadd.f32 %v1073_v18, %v1007_v39  ;;  %v1083_v60 = vadd.f32 %v1073_v18, %v1015_v40  ;;  %v1085_v62 = vadd.f32 %v1073_v18, %v1023_v41 }
 0x1d4   : > { %v1075_v45 = vpop.permute.xlu1 %1074 }
 0x1d5   : > { %v1086_v61 = vadd.f32 %v1075_v45, %v1027_v23  ;;  %v1088_v63 = vadd.f32 %v1075_v45, %v1035_v30  ;;  %v1087_v0 = vadd.f32 %v1075_v45, %v1031_v31  ;;  %v1090_v13 = vadd.f32 %v1075_v45, %v1043_v36 }
 0x1d6   : > { %v1089_v14 = vadd.f32 %v1075_v45, %v1039_v42  ;;  %v1092_v15 = vadd.f32 %v1075_v45, %v1051_v43  ;;  %v1091_v16 = vadd.f32 %v1075_v45, %v1047_v44  ;;  %v1093_v20 = vadd.f32 %v1075_v45, %v1055_v49 }
 0x1e8   : > { %v965_v22 = vpop.f32.mrb[4].mxu1 }
 0x1e9   : > { %v966_v28 = vadd.f32 %v2152_v17, %v965_v22  ;;  %v2280_v29 = vpop.f32.mrb[5].mxu1 }
 0x1eb   : > { %v976_v37 = vrot.slane %v966_v28, %v2636_v59 }
 0x1ed   : > { %v977_v46 = vcombine.high %v976_v37, %v976_v37  ;;  %v984_v47 = vrot.slane %v976_v37, %v2636_v59 }
 0x1ef   : > { %v991_v54 = vrot.slane %v977_v46, %v2636_v59  ;;  %v1097_v55 = vrot.slane %v984_v47, %v2645_v8 }
 0x1f1   : > { %v1101_v1 = vrot.slane %v991_v54, %v2645_v8  ;;  %v1105_v2 = vadd.f32 %v1097_v55, %v1079_v48  ;;  %v1104_v3 = vadd.f32 %v1097_v55, %v1078_v50  ;;  %v2683_v4 = vadd.f32 %v1097_v55, %v1082_v51 }
 0x1f2   : > { %v2685_v5 = vadd.f32 %v1097_v55, %v1080_v52  ;;  %v2687_v6 = vadd.f32 %v1097_v55, %v1084_v53  ;;  %v2689_v7 = vadd.f32 %v1097_v55, %v1081_v57  ;;  %v2691_v9 = vadd.f32 %v1097_v55, %v1083_v60 }
 0x1f3   : > { %v1123_v10 = vsel %vm678_vm1, %v1105_v2, 0.0  ;;  %v1120_v11 = vsel %vm678_vm1, %v1104_v3, 0.0  ;;  %v2695_v12 = vadd.f32 %v1101_v1, %v1086_v61  ;;  %v2697_v17 = vadd.f32 %v1097_v55, %v1085_v62 }
 0x1f4   : > { %1124 = vadd.xlane.f32.xlu1 %v1123_v10  ;;  %1121 = vadd.xlane.f32.xlu0 %v1120_v11  ;;  %v2699_v18 = vadd.f32 %v1101_v1, %v1088_v63  ;;  %v2701_v19 = vadd.f32 %v1101_v1, %v1087_v0  ;;  %v2703_v21 = vadd.f32 %v1101_v1, %v1090_v13  ;;  %v1132_v25 = vsel %vm678_vm1, %v2683_v4, 0.0 }
 0x1f5   : > { %v2705_v22 = vadd.f32 %v1101_v1, %v1089_v14  ;;  %v2707_v23 = vadd.f32 %v1101_v1, %v1092_v15  ;;  %v2709_v24 = vadd.f32 %v1101_v1, %v1091_v16  ;;  %v1126_v27 = vsel %vm678_vm1, %v2685_v5, 0.0 }
 0x1f6   : > { %v2715_v28 = vadd.f32 %v1101_v1, %v1093_v20  ;;  %v1138_v29 = vsel %vm678_vm1, %v2687_v6, 0.0  ;;  %v1129_v30 = vsel %vm678_vm1, %v2689_v7, 0.0  ;;  %v1135_v31 = vsel %vm678_vm1, %v2691_v9, 0.0 }
 0x1f7   : > { %v1144_v32 = vsel %vm678_vm1, %v2695_v12, 0.0  ;;  %v1141_v33 = vsel %vm678_vm1, %v2697_v17, 0.0  ;;  %v1150_v34 = vsel %vm678_vm1, %v2699_v18, 0.0  ;;  %v1147_v35 = vsel %vm678_vm1, %v2701_v19, 0.0 }
 0x1f8   : > { %1133 = vadd.xlane.f32.xlu1 %v1132_v25  ;;  %1127 = vadd.xlane.f32.xlu0 %v1126_v27  ;;  %v1156_v36 = vsel %vm678_vm1, %v2703_v21, 0.0  ;;  %v1153_v37 = vsel %vm678_vm1, %v2705_v22, 0.0  ;;  %v1162_v38 = vsel %vm678_vm1, %v2707_v23, 0.0  ;;  %v1159_v39 = vsel %vm678_vm1, %v2709_v24, 0.0 }
 0x1f9   : > { %v1165_v40 = vsel %vm678_vm1, %v2715_v28, 0.0 }
 0x1fc   : > { %1139 = vadd.xlane.f32.xlu1 %v1138_v29  ;;  %1130 = vadd.xlane.f32.xlu0 %v1129_v30 }
 0x200   : > { %1136 = vadd.xlane.f32.xlu0 %v1135_v31  ;;  %1145 = vadd.xlane.f32.xlu1 %v1144_v32 }
 0x204   : > { %1142 = vadd.xlane.f32.xlu0 %v1141_v33  ;;  %1151 = vadd.xlane.f32.xlu1 %v1150_v34 }
 0x208   : > { %1148 = vadd.xlane.f32.xlu0 %v1147_v35  ;;  %1157 = vadd.xlane.f32.xlu1 %v1156_v36 }
 0x20c   : > { %1154 = vadd.xlane.f32.xlu0 %v1153_v37  ;;  %1163 = vadd.xlane.f32.xlu1 %v1162_v38 }
 0x210   : > { %1160 = vadd.xlane.f32.xlu0 %v1159_v39 }
 0x214   : > { %1166 = vadd.xlane.f32.xlu0 %v1165_v40 }
 0x281   : > { %v1125_v41 = vpop.xlane.xlu1 %1124  ;;  %v1122_v42 = vpop.xlane.xlu0 %1121 }
 0x282   : > { %v1170_v43 = vmul.f32 0.03125, %v1125_v41  ;;  %v1169_v44 = vmul.f32 0.03125, %v1122_v42 }
 0x284   : > { %v2741_v45 = vsub.f32 %v1105_v2, %v1170_v43  ;;  %v2743_v46 = vsub.f32 %v1104_v3, %v1169_v44 }
 0x285   : > { %v1134_v47 = vpop.xlane.xlu1 %1133  ;;  %v1128_v48 = vpop.xlane.xlu0 %1127 }
 0x286   : > { %v1173_v49 = vmul.f32 0.03125, %v1134_v47  ;;  %v1171_v50 = vmul.f32 0.03125, %v1128_v48  ;;  %v1202_v51 = vmul.f32 %v2741_v45, %v2741_v45  ;;  %v1201_v52 = vmul.f32 %v2743_v46, %v2743_v46 }
 0x288   : > { %v2750_v53 = vsub.f32 %v2683_v4, %v1173_v49  ;;  %v2753_v54 = vsub.f32 %v2685_v5, %v1171_v50  ;;  %v1220_v55 = vsel %vm678_vm1, %v1202_v51, 0.0  ;;  %v1217_v57 = vsel %vm678_vm1, %v1201_v52, 0.0 }
 0x289   : > { %v1140_v60 = vpop.xlane.xlu1 %1139  ;;  %v1131_v61 = vpop.xlane.xlu0 %1130  ;;  %1221 = vadd.xlane.f32.xlu0 %v1220_v55  ;;  %1218 = vadd.xlane.f32.xlu1 %v1217_v57 }
 0x28a   : > { %v1175_v62 = vmul.f32 0.03125, %v1140_v60  ;;  %v1172_v63 = vmul.f32 0.03125, %v1131_v61  ;;  %v1203_v0 = vmul.f32 %v2753_v54, %v2753_v54  ;;  %v1205_v4 = vmul.f32 %v2750_v53, %v2750_v53 }
 0x28c   : > { %v2760_v1 = vsub.f32 %v2687_v6, %v1175_v62  ;;  %v2763_v2 = vsub.f32 %v2689_v7, %v1172_v63  ;;  %v1223_v3 = vsel %vm678_vm1, %v1203_v0, 0.0  ;;  %v1229_v20 = vsel %vm678_vm1, %v1205_v4, 0.0 }
 0x28d   : > { %v1137_v5 = vpop.xlane.xlu0 %1136  ;;  %1224 = vadd.xlane.f32.xlu1 %v1223_v3  ;;  %v1146_v10 = vpop.xlane.xlu1 %1145 }
 0x28e   : > { %v1174_v11 = vmul.f32 0.03125, %v1137_v5  ;;  %v1177_v13 = vmul.f32 0.03125, %v1146_v10  ;;  %v1204_v14 = vmul.f32 %v2763_v2, %v2763_v2  ;;  %v1207_v6 = vmul.f32 %v2760_v1, %v2760_v1 }
 0x290   : > { %v2773_v15 = vsub.f32 %v2691_v9, %v1174_v11  ;;  %v2776_v7 = vsub.f32 %v2695_v12, %v1177_v13  ;;  %v1226_v16 = vsel %vm678_vm1, %v1204_v14, 0.0  ;;  %v1235_v32 = vsel %vm678_vm1, %v1207_v6, 0.0  ;;  %v1739_v13 = vld [vmem:[%s3132_s1] sm:$0x3]  ;;  %v1456_v6 = vld [vmem:[%s563_s25 + $0x8] sm:$0xff] }
 0x291   : > { %v1143_v25 = vpop.xlane.xlu0 %1142  ;;  %1227 = vadd.xlane.f32.xlu0 %v1226_v16  ;;  %1230 = vadd.xlane.f32.xlu1 %v1229_v20  ;;  %v1152_v27 = vpop.xlane.xlu1 %1151  ;;  %v1743_v14 = vrot.slane %v1739_v13, %v2645_v8  ;;  %v1457_v20 = vld [vmem:[%s563_s25 + $0x10] sm:$0xff] }
 0x292   : > { %v1176_v29 = vmul.f32 0.03125, %v1143_v25  ;;  %v1179_v30 = vmul.f32 0.03125, %v1152_v27  ;;  %v1206_v31 = vmul.f32 %v2773_v15, %v2773_v15  ;;  %v1209_v34 = vmul.f32 %v2776_v7, %v2776_v7  ;;  %v1458_v25 = vld [vmem:[%s563_s25 + $0x18] sm:$0xff] }
 0x293   : > { %v2347_v27 = vpack.c.bf16 %v1458_v25, %v1457_v20 }
 0x294   : > { %v2784_v9 = vsub.f32 %v2697_v17, %v1176_v29  ;;  %v2787_v12 = vsub.f32 %v2699_v18, %v1179_v30  ;;  %v1232_v33 = vsel %vm678_vm1, %v1206_v31, 0.0  ;;  %v1241_v42 = vsel %vm678_vm1, %v1209_v34, 0.0 }
 0x295   : > { %1233 = vadd.xlane.f32.xlu0 %v1232_v33  ;;  %v1149_v35 = vpop.xlane.xlu0 %1148  ;;  %1236 = vadd.xlane.f32.xlu1 %v1235_v32  ;;  %v1158_v36 = vpop.xlane.xlu1 %1157  ;;  %v2844_v29 = vsub.s32 1, %v2633_v58 }
 0x296   : > { %v1178_v37 = vmul.f32 0.03125, %v1149_v35  ;;  %v1181_v38 = vmul.f32 0.03125, %v1158_v36  ;;  %v1208_v39 = vmul.f32 %v2784_v9, %v2784_v9  ;;  %v1211_v17 = vmul.f32 %v2787_v12, %v2787_v12 }
 0x297   : > { %v1750_v30 = vrot.slane %v1739_v13, %v2844_v29 }
 0x298   : > { %v2797_v18 = vsub.f32 %v2701_v19, %v1178_v37  ;;  %v2800_v40 = vsub.f32 %v2703_v21, %v1181_v38  ;;  %v1238_v41 = vsel %vm678_vm1, %v1208_v39, 0.0  ;;  %v1247_v50 = vsel %vm678_vm1, %v1211_v17, 0.0 }
 0x299   : > { %1239 = vadd.xlane.f32.xlu0 %v1238_v41  ;;  %v1155_v43 = vpop.xlane.xlu0 %1154  ;;  %1242 = vadd.xlane.f32.xlu1 %v1241_v42  ;;  %v1164_v44 = vpop.xlane.xlu1 %1163 }
 0x29a   : > { %v1180_v47 = vmul.f32 0.03125, %v1155_v43  ;;  %v1183_v48 = vmul.f32 0.03125, %v1164_v44  ;;  %v1210_v49 = vmul.f32 %v2797_v18, %v2797_v18  ;;  %v1213_v52 = vmul.f32 %v2800_v40, %v2800_v40 }
 0x29c   : > { %v2808_v19 = vsub.f32 %v2705_v22, %v1180_v47  ;;  %v2811_v21 = vsub.f32 %v2707_v23, %v1183_v48  ;;  %v1244_v51 = vsel %vm678_vm1, %v1210_v49, 0.0  ;;  %v1253_v23 = vsel %vm678_vm1, %v1213_v52, 0.0  ;;  %v2855_v52 = vld [vmem:[%s555_s27] ss:$0 sm:$0xff] }
 0x29d   : > { %1245 = vadd.xlane.f32.xlu0 %v1244_v51  ;;  %v1161_v55 = vpop.xlane.xlu0 %1160  ;;  %1248 = vadd.xlane.f32.xlu1 %v1247_v50 }
 0x29e   : > { %v1182_v57 = vmul.f32 0.03125, %v1161_v55  ;;  %v1212_v60 = vmul.f32 %v2808_v19, %v2808_v19  ;;  %v1215_v62 = vmul.f32 %v2811_v21, %v2811_v21 }
 0x2a0   : > { %v2819_v61 = vsub.f32 %v2709_v24, %v1182_v57  ;;  %v1250_v22 = vsel %vm678_vm1, %v1212_v60, 0.0  ;;  %v1259_v5 = vsel %vm678_vm1, %v1215_v62, 0.0 }
 0x2a1   : > { %1251 = vadd.xlane.f32.xlu0 %v1250_v22  ;;  %v1167_v63 = vpop.xlane.xlu0 %1166  ;;  %1254 = vadd.xlane.f32.xlu1 %v1253_v23  ;;  %v2858_v22 = vrot.slane %v1739_v13, %v2636_v59 }
 0x2a2   : > { %v1184_v0 = vmul.f32 0.03125, %v1167_v63  ;;  %v1214_v3 = vmul.f32 %v2819_v61, %v2819_v61 }
 0x2a3   : > { %v1769_v20 = vrot.slane %v2858_v22, %v2636_v59 }
 0x2a4   : > { %v2828_v4 = vsub.f32 %v2715_v28, %v1184_v0  ;;  %v1256_v24 = vsel %vm678_vm1, %v1214_v3, 0.0  ;;  %v1455_v28 = vld [vmem:[%s563_s25] sm:$0xff]  ;;  %v2863_v3 = vand.u32 127, %v788_v56 }
 0x2a5   : > { %1257 = vadd.xlane.f32.xlu0 %v1256_v24  ;;  %1260 = vadd.xlane.f32.xlu1 %v1259_v5  ;;  %v2343_v16 = vpack.c.bf16 %v1456_v6, %v1455_v28  ;;  %v1826_v28 = vsub.s32 3, %v2633_v58 }
 0x2a6   : > { %v1216_v10 = vmul.f32 %v2828_v4, %v2828_v4  ;;  %vm1793_vm4 = vcmp.le.s32.totalorder %v2633_v58, %v2863_v3 }
 0x2a7   : > { %2344 = vmatprep.subr.bf16.mxu0 %v2343_v16 }
 0x2a8   : > { %v1262_v11 = vsel %vm678_vm1, %v1216_v10, 0.0  ;;  %2346 = vmatpush3.bf16.msra.mxu0 %v2343_v16 }
 0x2a9   : > { %1263 = vadd.xlane.f32.xlu0 %v1262_v11  ;;  %2348 = vmatprep.subr.bf16.mxu0 %v2347_v27  ;;  %v2866_v11 = vld [vmem:[%s558_s30] ss:$0 sm:$0xff] }
 0x2ac   : > { %2350 = vmatpush3.bf16.msra.mxu0 %v2347_v27 }
 0x2b6   : > { %1745 = vbcast.lane.b32.xlu1 %v1743_v14, 256  ;;  %v1819_v14 = vsub.s32 2, %v2633_v58 }
 0x2bf   : > { %1752 = vbcast.lane.b32.xlu0 %v1750_v30, 256 }
 0x316   : > { %v1222_v31 = vpop.xlane.xlu0 %1221  ;;  %v1219_v32 = vpop.xlane.xlu1 %1218 }
 0x317   : > { %v1266_v33 = vmul.f32 0.03125, %v1222_v31  ;;  %v1265_v34 = vmul.f32 0.03125, %v1219_v32  ;;  %v1833_v31 = vsub.s32 4, %v2633_v58  ;;  %v1840_v32 = vsub.s32 5, %v2633_v58 }
 0x319   : > { %v1282_v35 = vadd.f32 1e-05, %v1266_v33  ;;  %v1281_v36 = vadd.f32 1e-05, %v1265_v34 }
 0x31a   : > { %v1225_v37 = vpop.xlane.xlu1 %1224 }
 0x31b   : > { %2368 = vrsqrt.f32 %v1282_v35  ;;  %v1267_v38 = vmul.f32 0.03125, %v1225_v37 }
 0x31c   : > { %2370 = vrsqrt.f32 %v1281_v36 }
 0x31d   : > { %v1283_v39 = vadd.f32 1e-05, %v1267_v38  ;;  %v1847_v38 = vsub.s32 6, %v2633_v58 }
 0x31e   : > { %v1228_v17 = vpop.xlane.xlu0 %1227  ;;  %v1231_v41 = vpop.xlane.xlu1 %1230 }
 0x31f   : > { %2372 = vrsqrt.f32 %v1283_v39  ;;  %v1268_v42 = vmul.f32 0.03125, %v1228_v17  ;;  %v1269_v43 = vmul.f32 0.03125, %v1231_v41  ;;  %v1796_v41 = vstv %s2876_s13 }
 0x320   : > { %vm1797_vm5 = vcmp.eq.s32.totalorder %v1796_v41, 1 }
 0x321   : > { %v1284_v44 = vadd.f32 1e-05, %v1268_v42  ;;  %v1285_v47 = vadd.f32 1e-05, %v1269_v43  ;;  %vm2918_vm6 = vmor %vm1793_vm4, %vm1797_vm5 }
 0x322   : > { %v1234_v48 = vpop.xlane.xlu0 %1233  ;;  %v1237_v49 = vpop.xlane.xlu1 %1236 }
 0x323   : > { %2374 = vrsqrt.f32 %v1284_v44  ;;  %v1270_v50 = vmul.f32 0.03125, %v1234_v48  ;;  %v1271_v51 = vmul.f32 0.03125, %v1237_v49 }
 0x324   : > { %2376 = vrsqrt.f32 %v1285_v47 }
 0x325   : > { %v2369_v55 = vpop.eup %2368  ;;  %v1286_v57 = vadd.f32 1e-05, %v1270_v50  ;;  %v1287_v60 = vadd.f32 1e-05, %v1271_v51 }
 0x326   : > { %v2371_v23 = vpop.eup %2370  ;;  %v1240_v62 = vpop.xlane.xlu0 %1239  ;;  %v1314_v0 = vmul.f32 %v2369_v55, %v2741_v45 }
 0x327   : > { %v1243_v63 = vpop.xlane.xlu1 %1242  ;;  %2378 = vrsqrt.f32 %v1286_v57  ;;  %v1272_v24 = vmul.f32 0.03125, %v1240_v62  ;;  %v1313_v10 = vmul.f32 %v2371_v23, %v2743_v46  ;;  %v1762_v23 = vcombine.high %v2858_v22, %v2858_v22 }
 0x328   : > { %v1273_v5 = vmul.f32 0.03125, %v1243_v63  ;;  %2380 = vrsqrt.f32 %v1287_v60  ;;  %v1337_v13 = vmul.f32 %v2855_v52, %v1314_v0 }
 0x329   : > { %v2373_v6 = vpop.eup %2372  ;;  %v1288_v45 = vadd.f32 1e-05, %v1272_v24  ;;  %v1336_v56 = vmul.f32 %v2855_v52, %v1313_v10 }
 0x32a   : > { %v1289_v16 = vadd.f32 1e-05, %v1273_v5  ;;  %v1246_v46 = vpop.xlane.xlu0 %1245  ;;  %v2879_v27 = vadd.f32 %v2866_v11, %v1337_v13  ;;  %v1315_v30 = vmul.f32 %v2373_v6, %v2753_v54 }
 0x32b   : > { %v1249_v25 = vpop.xlane.xlu1 %1248  ;;  %2382 = vrsqrt.f32 %v1288_v45  ;;  %v1274_v33 = vmul.f32 0.03125, %v1246_v46  ;;  %v2885_v35 = vadd.f32 %v2866_v11, %v1336_v56  ;;  %v1780_v46 = vrot.slane %v1769_v20, %v2645_v8 }
 0x32c   : > { %v1275_v34 = vmul.f32 0.03125, %v1249_v25  ;;  %2384 = vrsqrt.f32 %v1289_v16  ;;  %v1393_v36 = vmul.f32 1.442695, %v2879_v27  ;;  %v1338_v37 = vmul.f32 %v2855_v52, %v1315_v30 }
 0x32d   : > { %v2375_v39 = vpop.eup %2374  ;;  %v1290_v17 = vadd.f32 1e-05, %v1274_v33  ;;  %v1391_v47 = vmul.f32 1.442695, %v2885_v35  ;;  %vm1375_vm7 = vcmp.gt.f32.partialorder %v2885_v35, 0.0  ;;  %vm1376_vm8 = vcmp.gt.f32.partialorder %v2879_v27, 0.0 }
 0x32e   : > { %v1291_v54 = vadd.f32 1e-05, %v1275_v34  ;;  %v2377_v42 = vpop.eup %2376  ;;  %v1252_v43 = vpop.xlane.xlu0 %1251  ;;  %2386 = vpow2.f32 %v1393_v36  ;;  %v2895_v48 = vadd.f32 %v2866_v11, %v1338_v37  ;;  %v1316_v49 = vmul.f32 %v2375_v39, %v2763_v2 }
 0x32f   : > { %v1255_v44 = vpop.xlane.xlu1 %1254  ;;  %2388 = vrsqrt.f32 %v1290_v17  ;;  %v1276_v50 = vmul.f32 0.03125, %v1252_v43  ;;  %v1317_v55 = vmul.f32 %v2377_v42, %v2750_v53  ;;  %v2923_v36 = vrot.slane %v1762_v23, %v2636_v59 }
 0x330   : > { %v1277_v51 = vmul.f32 0.03125, %v1255_v44  ;;  %2390 = vrsqrt.f32 %v1291_v54  ;;  %v1395_v57 = vmul.f32 1.442695, %v2895_v48  ;;  %v1339_v60 = vmul.f32 %v2855_v52, %v1316_v49 }
 0x331   : > { %v2379_v62 = vpop.eup %2378  ;;  %v1292_v63 = vadd.f32 1e-05, %v1276_v50  ;;  %2392 = vpow2.f32 %v1391_v47  ;;  %v1340_v24 = vmul.f32 %v2855_v52, %v1317_v55  ;;  %v2937_v44 = vsel %vm2918_vm6, 1.0, %v2507_v26 }
 0x332   : > { %v1293_v0 = vadd.f32 1e-05, %v1277_v51  ;;  %v2381_v2 = vpop.eup %2380  ;;  %v1258_v5 = vpop.xlane.xlu0 %1257  ;;  %2394 = vpow2.f32 %v1395_v57  ;;  %v2905_v53 = vadd.f32 %v2866_v11, %v1339_v60  ;;  %v1318_v13 = vmul.f32 %v2379_v62, %v2773_v15 }
 0x333   : > { %v1261_v10 = vpop.xlane.xlu1 %1260  ;;  %2396 = vrsqrt.f32 %v1292_v63  ;;  %v1278_v6 = vmul.f32 0.03125, %v1258_v5  ;;  %v2909_v22 = vadd.f32 %v2866_v11, %v1340_v24  ;;  %v1319_v34 = vmul.f32 %v2381_v2, %v2760_v1 }
 0x334   : > { %v1279_v45 = vmul.f32 0.03125, %v1261_v10  ;;  %2398 = vrsqrt.f32 %v1293_v0  ;;  %v1397_v16 = vmul.f32 1.442695, %v2905_v53  ;;  %v1341_v56 = vmul.f32 %v2855_v52, %v1318_v13 }
 0x335   : > { %v2383_v25 = vpop.eup %2382  ;;  %v1294_v30 = vadd.f32 1e-05, %v1278_v6  ;;  %v1399_v20 = vmul.f32 1.442695, %v2909_v22  ;;  %v1342_v3 = vmul.f32 %v2855_v52, %v1319_v34  ;;  %vm1377_vm9 = vcmp.gt.f32.partialorder %v2895_v48, 0.0 }
 0x336   : > { %v1295_v33 = vadd.f32 1e-05, %v1279_v45  ;;  %v2385_v37 = vpop.eup %2384  ;;  %v1264_v39 = vpop.xlane.xlu0 %1263  ;;  %2400 = vpow2.f32 %v1397_v16  ;;  %v2927_v17 = vadd.f32 %v2866_v11, %v1341_v56  ;;  %v1320_v1 = vmul.f32 %v2383_v25, %v2784_v9 }
 0x337   : > { %2402 = vrsqrt.f32 %v1294_v30  ;;  %v1280_v54 = vmul.f32 0.03125, %v1264_v39  ;;  %v1321_v41 = vmul.f32 %v2385_v37, %v2776_v7  ;;  %v2940_v50 = vadd.f32 %v2866_v11, %v1342_v3  ;;  %v1746_v13 = vpop.permute.xlu1 %1745 }
 0x338   : > { %v2387_v42 = vpop.eup %2386  ;;  %2404 = vrsqrt.f32 %v1295_v33  ;;  %v1401_v59 = vmul.f32 1.442695, %v2927_v17  ;;  %v1343_v43 = vmul.f32 %v2855_v52, %v1320_v1  ;;  %v1787_v33 = vmul.f32 %v1780_v46, %v1746_v13 }
 0x339   : > { %v2389_v47 = vpop.eup %2388  ;;  %v1296_v49 = vadd.f32 1e-05, %v1280_v54  ;;  %v2157_v9 = vadd.f32 -1.0, %v2387_v42  ;;  %2406 = vpow2.f32 %v1399_v20  ;;  %v1344_v55 = vmul.f32 %v2855_v52, %v1321_v41 }
 0x33a   : > { %v2391_v51 = vpop.eup %2390  ;;  %2408 = vpow2.f32 %v1401_v59  ;;  %v2943_v7 = vadd.f32 %v2866_v11, %v1343_v43  ;;  %v1322_v57 = vmul.f32 %v2389_v47, %v2797_v18  ;;  %v1403_v26 = vmul.f32 1.442695, %v2940_v50 }
 0x33b   : > { %v2393_v60 = vpop.eup %2392  ;;  %2410 = vrsqrt.f32 %v1296_v49  ;;  %v1440_v63 = vsel %vm1376_vm8, %v2879_v27, %v2157_v9  ;;  %v2953_v24 = vadd.f32 %v2866_v11, %v1344_v55  ;;  %v1323_v10 = vmul.f32 %v2391_v51, %v2787_v12 }
 0x33c   : > { %v2395_v23 = vpop.eup %2394  ;;  %v2156_v62 = vadd.f32 -1.0, %v2393_v60  ;;  %v1405_v0 = vmul.f32 1.442695, %v2943_v7  ;;  %2412 = vpow2.f32 %v1403_v26  ;;  %v1345_v18 = vmul.f32 %v2855_v52, %v1322_v57 }
 0x33d   : > { %v2397_v2 = vpop.eup %2396  ;;  %v2158_v5 = vadd.f32 -1.0, %v2395_v23  ;;  %v1407_v27 = vmul.f32 1.442695, %v2953_v24  ;;  %v1346_v25 = vmul.f32 %v2855_v52, %v1323_v10  ;;  %v1784_v34 = vrot.slane %v2923_v36, %v2645_v8 }
 0x33e   : > { %v2399_v6 = vpop.eup %2398  ;;  %v1439_v45 = vsel %vm1375_vm7, %v2885_v35, %v2156_v62  ;;  %2414 = vpow2.f32 %v1405_v0  ;;  %v2963_v56 = vadd.f32 %v2866_v11, %v1345_v18  ;;  %v1324_v12 = vmul.f32 %v2397_v2, %v2808_v19 }
 0x33f   : > { %2289 = vmatprep.mubr.msk.f32.mxu0 %vm678_vm1, %v1439_v45  ;;  %v1441_v16 = vsel %vm1377_vm9, %v2895_v48, %v2158_v5  ;;  %2416 = vpow2.f32 %v1407_v27  ;;  %v1325_v35 = vmul.f32 %v2399_v6, %v2800_v40  ;;  %vm1378_vm10 = vcmp.gt.f32.partialorder %v2905_v53, 0.0 }
 0x340   : > { %v2401_v30 = vpop.eup %2400  ;;  %2290 = vmatmul.mubr.msk.f32.vlgmr.msra.gmra.mrb[0].mxu0 %vm678_vm1, %v1440_v63  ;;  %v1409_v37 = vmul.f32 1.442695, %v2963_v56  ;;  %v2975_v19 = vadd.f32 %v2866_v11, %v1346_v25  ;;  %v1347_v20 = vmul.f32 %v2855_v52, %v1324_v12  ;;  %v2981_v1 = vmul.f32 %v2937_v44, %v1787_v33  ;;  %v1753_v25 = vpop.permute.xlu0 %1752 }
 0x341   : > { %v2403_v15 = vpop.eup %2402  ;;  %2292 = vmatprep.mubr.msk.f32.mxu0 %vm678_vm1, %v1441_v16  ;;  %v2159_v48 = vadd.f32 -1.0, %v2401_v30  ;;  %v1348_v40 = vmul.f32 %v2855_v52, %v1325_v35  ;;  %vm1379_vm11 = vcmp.gt.f32.partialorder %v2909_v22, 0.0  ;;  %vm1380_vm12 = vcmp.gt.f32.partialorder %v2927_v17, 0.0 }
 0x342   : > { %v2405_v39 = vpop.eup %2404  ;;  %v1326_v46 = vmul.f32 %v2403_v15, %v2819_v61  ;;  %2418 = vpow2.f32 %v1409_v37  ;;  %v1411_v41 = vmul.f32 1.442695, %v2975_v19  ;;  %v2988_v43 = vadd.f32 %v2866_v11, %v1347_v20 }
 0x343   : > { %v2407_v54 = vpop.eup %2406  ;;  %v1442_v3 = vsel %vm1378_vm10, %v2905_v53, %v2159_v48  ;;  %v2991_v61 = vadd.f32 %v2866_v11, %v1348_v40  ;;  %v1327_v53 = vmul.f32 %v2405_v39, %v2811_v21  ;;  %v1806_v51 = vrot.slane %v2981_v1, %v2645_v8 }
 0x344   : > { %v2409_v42 = vpop.eup %2408  ;;  %2293 = vmatmul.mubr.msk.f32.gmra.mrb[2].mxu0 %vm678_vm1, %v1442_v3  ;;  %v2160_v59 = vadd.f32 -1.0, %v2407_v54  ;;  %v1349_v47 = vmul.f32 %v2855_v52, %v1326_v46  ;;  %2420 = vpow2.f32 %v1411_v41  ;;  %vm1381_vm13 = vcmp.gt.f32.partialorder %v2940_v50, 0.0 }
 0x345   : > { %v2411_v49 = vpop.eup %2410  ;;  %v2161_v9 = vadd.f32 -1.0, %v2409_v42  ;;  %v1413_v57 = vmul.f32 1.442695, %v2988_v43  ;;  %v1415_v23 = vmul.f32 1.442695, %v2991_v61  ;;  %v1350_v62 = vmul.f32 %v2855_v52, %v1327_v53  ;;  %1808 = vbcast.lane.b32.xlu1 %v1806_v51, 256 }
 0x346   : > { %v1443_v55 = vsel %vm1379_vm11, %v2909_v22, %v2160_v59  ;;  %v2413_v60 = vpop.eup %2412  ;;  %v3005_v21 = vadd.f32 %v2866_v11, %v1349_v47  ;;  %v1328_v0 = vmul.f32 %v2411_v49, %v2828_v4  ;;  %v1813_v2 = vrot.slane %v2981_v1, %v2844_v29 }
 0x347   : > { %2295 = vmatprep.mubr.msk.f32.mxu0 %vm678_vm1, %v1443_v55  ;;  %v1444_v26 = vsel %vm1380_vm12, %v2927_v17, %v2161_v9  ;;  %v2162_v63 = vadd.f32 -1.0, %v2413_v60  ;;  %2422 = vpow2.f32 %v1413_v57  ;;  %vm1382_vm14 = vcmp.gt.f32.partialorder %v2943_v7, 0.0 }
 0x348   : > { %v2415_v22 = vpop.eup %2414  ;;  %2296 = vmatmul.mubr.msk.f32.gmra.mrb[4].mxu0 %vm678_vm1, %v1444_v26  ;;  %2424 = vpow2.f32 %v1415_v23  ;;  %v1417_v5 = vmul.f32 1.442695, %v3005_v21  ;;  %v3018_v13 = vadd.f32 %v2866_v11, %v1350_v62  ;;  %v1351_v6 = vmul.f32 %v2855_v52, %v1328_v0 }
 0x349   : > { %v2163_v17 = vadd.f32 -1.0, %v2415_v22  ;;  %v2417_v18 = vpop.eup %2416  ;;  %v1445_v10 = vsel %vm1381_vm13, %v2940_v50, %v2162_v63  ;;  %v1820_v4 = vrot.slane %v2981_v1, %v1819_v14  ;;  %1815 = vbcast.lane.b32.xlu1 %v1813_v2, 256  ;;  %v1827_v50 = vrot.slane %v2981_v1, %v1826_v28 }
 0x34a   : > { %2298 = vmatprep.mubr.msk.f32.mxu0 %vm678_vm1, %v1445_v10  ;;  %v2164_v27 = vadd.f32 -1.0, %v2417_v18  ;;  %2426 = vpow2.f32 %v1417_v5  ;;  %vm1383_vm15 = vcmp.gt.f32.partialorder %v2953_v24, 0.0  ;;  %v1419_v52 = vmul.f32 1.442695, %v3018_v13 }
 0x34b   : > { %v1446_v45 = vsel %vm1382_vm14, %v2943_v7, %v2163_v17  ;;  %v1374_v16 = vadd.f32 %v2866_v11, %v1351_v6  ;;  %1822 = vbcast.lane.b32.xlu0 %v1820_v4, 256  ;;  %v1834_v7 = vrot.slane %v2981_v1, %v1833_v31  ;;  %vm1384_vm0 = vcmp.gt.f32.partialorder %v2963_v56, 0.0 }
 0x34c   : > { %2299 = vmatmul.mubr.msk.f32.gmra.mrb[6].mxu0 %vm678_vm1, %v1446_v45  ;;  %v2419_v12 = vpop.eup %2418  ;;  %v1447_v30 = vsel %vm1383_vm15, %v2953_v24, %v2164_v27  ;;  %2428 = vpow2.f32 %v1419_v52  ;;  %v1841_v11 = vrot.slane %v2981_v1, %v1840_v32  ;;  %v1854_v48 = vsub.s32 7, %v2633_v58 }
 0x34d   : > { %2301 = vmatprep.mubr.msk.f32.mxu0 %vm678_vm1, %v1447_v30  ;;  %v2165_v35 = vadd.f32 -1.0, %v2419_v12  ;;  %v1421_v33 = vmul.f32 1.442695, %v1374_v16  ;;  %1829 = vbcast.lane.b32.xlu1 %v1827_v50, 256  ;;  %v1788_v37 = vmul.f32 %v1784_v34, %v1753_v25  ;;  %v1848_v20 = vrot.slane %v2981_v1, %v1847_v38 }
 0x34e   : > { %v2421_v15 = vpop.eup %2420  ;;  %vm1385_vm2 = vcmp.gt.f32.partialorder %v2975_v19, 0.0  ;;  %v1855_v34 = vrot.slane %v2981_v1, %v1854_v48  ;;  %vm1386_vm3 = vcmp.gt.f32.partialorder %v2988_v43, 0.0  ;;  %vm1387_vm4 = vcmp.gt.f32.partialorder %v2991_v61, 0.0 }
 0x34f   : > { %v1448_v24 = vsel %vm1384_vm0, %v2963_v56, %v2165_v35  ;;  %v2166_v39 = vadd.f32 -1.0, %v2421_v15  ;;  %2430 = vpow2.f32 %v1421_v33  ;;  %1836 = vbcast.lane.b32.xlu0 %v1834_v7, 256  ;;  %v1802_v40 = vmul.f32 %v2937_v44, %v1788_v37 }
 0x350   : > { %2302 = vmatmul.mubr.msk.f32.gmra.mrb[8].mxu0 %vm678_vm1, %v1448_v24  ;;  %vm1388_vm5 = vcmp.gt.f32.partialorder %v3005_v21, 0.0  ;;  %vm1389_vm6 = vcmp.gt.f32.partialorder %v3018_v13, 0.0  ;;  %vm1390_vm7 = vcmp.gt.f32.partialorder %v1374_v16, 0.0 }
 0x351   : > { %v2423_v46 = vpop.eup %2422  ;;  %v1449_v54 = vsel %vm1385_vm2, %v2975_v19, %v2166_v39  ;;  %1843 = vbcast.lane.b32.xlu1 %v1841_v11, 256  ;;  %v1862_v41 = vrot.slane %v1802_v40, %v2645_v8  ;;  %v1869_v1 = vrot.slane %v1802_v40, %v2844_v29  ;;  %v1883_v29 = vrot.slane %v1802_v40, %v1826_v28 }
 0x352   : > { %v2425_v36 = vpop.eup %2424  ;;  %2304 = vmatprep.mubr.msk.f32.mxu0 %vm678_vm1, %v1449_v54  ;;  %v2167_v56 = vadd.f32 -1.0, %v2423_v46  ;;  %v1897_v55 = vrot.slane %v1802_v40, %v1840_v32  ;;  %v1904_v57 = vrot.slane %v1802_v40, %v1847_v38  ;;  %v1911_v28 = vrot.slane %v1802_v40, %v1854_v48 }
 0x353   : > { %v2168_v3 = vadd.f32 -1.0, %v2425_v36  ;;  %1850 = vbcast.lane.b32.xlu0 %v1848_v20, 256 }
 0x354   : > { %v2427_v42 = vpop.eup %2426  ;;  %v1450_v59 = vsel %vm1386_vm3, %v2988_v43, %v2167_v56  ;;  %v1876_v43 = vrot.slane %v1802_v40, %v1819_v14  ;;  %v1890_v14 = vrot.slane %v1802_v40, %v1833_v31  ;;  %v3085_v31 = vld [vmem:[%s566_s14] ss:$0 sm:$0xff] }
 0x355   : > { %2305 = vmatmul.mubr.msk.f32.gmra.mrb[10].mxu0 %vm678_vm1, %v1450_v59  ;;  %v1451_v44 = vsel %vm1387_vm4, %v2991_v61, %v2168_v3  ;;  %v2169_v19 = vadd.f32 -1.0, %v2427_v42  ;;  %1857 = vbcast.lane.b32.xlu1 %v1855_v34, 256 }
 0x356   : > { %2307 = vmatprep.mubr.msk.f32.mxu0 %vm678_vm1, %v1451_v44  ;;  %v2429_v47 = vpop.eup %2428 }
 0x357   : > { %v1452_v8 = vsel %vm1388_vm5, %v3005_v21, %v2169_v19  ;;  %1864 = vbcast.lane.b32.xlu0 %v1862_v41, 256  ;;  %v2170_v49 = vadd.f32 -1.0, %v2429_v47 }
 0x359   : > { %v2431_v9 = vpop.eup %2430  ;;  %2308 = vmatmul.mubr.msk.f32.gmra.mrb[12].mxu0 %vm678_vm1, %v1452_v8  ;;  %v1453_v61 = vsel %vm1389_vm6, %v3018_v13, %v2170_v49  ;;  %1871 = vbcast.lane.b32.xlu1 %v1869_v1, 256 }
 0x35a   : > { %v2171_v53 = vadd.f32 -1.0, %v2431_v9  ;;  %2310 = vmatprep.mubr.msk.f32.mxu0 %vm678_vm1, %v1453_v61 }
 0x35b   : > { %1878 = vbcast.lane.b32.xlu0 %v1876_v43, 256 }
 0x35c   : > { %v1454_v51 = vsel %vm1390_vm7, %v1374_v16, %v2171_v53 }
 0x35d   : > { %2311 = vmatmul.mubr.msk.f32.gmra.mrb[14].mxu0 %vm678_vm1, %v1454_v51  ;;  %1885 = vbcast.lane.b32.xlu1 %v1883_v29, 256 }
 0x35f   : > { %1892 = vbcast.lane.b32.xlu0 %v1890_v14, 256 }
 0x361   : > { %1899 = vbcast.lane.b32.xlu1 %v1897_v55, 256 }
 0x363   : > { %1906 = vbcast.lane.b32.xlu0 %v1904_v57, 256 }
 0x365   : > { %1913 = vbcast.lane.b32.xlu1 %v1911_v28, 256 }
 0x3b7   : > { %v3094_v30 = vpop.permute.xlu1 %1808 }
 0x3bb   : > { %v1816_v56 = vpop.permute.xlu1 %1815 }
 0x3bd   : > { %v1823_v28 = vpop.permute.xlu0 %1822 }
 0x3bf   : > { %v1830_v14 = vpop.permute.xlu1 %1829 }
 0x413   : > { %v2291_v60 = vpop.f32.mrb[0].mxu0 }
 0x414   : > { %v1586_v26 = vadd.f32 %v2291_v60, %v3085_v31  ;;  %v1580_v23 = vpop.f32.mrb[1].mxu0 }
 0x415   : > { %v1581_v32 = vadd.f32 %v3085_v31, %v1580_v23 }
 0x416   : > { %v1660_v21 = vsub.f32 0.0, %v1586_v26 }
 0x417   : > { %v1659_v62 = vsub.f32 0.0, %v1581_v32  ;;  %v2294_v58 = vpop.f32.mrb[2].mxu0 }
 0x418   : > { %v1677_v38 = vmul.f32 1.442695, %v1660_v21  ;;  %v1596_v22 = vadd.f32 %v2294_v58, %v3085_v31  ;;  %v1590_v63 = vpop.f32.mrb[3].mxu0 }
 0x419   : > { %v1675_v0 = vmul.f32 1.442695, %v1659_v62  ;;  %v1591_v2 = vadd.f32 %v3085_v31, %v1590_v63 }
 0x41a   : > { %2432 = vpow2.f32 %v1677_v38  ;;  %v1662_v17 = vsub.f32 0.0, %v1596_v22 }
 0x41b   : > { %2434 = vpow2.f32 %v1675_v0  ;;  %v1661_v5 = vsub.f32 0.0, %v1591_v2  ;;  %v2297_v18 = vpop.f32.mrb[4].mxu0 }
 0x41c   : > { %v1681_v10 = vmul.f32 1.442695, %v1662_v17  ;;  %v1606_v13 = vadd.f32 %v2297_v18, %v3085_v31  ;;  %v1600_v6 = vpop.f32.mrb[5].mxu0 }
 0x41d   : > { %v1679_v4 = vmul.f32 1.442695, %v1661_v5  ;;  %v1601_v45 = vadd.f32 %v3085_v31, %v1600_v6 }
 0x41e   : > { %2436 = vpow2.f32 %v1681_v10  ;;  %v1664_v27 = vsub.f32 0.0, %v1606_v13 }
 0x41f   : > { %2438 = vpow2.f32 %v1679_v4  ;;  %v1663_v50 = vsub.f32 0.0, %v1601_v45  ;;  %v2300_v52 = vpop.f32.mrb[6].mxu0  ;;  %v1844_v4 = vpop.permute.xlu1 %1843 }
 0x420   : > { %v1685_v16 = vmul.f32 1.442695, %v1664_v27  ;;  %v1616_v7 = vadd.f32 %v2300_v52, %v3085_v31  ;;  %v1610_v25 = vpop.f32.mrb[7].mxu0  ;;  %v1837_v52 = vpop.permute.xlu0 %1836 }
 0x421   : > { %v1683_v12 = vmul.f32 1.442695, %v1663_v50  ;;  %v1611_v35 = vadd.f32 %v3085_v31, %v1610_v25 }
 0x422   : > { %2440 = vpow2.f32 %v1685_v16  ;;  %v1666_v33 = vsub.f32 0.0, %v1616_v7 }
 0x423   : > { %2442 = vpow2.f32 %v1683_v12  ;;  %v1665_v15 = vsub.f32 0.0, %v1611_v35  ;;  %v2303_v37 = vpop.f32.mrb[8].mxu0 }
 0x424   : > { %v2433_v11 = vpop.eup %2432  ;;  %v1689_v48 = vmul.f32 1.442695, %v1666_v33  ;;  %v1626_v40 = vadd.f32 %v2303_v37, %v3085_v31  ;;  %v1620_v46 = vpop.f32.mrb[9].mxu0 }
 0x425   : > { %v2435_v24 = vpop.eup %2434  ;;  %v1708_v39 = vadd.f32 1.0, %v2433_v11  ;;  %v1687_v20 = vmul.f32 1.442695, %v1665_v15  ;;  %v1621_v36 = vadd.f32 %v3085_v31, %v1620_v46  ;;  %v1851_v46 = vpop.permute.xlu0 %1850 }
 0x426   : > { %v1707_v54 = vadd.f32 1.0, %v2435_v24  ;;  %2444 = vpow2.f32 %v1689_v48  ;;  %v1668_v34 = vsub.f32 0.0, %v1626_v40 }
 0x427   : > { %2446 = vrcp.f32 %v1708_v39  ;;  %v1667_v41 = vsub.f32 0.0, %v1621_v36  ;;  %v1858_v39 = vpop.permute.xlu1 %1857 }
 0x428   : > { %v2437_v3 = vpop.eup %2436  ;;  %2448 = vrcp.f32 %v1707_v54  ;;  %v1693_v44 = vmul.f32 1.442695, %v1668_v34  ;;  %v2306_v19 = vpop.f32.mrb[10].mxu0 }
 0x429   : > { %v2439_v42 = vpop.eup %2438  ;;  %v1710_v59 = vadd.f32 1.0, %v2437_v3  ;;  %2450 = vpow2.f32 %v1687_v20  ;;  %v1691_v47 = vmul.f32 1.442695, %v1667_v41  ;;  %v1636_v8 = vadd.f32 %v2306_v19, %v3085_v31  ;;  %v1630_v43 = vpop.f32.mrb[11].mxu0 }
 0x42a   : > { %v1709_v1 = vadd.f32 1.0, %v2439_v42  ;;  %v1631_v49 = vadd.f32 %v3085_v31, %v1630_v43  ;;  %v1865_v19 = vpop.permute.xlu0 %1864 }
 0x42b   : > { %2452 = vrcp.f32 %v1710_v59  ;;  %v1670_v61 = vsub.f32 0.0, %v1636_v8  ;;  %v1872_v42 = vpop.permute.xlu1 %1871 }
 0x42c   : > { %v2441_v9 = vpop.eup %2440  ;;  %2454 = vrcp.f32 %v1709_v1  ;;  %v1669_v51 = vsub.f32 0.0, %v1631_v49  ;;  %v2309_v55 = vpop.f32.mrb[12].mxu0 }
 0x42d   : > { %v2443_v53 = vpop.eup %2442  ;;  %v1712_v29 = vadd.f32 1.0, %v2441_v9  ;;  %2456 = vpow2.f32 %v1693_v44  ;;  %v1697_v60 = vmul.f32 1.442695, %v1670_v61  ;;  %v1646_v26 = vadd.f32 %v2309_v55, %v3085_v31  ;;  %v1640_v23 = vpop.f32.mrb[13].mxu0 }
 0x42e   : > { %v1711_v57 = vadd.f32 1.0, %v2443_v53  ;;  %2458 = vpow2.f32 %v1691_v47  ;;  %v1695_v32 = vmul.f32 1.442695, %v1669_v51  ;;  %v1641_v21 = vadd.f32 %v3085_v31, %v1640_v23  ;;  %v1879_v55 = vpop.permute.xlu0 %1878 }
 0x42f   : > { %2460 = vrcp.f32 %v1712_v29  ;;  %v1672_v58 = vsub.f32 0.0, %v1646_v26  ;;  %v1886_v29 = vpop.permute.xlu1 %1885 }
 0x430   : > { %v2445_v62 = vpop.eup %2444  ;;  %2462 = vrcp.f32 %v1711_v57  ;;  %v1671_v63 = vsub.f32 0.0, %v1641_v21  ;;  %v2312_v0 = vpop.f32.mrb[14].mxu0 }
 0x431   : > { %v2447_v38 = vpop.eup %2446  ;;  %v1714_v22 = vadd.f32 1.0, %v2445_v62  ;;  %2464 = vpow2.f32 %v1697_v60  ;;  %v1701_v5 = vmul.f32 1.442695, %v1672_v58  ;;  %v1656_v18 = vadd.f32 %v2312_v0, %v3085_v31  ;;  %v1650_v10 = vpop.f32.mrb[15].mxu0 }
 0x432   : > { %v2449_v2 = vpop.eup %2448  ;;  %v1916_v17 = vmul.f32 %v2447_v38, %v1816_v56  ;;  %2466 = vpow2.f32 %v1695_v32  ;;  %v1699_v45 = vmul.f32 1.442695, %v1671_v63  ;;  %v1651_v27 = vadd.f32 %v3085_v31, %v1650_v10  ;;  %v1893_v58 = vpop.permute.xlu0 %1892 }
 0x433   : > { %v2451_v13 = vpop.eup %2450  ;;  %v1915_v6 = vmul.f32 %v2449_v2, %v3094_v30  ;;  %2468 = vrcp.f32 %v1714_v22  ;;  %v1674_v16 = vsub.f32 0.0, %v1656_v18  ;;  %v1900_v21 = vpop.permute.xlu1 %1899 }
 0x434   : > { %v1713_v50 = vadd.f32 1.0, %v2451_v13  ;;  %1932 = vst [vmem:[%s3107_s19 + $0x8] sm:$0xff] %v1916_v17  ;;  %2470 = vpow2.f32 %v1701_v5  ;;  %v1673_v25 = vsub.f32 0.0, %v1651_v27 }
 0x435   : > { %v2453_v7 = vpop.eup %2452  ;;  %1931 = vst [vmem:[%s3107_s19] sm:$0xff] %v1915_v6  ;;  %2472 = vpow2.f32 %v1699_v45  ;;  %v1705_v30 = vmul.f32 1.442695, %v1674_v16 }
 0x436   : > { %v2455_v12 = vpop.eup %2454  ;;  %2474 = vrcp.f32 %v1713_v50  ;;  %v1918_v35 = vmul.f32 %v2453_v7, %v1830_v14  ;;  %v1703_v11 = vmul.f32 1.442695, %v1673_v25  ;;  %v1907_v18 = vpop.permute.xlu0 %1906 }
 0x437   : > { %v2457_v33 = vpop.eup %2456  ;;  %v1917_v15 = vmul.f32 %v2455_v12, %v1823_v28  ;;  %2476 = vpow2.f32 %v1705_v30  ;;  %v1914_v17 = vpop.permute.xlu1 %1913 }
 0x438   : > { %v2459_v48 = vpop.eup %2458  ;;  %v1716_v31 = vadd.f32 1.0, %v2457_v33  ;;  %1934 = vst [vmem:[%s3107_s19 + $0x18] sm:$0xff] %v1918_v35  ;;  %2478 = vpow2.f32 %v1703_v11 }
 0x439   : > { %v2461_v37 = vpop.eup %2460  ;;  %v1715_v24 = vadd.f32 1.0, %v2459_v48  ;;  %1933 = vst [vmem:[%s3107_s19 + $0x10] sm:$0xff] %v1917_v15 }
 0x43a   : > { %v2463_v20 = vpop.eup %2462  ;;  %2480 = vrcp.f32 %v1716_v31  ;;  %v1920_v40 = vmul.f32 %v2461_v37, %v1844_v4 }
 0x43b   : > { %v2465_v54 = vpop.eup %2464  ;;  %2482 = vrcp.f32 %v1715_v24  ;;  %v1919_v36 = vmul.f32 %v2463_v20, %v1837_v52 }
 0x43c   : > { %v2467_v56 = vpop.eup %2466  ;;  %v1718_v34 = vadd.f32 1.0, %v2465_v54  ;;  %1936 = vst [vmem:[%s3107_s19 + $0x28] sm:$0xff] %v1920_v40 }
 0x43d   : > { %v2469_v3 = vpop.eup %2468  ;;  %v1717_v41 = vadd.f32 1.0, %v2467_v56  ;;  %1935 = vst [vmem:[%s3107_s19 + $0x20] sm:$0xff] %v1919_v36 }
 0x43e   : > { %v2471_v59 = vpop.eup %2470  ;;  %2484 = vrcp.f32 %v1718_v34  ;;  %v1922_v44 = vmul.f32 %v2469_v3, %v1858_v39 }
 0x43f   : > { %v2473_v1 = vpop.eup %2472  ;;  %2486 = vrcp.f32 %v1717_v41  ;;  %v1720_v47 = vadd.f32 1.0, %v2471_v59 }
 0x440   : > { %v2475_v8 = vpop.eup %2474  ;;  %v1719_v43 = vadd.f32 1.0, %v2473_v1  ;;  %1938 = vst [vmem:[%s3107_s19 + $0x38] sm:$0xff] %v1922_v44 }
 0x441   : > { %2488 = vrcp.f32 %v1720_v47  ;;  %v1921_v49 = vmul.f32 %v2475_v8, %v1851_v46  ;;  %v2477_v9 = vpop.eup %2476 }
 0x442   : > { %2490 = vrcp.f32 %v1719_v43  ;;  %v2479_v61 = vpop.eup %2478  ;;  %v1722_v53 = vadd.f32 1.0, %v2477_v9 }
 0x443   : > { %1937 = vst [vmem:[%s3107_s19 + $0x30] sm:$0xff] %v1921_v49  ;;  %v1721_v51 = vadd.f32 1.0, %v2479_v61 }
 0x444   : > { %v2481_v14 = vpop.eup %2480  ;;  %2492 = vrcp.f32 %v1722_v53 }
 0x445   : > { %v2483_v57 = vpop.eup %2482  ;;  %v1924_v28 = vmul.f32 %v2481_v14, %v1872_v42  ;;  %2494 = vrcp.f32 %v1721_v51 }
 0x446   : > { %v1923_v60 = vmul.f32 %v2483_v57, %v1865_v19 }
 0x447   : > { %1940 = vst [vmem:[%s3107_s19 + $0x48] sm:$0xff] %v1924_v28 }
 0x448   : > { %v2485_v26 = vpop.eup %2484  ;;  %1939 = vst [vmem:[%s3107_s19 + $0x40] sm:$0xff] %v1923_v60 }
 0x449   : > { %v2487_v23 = vpop.eup %2486  ;;  %v1926_v32 = vmul.f32 %v2485_v26, %v1886_v29 }
 0x44a   : > { %v1925_v62 = vmul.f32 %v2487_v23, %v1879_v55 }
 0x44b   : > { %v2489_v38 = vpop.eup %2488  ;;  %1942 = vst [vmem:[%s3107_s19 + $0x58] sm:$0xff] %v1926_v32 }
 0x44c   : > { %v2491_v22 = vpop.eup %2490  ;;  %1941 = vst [vmem:[%s3107_s19 + $0x50] sm:$0xff] %v1925_v62  ;;  %v1928_v63 = vmul.f32 %v2489_v38, %v1900_v21 }
 0x44d   : > { %v1927_v0 = vmul.f32 %v2491_v22, %v1893_v58 }
 0x44e   : > { %1944 = vst [vmem:[%s3107_s19 + $0x68] sm:$0xff] %v1928_v63  ;;  %v2493_v2 = vpop.eup %2492 }
 0x44f   : > { %1943 = vst [vmem:[%s3107_s19 + $0x60] sm:$0xff] %v1927_v0  ;;  %v2495_v5 = vpop.eup %2494  ;;  %v1930_v10 = vmul.f32 %v2493_v2, %v1914_v17 }
 0x450   : > { %v1929_v13 = vmul.f32 %v2495_v5, %v1907_v18 }
 0x451   : > { %1946 = vst [vmem:[%s3107_s19 + $0x78] sm:$0xff] %v1930_v10 }
 0x452   : > { %1945 = vst [vmem:[%s3107_s19 + $0x70] sm:$0xff] %v1929_v13 }
 0x453 PF: > { %s23_s21 = sadd.s32 1, %s2502_s21  }
 0x454   : > { %p20_p5 = scmp.ge.s32.totalorder %s23_s21, 4  }
 0x456   :  { %22 = sbr.rel (!%p20_p5) target bundleno = 1 (0x1), region = 133 }

// kernel: pfn_forward.2
= control target key start
LH: loop header
LB: loop body
LE: loop exit
PB: predicated region body
PF: predicated region fallthrough
CT: control target
= control target key end

     0   :  { %12 = vsyncpa [#allocation3], 0  ;;  %s4941_s24 = smov [#allocation2]   ;;  %s6229_s0 = inlined_call_operand.vmem [shape: f32[8,2,32], index: 0, kind: input, shape index: {}]   ;;  %s6230_s1 = inlined_call_operand.vmem [shape: f32[32,160], index: 1, kind: input, shape index: {}]   ;;  %s6231_s2 = inlined_call_operand.vmem [shape: f32[1,160], index: 2, kind: input, shape index: {}]   ;;  %s6232_s3 = inlined_call_operand.hbm [shape: f32[32,160], index: 3, kind: input, shape index: {}]   ;;  %s6233_s4 = inlined_call_operand.vmem [shape: f32[96,32], index: 4, kind: input, shape index: {}]   ;;  %s6234_s5 = inlined_call_operand.vmem [shape: f32[1,32], index: 5, kind: input, shape index: {}]   ;;  %s6235_s6 = inlined_call_operand.vmem [shape: f32[128,256], index: 6, kind: input, shape index: {}]   ;;  %s6236_s7 = inlined_call_operand.vmem [shape: f32[2,2,8,128], index: 7, kind: output, shape index: {}]  }
   0x1   :  { %s24_s25 = sshll.u32 %s4941_s24, 4  ;;  %s4917_s28 = scalar_lea.hbm %s6232_s3, 1024  ;;  %s25_s25 = int_to_ptr.vmem [resolvable:$true] %s24_s25 }
   0x2   :  { %p4918_p0 = scmp.ne.s32.totalorder %s6232_s3, %s4917_s28  ;;  %p4921_p1 = scmp.lt.u32.totalorder %s4917_s28, %s6232_s3 }
   0x4   :  { %p4923_p2 = pnand %p4921_p1, %p4918_p0 }
   0x6   :  { %4926 = shalt.err (!%p4923_p2)
}
   0x7   :  { %s4927_s10 = scalar_lea.vmem %s25_s25, 1024  ;;  %p4932_p4 = scmp.lt.s32.totalorder %s25_s25, %s25_s25 }
   0x8   :  { %p4928_p3 = scmp.ne.s32.totalorder %s25_s25, %s4927_s10  ;;  %p4933_p5 = scmp.lt.s32.totalorder %s4927_s10, %s4927_s10 }
   0xa   :  { %p4934_p6 = por %p4933_p5, %p4932_p4 }
   0xc   :  { %p4935_p7 = pnand %p4934_p6, %p4928_p3 }
   0xe   :  { %4938 = shalt.err (!%p4935_p7)
}
   0xf   :  { %s4942_s11 = smov 256   ;;  %s4943_s12 = smov 16  }
  0x10   :  { %30 = dma.hbm_to_vmem [thread:$0]  %s6232_s3, 1024, %s25_s25, [#allocation3], %s4942_s11, %s4942_s11, %s4943_s12  }
  0x11   :  { %4939 = dma.done.wait [#allocation3], 1024  }
  0x12   :  { %4940 = vsyncadd [#allocation3], 4294966272  ;;  %v4944_v0 = vmov 0.0   ;;  %v58_v1 = vlaneseq  ;;  %v4945_v2 = vmov 1983009808   ;;  %v49_v6 = vld [vmem:[%s6230_s1 + $0x8] sm:$0xff] }
  0x13   :  { %179 = vmatprep.mubr.f32.mxu1 %v4944_v0  ;;  %v79_v3 = vunpack.c.l.s4 %v4945_v2  ;;  %532 = vmatprep.mubr.f32.mxu0 %v4944_v0  ;;  %v51_v7 = vld [vmem:[%s6230_s1 + $0x18] sm:$0xff]  ;;  %v48_v8 = vld [vmem:[%s6230_s1] sm:$0xff]  ;;  %v50_v10 = vld [vmem:[%s6230_s1 + $0x10] sm:$0xff]  ;;  %vm110_vm0 = vcmask 261120   ;;  %vm393_vm1 = vcmask 1042176   ;;  %vm379_vm2 = vcmask 517376  }
  0x14   :  { %v5006_v4 = vshrl.u32 %v58_v1, 7  ;;  %v4213_v9 = vpack.c.bf16 %v51_v7, %v49_v6  ;;  %v53_v11 = vld [vmem:[%s6230_s1 + $0x28] sm:$0xff]  ;;  %v55_v12 = vld [vmem:[%s6230_s1 + $0x38] sm:$0xff]  ;;  %v4215_v13 = vpack.c.bf16 %v50_v10, %v48_v8  ;;  %v52_v15 = vld [vmem:[%s6230_s1 + $0x20] sm:$0xff]  ;;  %vm410_vm3 = vcmask 254976   ;;  %s4947_s8 = smov 32  }
  0x15   :  { %v80_v5 = vunpack.c.0.s8 %v79_v3  ;;  %v4217_v14 = vpack.c.bf16 %v55_v12, %v53_v11  ;;  %v54_v16 = vld [vmem:[%s6230_s1 + $0x30] sm:$0xff]  ;;  %v40_v17 = vld [vmem:[%s6229_s0] sm:$0x3]  ;;  %v41_v19 = vld [vmem:[%s6229_s0 + $0x2] sm:$0x3]  ;;  %vm386_vm4 = vcmask 779776  }
  0x16   :  { %4214 = vmatprep.subr.bf16.mxu1 %v4213_v9  ;;  %v42_v20 = vld [vmem:[%s6229_s0 + $0x4] sm:$0x3]  ;;  %v43_v21 = vld [vmem:[%s6229_s0 + $0x6] sm:$0x3]  ;;  %v4219_v22 = vpack.c.bf16 %v54_v16, %v52_v15  ;;  %v76_v23 = vcombine.low %v40_v17, %v41_v19  ;;  %v241_v25 = vld [vmem:[#allocation2 + $0x8] sm:$0xff]  ;;  %v60_v49 = vsub.s32 0, %v5006_v4 }
  0x17   :  { %v5036_v18 = vsub.s32 %v80_v5, %v5006_v4  ;;  %4216 = vmatpush1.bf16.msra.mxu1 %v4215_v13  ;;  %v77_v24 = vcombine.low %v42_v20, %v43_v21  ;;  %v243_v26 = vld [vmem:[#allocation2 + $0x18] sm:$0xff]  ;;  %v240_v27 = vld [vmem:[#allocation2] sm:$0xff]  ;;  %v242_v29 = vld [vmem:[#allocation2 + $0x10] sm:$0xff]  ;;  %v64_v51 = vsub.s32 1, %v5006_v4  ;;  %vm464_vm5 = vcmask 523264   ;;  %s4948_s9 = smov 64  }
  0x18   :  { %4218 = vmatprep.subr.bf16.mxu1 %v4217_v14  ;;  %v5047_v28 = vpack.c.bf16 %v243_v26, %v241_v25  ;;  %v44_v30 = vld [vmem:[%s6229_s0 + $0x8] sm:$0x3]  ;;  %v45_v31 = vld [vmem:[%s6229_s0 + $0xa] sm:$0x3]  ;;  %v46_v34 = vld [vmem:[%s6229_s0 + $0xc] sm:$0x3]  ;;  %v5063_v41 = vpack.c.bf16 %v242_v29, %v240_v27 }
  0x19   :  { %v84_v32 = vrot.slane %v76_v23, %v5036_v18  ;;  %v91_v33 = vrot.slane %v77_v24, %v5036_v18  ;;  %v47_v35 = vld [vmem:[%s6229_s0 + $0xe] sm:$0x3]  ;;  %v93_v36 = vcombine.low %v44_v30, %v45_v31  ;;  %v247_v39 = vld [vmem:[#allocation2 + $0x38] sm:$0xff]  ;;  %v244_v45 = vld [vmem:[#allocation2 + $0x20] sm:$0xff]  ;;  %vm466_vm6 = vcmask 785408  }
  0x1a   :  { %v245_v37 = vld [vmem:[#allocation2 + $0x28] sm:$0xff]  ;;  %v94_v38 = vcombine.low %v46_v34, %v47_v35  ;;  %v246_v46 = vld [vmem:[#allocation2 + $0x30] sm:$0xff]  ;;  %v56_v50 = vld [vmem:[%s6231_s2] sm:$0x3]  ;;  %vm4950_vm7 = vmmov 0  }
  0x1b   :  { %4220 = vmatpush1.bf16.msra.mxu1 %v4219_v22  ;;  %v92_v40 = vcombine.low %v84_v32, %v91_v33  ;;  %v101_v42 = vrot.slane %v93_v36, %v5036_v18  ;;  %v5068_v44 = vpack.c.bf16 %v247_v39, %v245_v37  ;;  %v5073_v48 = vpack.c.bf16 %v246_v46, %v244_v45  ;;  %v262_v16 = vld [vmem:[%s6235_s6 + $0x8] sm:$0xff]  ;;  %v264_v17 = vld [vmem:[%s6235_s6 + $0x18] sm:$0xff]  ;;  %v261_v19 = vld [vmem:[%s6235_s6] sm:$0xff] }
  0x1c   :  { %4222 = vmatprep.subr.bf16.mxu1 %v5047_v28  ;;  %v108_v43 = vrot.slane %v94_v38, %v5036_v18  ;;  %v61_v52 = vrot.slane %v56_v50, %v60_v49  ;;  %v65_v53 = vrot.slane %v56_v50, %v64_v51  ;;  %v5126_v20 = vpack.c.bf16 %v264_v17, %v262_v16  ;;  %v263_v21 = vld [vmem:[%s6235_s6 + $0x10] sm:$0xff]  ;;  %v266_v22 = vld [vmem:[%s6235_s6 + $0x28] sm:$0xff]  ;;  %v268_v23 = vld [vmem:[%s6235_s6 + $0x38] sm:$0xff] }
  0x1d   :  { %v5137_v24 = vpack.c.bf16 %v263_v21, %v261_v19  ;;  %v5139_v25 = vpack.c.bf16 %v268_v23, %v266_v22  ;;  %v265_v26 = vld [vmem:[%s6235_s6 + $0x20] sm:$0xff]  ;;  %v267_v27 = vld [vmem:[%s6235_s6 + $0x30] sm:$0xff]  ;;  %v270_v29 = vld [vmem:[%s6235_s6 + $0x48] sm:$0xff] }
  0x1e   :  { %3868 = vmatmul.mubr.msk.f32.vlgmr.msra.gmra.mrb[0].mxu1 %vm110_vm0, %v92_v40  ;;  %v109_v47 = vcombine.low %v101_v42, %v108_v43  ;;  %4230 = vmatprep.subr.bf16.mxu0 %v5126_v20  ;;  %v272_v30 = vld [vmem:[%s6235_s6 + $0x58] sm:$0xff]  ;;  %v5155_v31 = vpack.c.bf16 %v267_v27, %v265_v26  ;;  %v269_v33 = vld [vmem:[%s6235_s6 + $0x40] sm:$0xff]  ;;  %v271_v34 = vld [vmem:[%s6235_s6 + $0x50] sm:$0xff] }
  0x1f   :  { %4224 = vmatpush1.bf16.msra.mxu1 %v5063_v41  ;;  %185 = vmatprep.mubr.f32.mxu1 %v4944_v0  ;;  %v5158_v32 = vpack.c.bf16 %v272_v30, %v270_v29  ;;  %v274_v35 = vld [vmem:[%s6235_s6 + $0x68] sm:$0xff]  ;;  %v276_v36 = vld [vmem:[%s6235_s6 + $0x78] sm:$0xff]  ;;  %v5173_v37 = vpack.c.bf16 %v271_v34, %v269_v33  ;;  %v273_v39 = vld [vmem:[%s6235_s6 + $0x60] sm:$0xff] }
  0x20   :  { %4226 = vmatprep.subr.bf16.mxu1 %v5068_v44  ;;  %4232 = vmatpush1.bf16.msra.mxu0 %v5137_v24  ;;  %v5176_v38 = vpack.c.bf16 %v276_v36, %v274_v35  ;;  %v275_v40 = vld [vmem:[%s6235_s6 + $0x70] sm:$0xff]  ;;  %v278_v42 = vld [vmem:[%s6235_s6 + $0x88] sm:$0xff]  ;;  %v280_v43 = vld [vmem:[%s6235_s6 + $0x98] sm:$0xff] }
  0x21   :  { %4234 = vmatprep.subr.bf16.mxu0 %v5139_v25  ;;  %v5191_v45 = vpack.c.bf16 %v275_v40, %v273_v39  ;;  %v5194_v46 = vpack.c.bf16 %v280_v43, %v278_v42  ;;  %v279_v49 = vld [vmem:[%s6235_s6 + $0x90] sm:$0xff]  ;;  %v282_v50 = vld [vmem:[%s6235_s6 + $0xa8] sm:$0xff]  ;;  %v284_v51 = vld [vmem:[%s6235_s6 + $0xb8] sm:$0xff] }
  0x22   :  { %3869 = vmatmul.mubr.msk.f32.gmra.mrb[2].mxu1 %vm110_vm0, %v109_v47  ;;  %v277_v47 = vld [vmem:[%s6235_s6 + $0x80] sm:$0xff]  ;;  %v290_v27 = vld [vmem:[%s6235_s6 + $0xe8] sm:$0xff]  ;;  %v292_v29 = vld [vmem:[%s6235_s6 + $0xf8] sm:$0xff] }
  0x23   :  { %4228 = vmatpush1.bf16.msra.mxu1 %v5073_v48  ;;  %360 = vmatprep.mubr.f32.mxu1 %v4944_v0  ;;  %v5253_v30 = vpack.c.bf16 %v292_v29, %v290_v27  ;;  %v289_v33 = vld [vmem:[%s6235_s6 + $0xe0] sm:$0xff]  ;;  %v291_v34 = vld [vmem:[%s6235_s6 + $0xf0] sm:$0xff] }
  0x24   :  { %4236 = vmatpush1.bf16.msra.mxu0 %v5155_v31  ;;  %v5261_v35 = vpack.c.bf16 %v291_v34, %v289_v33  ;;  %v248_v34 = vld [vmem:[%s6233_s4] sm:$0xff] }
  0x25   :  { %4238 = vmatprep.subr.bf16.mxu0 %v5158_v32 }
  0x26   :  { %361 = vmatmul.mubr.f32.vlgmr.msra.gmra.mrb[4].mxu1 %v4944_v0 }
  0x27   :  { %4048 = vmatprep.mubr.msk.f32.mxu1 %vm4950_vm7, %v4944_v0 }
  0x28   :  { %4240 = vmatpush1.bf16.msra.mxu0 %v5173_v37 }
  0x29   :  { %4242 = vmatprep.subr.bf16.mxu0 %v5176_v38 }
  0x2c   :  { %4244 = vmatpush1.bf16.msra.mxu0 %v5191_v45 }
  0x2d   :  { %4246 = vmatprep.subr.bf16.mxu0 %v5194_v46 }
  0xf1   :  { %v181_v54 = vpop.f32.mrb[0].mxu1 }
  0xf2   :  { %v5085_v55 = vadd.f32 %v181_v54, %v61_v52  ;;  %v183_v56 = vpop.f32.mrb[1].mxu1  ;;  %v281_v54 = vld [vmem:[%s6235_s6 + $0xa0] sm:$0xff] }
  0xf3   :  { %v5087_v57 = vadd.f32 %v183_v56, %v65_v53  ;;  %v283_v56 = vld [vmem:[%s6235_s6 + $0xb0] sm:$0xff] }
  0xf5   :  { %v196_v58 = vcombine.low %v5085_v55, %v5087_v57  ;;  %v197_v59 = vcombine.high %v5085_v55, %v5087_v57  ;;  %v187_v60 = vpop.f32.mrb[2].mxu1 }
  0xf6   :  { %v5093_v61 = vadd.f32 %v187_v60, %v61_v52  ;;  %v189_v62 = vpop.f32.mrb[3].mxu1  ;;  %v5209_v52 = vpack.c.bf16 %v279_v49, %v277_v47  ;;  %v288_v60 = vld [vmem:[%s6235_s6 + $0xd8] sm:$0xff] }
  0xf7   :  { %v5095_v63 = vadd.f32 %v189_v62, %v65_v53  ;;  %v5102_v7 = vrot.slane %v196_v58, %v5036_v18  ;;  %v5212_v53 = vpack.c.bf16 %v284_v51, %v282_v50  ;;  %v286_v58 = vld [vmem:[%s6235_s6 + $0xc8] sm:$0xff]  ;;  %v5227_v62 = vpack.c.bf16 %v283_v56, %v281_v54 }
  0xf8   :  { %4248 = vmatpush1.bf16.msra.mxu0 %v5209_v52 }
  0xf9   :  { %v214_v1 = vcombine.low %v5093_v61, %v5095_v63  ;;  %v362_v3 = vpop.f32.mrb[4].mxu1  ;;  %4250 = vmatprep.subr.bf16.mxu0 %v5212_v53 }
  0xfa   :  { %v364_v5 = vpop.f32.mrb[5].mxu1 }
  0xfb   :  { %v369_v6 = vcombine.low %v362_v3, %v364_v5  ;;  %v5230_v3 = vpack.c.bf16 %v288_v60, %v286_v58  ;;  %v285_v5 = vld [vmem:[%s6235_s6 + $0xc0] sm:$0xff] }
  0xfc   :  { %4252 = vmatpush1.bf16.msra.mxu0 %v5227_v62 }
  0xfd   :  { %v376_v8 = vrot.slane %v369_v6, %v5036_v18  ;;  %v287_v6 = vld [vmem:[%s6235_s6 + $0xd0] sm:$0xff]  ;;  %4254 = vmatprep.subr.bf16.mxu0 %v5230_v3  ;;  %s4946_s6 = smov 96  }
  0xff   :  { %v5106_v9 = vadd.f32 %v376_v8, %v5102_v7  ;;  %v5239_v8 = vpack.c.bf16 %v287_v6, %v285_v5 }
 0x101   :  { %v394_v10 = vsel %vm393_vm1, %v5106_v9, -inf  ;;  %v380_v11 = vsel %vm379_vm2, %v5106_v9, -inf  ;;  %v407_v12 = vrot.slane %v5106_v9, %v5036_v18  ;;  %v387_v15 = vsel %vm386_vm4, %v5106_v9, -inf  ;;  %4256 = vmatpush1.bf16.msra.mxu0 %v5239_v8 }
 0x102   :  { %395 = vmax.xlane.f32.xlu1 %v394_v10  ;;  %381 = vmax.xlane.f32.xlu0 %v380_v11 }
 0x103   :  { %v408_v13 = vcombine.high %v407_v12, %v407_v12  ;;  %4258 = vmatprep.subr.bf16.mxu0 %v5253_v30 }
 0x105   :  { %v411_v14 = vsel %vm410_vm3, %v408_v13, -inf  ;;  %4260 = vmatpush1.bf16.msra.mxu0 %v5261_v35 }
 0x106   :  { %412 = vmax.xlane.f32.xlu1 %v411_v14  ;;  %388 = vmax.xlane.f32.xlu0 %v387_v15  ;;  %v414_v15 = vrot.slane %v5106_v9, 2 }
 0x107   :  { %4288 = vmatprep.subr.bf16.mxu0 %v5126_v20 }
 0x18f   :  { %v396_v10 = vpop.xlane.xlu1 %395  ;;  %v382_v11 = vpop.xlane.xlu0 %381 }
 0x190   :  { %v397_v12 = vsub.f32 %v5106_v9, %v396_v10  ;;  %v383_v13 = vsub.f32 %v5106_v9, %v382_v11 }
 0x192   :  { %v398_v14 = vmul.f32 1.442695, %v397_v12  ;;  %v384_v16 = vmul.f32 1.442695, %v383_v13 }
 0x193   :  { %v413_v17 = vpop.xlane.xlu1 %412  ;;  %v389_v19 = vpop.xlane.xlu0 %388 }
 0x194   :  { %v416_v21 = vsub.f32 %v414_v15, %v413_v17  ;;  %v390_v22 = vsub.f32 %v5106_v9, %v389_v19  ;;  %4758 = vpow2.f32 %v398_v14 }
 0x195   :  { %4760 = vpow2.f32 %v384_v16 }
 0x196   :  { %v417_v23 = vmul.f32 1.442695, %v416_v21  ;;  %v391_v26 = vmul.f32 1.442695, %v390_v22 }
 0x198   :  { %4762 = vpow2.f32 %v417_v23 }
 0x199   :  { %4764 = vpow2.f32 %v391_v26 }
 0x19e   :  { %v4759_v36 = vpop.eup %4758 }
 0x19f   :  { %v4761_v39 = vpop.eup %4760  ;;  %v448_v43 = vrot.slane %v4759_v36, %v5036_v18  ;;  %v249_v36 = vld [vmem:[%s6233_s4 + $0x8] sm:$0xff] }
 0x1a0   :  { %v426_v49 = vrot.slane %v4761_v39, %v5036_v18  ;;  %v250_v39 = vld [vmem:[%s6233_s4 + $0x10] sm:$0xff] }
 0x1a2   :  { %v4763_v40 = vpop.eup %4762 }
 0x1a3   :  { %v4765_v42 = vpop.eup %4764  ;;  %v459_v47 = vrot.slane %v4763_v40, %v5036_v18 }
 0x1a4   :  { %v437_v50 = vrot.slane %v4765_v42, %v5036_v18 }
 0x1a5   :  { %v4683_v51 = vpack.i.bf16 %v459_v47, %v448_v43  ;;  %v6237_v43 = vmov 0.0|0.0   ;;  %v5310_v47 = vpack.c.bf16 %v249_v36, %v248_v34 }
 0x1a6   :  { %v4678_v54 = vpack.i.bf16 %v437_v50, %v426_v49  ;;  %4261 = vmatprep.subr.bf16.mxu1 %v6237_v43  ;;  %v251_v49 = vld [vmem:[%s6233_s4 + $0x18] sm:$0xff] }
 0x1a7   :  { %4684 = vrot.lane.b32.xlu1 %v4683_v51, %s4946_s6  ;;  %4263 = vmatpush3.bf16.msra.mxu1 %v5310_v47  ;;  %v5316_v51 = vpack.c.bf16 %v251_v49, %v250_v39 }
 0x1a8   :  { %4679 = vrot.lane.b32.xlu0 %v4678_v54, %s4946_s6  ;;  %4264 = vmatprep.subr.bf16.mxu1 %v6237_v43 }
 0x1ab   :  { %4266 = vmatpush3.bf16.msra.mxu1 %v5316_v51 }
 0x1ac   :  { %4267 = vmatprep.subr.bf16.mxu1 %v6237_v43 }
 0x219   :  { %v4685_v56 = vpop.permute.xlu1 %4684 }
 0x21a   :  { %v4686_v58 = vunpack.i.l.bf16 %v4685_v56  ;;  %v4680_v60 = vpop.permute.xlu0 %4679  ;;  %v4687_v10 = vunpack.i.h.bf16 %v4685_v56 }
 0x21b   :  { %v4682_v5 = vunpack.i.h.bf16 %v4680_v60  ;;  %v4681_v6 = vunpack.i.l.bf16 %v4680_v60  ;;  %v252_v60 = vld [vmem:[%s6233_s4 + $0x20] sm:$0xff] }
 0x21d   :  { %v463_v11 = vsel %vm110_vm0, %v4681_v6, %v4682_v5  ;;  %v253_v5 = vld [vmem:[%s6233_s4 + $0x28] sm:$0xff] }
 0x21e   :  { %v465_v12 = vsel %vm464_vm5, %v463_v11, %v4686_v58 }
 0x21f   :  { %v467_v13 = vsel %vm466_vm6, %v465_v12, %v4687_v10 }
 0x220   :  { %533 = vmatmul.mubr.f32.vlgmr.msra.gmra.mrb[0].mxu0 %v467_v13  ;;  %v5329_v13 = vpack.c.bf16 %v253_v5, %v252_v60 }
 0x221   :  { %4290 = vmatpush1.bf16.msra.mxu0 %v5137_v24  ;;  %991 = vmatprep.mubr.f32.mxu0 %v4944_v0 }
 0x222   :  { %4292 = vmatprep.subr.bf16.mxu0 %v5139_v25  ;;  %4269 = vmatpush3.bf16.msra.mxu1 %v5329_v13 }
 0x223   :  { %4270 = vmatprep.subr.bf16.mxu1 %v6237_v43 }
 0x225   :  { %4294 = vmatpush1.bf16.msra.mxu0 %v5155_v31 }
 0x226   :  { %4296 = vmatprep.subr.bf16.mxu0 %v5158_v32 }
 0x229   :  { %4298 = vmatpush1.bf16.msra.mxu0 %v5173_v37 }
 0x22a   :  { %4300 = vmatprep.subr.bf16.mxu0 %v5176_v38 }
 0x22d   :  { %4302 = vmatpush1.bf16.msra.mxu0 %v5191_v45 }
 0x22e   :  { %4304 = vmatprep.subr.bf16.mxu0 %v5194_v46 }
 0x231   :  { %4306 = vmatpush1.bf16.msra.mxu0 %v5209_v52 }
 0x232   :  { %4308 = vmatprep.subr.bf16.mxu0 %v5212_v53 }
 0x235   :  { %4310 = vmatpush1.bf16.msra.mxu0 %v5227_v62 }
 0x236   :  { %4312 = vmatprep.subr.bf16.mxu0 %v5230_v3 }
 0x239   :  { %4314 = vmatpush1.bf16.msra.mxu0 %v5239_v8 }
 0x23a   :  { %4316 = vmatprep.subr.bf16.mxu0 %v5253_v30 }
 0x23d   :  { %4318 = vmatpush1.bf16.msra.mxu0 %v5261_v35 }
 0x23e   :  { %4346 = vmatprep.subr.bf16.mxu0 %v5126_v20 }
 0x2f3   :  { %v534_v14 = vpop.f32.mrb[0].mxu0 }
 0x2f4   :  { %4766 = vrcp.f32 %v534_v14  ;;  %v536_v15 = vpop.f32.mrb[1].mxu0 }
 0x2f5   :  { %4768 = vtanh.f32 %v5106_v9 }
 0x2fe   :  { %v4767_v16 = vpop.eup %4766 }
 0x2ff   :  { %v540_v17 = vmul.f32 %v4767_v16, %v536_v15  ;;  %v4769_v21 = vpop.eup %4768  ;;  %v254_v15 = vld [vmem:[%s6233_s4 + $0x30] sm:$0xff]  ;;  %v255_v16 = vld [vmem:[%s6233_s4 + $0x38] sm:$0xff] }
 0x300   :  { %v562_v22 = vrot.slane %v4769_v21, %v5036_v18  ;;  %v257_v21 = vld [vmem:[%s6233_s4 + $0x48] sm:$0xff] }
 0x301   :  { %v541_v19 = vsub.f32 1.0, %v540_v17 }
 0x303   :  { %544 = vrot.lane.b32.xlu1 %v541_v19, %s4947_s8 }
 0x307   :  { %563 = vrot.lane.b32.xlu1 %v562_v22, %s4946_s6 }
 0x30b   :  { %581 = vrot.lane.b32.xlu1 %v562_v22, %s4948_s9 }
 0x375   :  { %v545_v23 = vpop.permute.xlu1 %544 }
 0x376   :  { %v547_v26 = vmul.f32 %v545_v23, %v540_v17  ;;  %v258_v23 = vld [vmem:[%s6233_s4 + $0x50] sm:$0xff] }
 0x378   :  { %550 = vrot.lane.b32.xlu0 %v547_v26, %s4946_s6  ;;  %v548_v27 = vsub.f32 %v540_v17, %v547_v26  ;;  %v554_v56 = vmul.f32 0.0, %v547_v26  ;;  %v5346_v17 = vpack.c.bf16 %v255_v16, %v254_v15  ;;  %v212_v15 = vcombine.high %v5102_v7, %v5102_v7 }
 0x379   :  { %v564_v9 = vpop.permute.xlu1 %563 }
 0x37a   :  { %v566_v29 = vmul.f32 %v564_v9, %v547_v26  ;;  %v573_v33 = vmul.f32 %v564_v9, %v548_v27  ;;  %v572_v58 = vmul.f32 0.0, %v548_v27  ;;  %4272 = vmatpush3.bf16.msra.mxu1 %v5346_v17  ;;  %v259_v26 = vld [vmem:[%s6233_s4 + $0x58] sm:$0xff] }
 0x37b   :  { %4273 = vmatprep.subr.bf16.mxu1 %v6237_v43  ;;  %v5368_v27 = vpack.c.bf16 %v259_v26, %v258_v23 }
 0x37c   :  { %575 = vrot.lane.b32.xlu1 %v573_v33, %s4948_s9  ;;  %568 = vrot.lane.b32.xlu0 %v566_v29, %s4948_s9 }
 0x37d   :  { %v582_v40 = vpop.permute.xlu1 %581 }
 0x3ea   :  { %v551_v42 = vpop.permute.xlu0 %550 }
 0x3eb   :  { %v553_v50 = vsub.f32 %v541_v19, %v551_v42  ;;  %v256_v19 = vld [vmem:[%s6233_s4 + $0x40] sm:$0xff] }
 0x3ec   :  { %v5358_v22 = vpack.c.bf16 %v257_v21, %v256_v19 }
 0x3ed   :  { %v584_v54 = vmul.f32 %v582_v40, %v553_v50  ;;  %v580_v9 = vmul.f32 0.0, %v553_v50  ;;  %v5390_v50 = vld [vmem:[%s6234_s5] ss:$0 sm:$0xff] }
 0x3ee   :  { %v569_v6 = vpop.permute.xlu0 %568  ;;  %v576_v10 = vpop.permute.xlu1 %575  ;;  %4275 = vmatpush3.bf16.msra.mxu1 %v5358_v22 }
 0x3ef   :  { %v5325_v11 = vadd.f32 %v569_v6, %v554_v56  ;;  %v578_v12 = vadd.f32 %v576_v10, %v572_v58  ;;  %586 = vrot.lane.b32.xlu0 %v584_v54, %s4948_s9  ;;  %4276 = vmatprep.subr.bf16.mxu1 %v6237_v43 }
 0x3f1   :  { %v5332_v14 = vadd.f32 %v578_v12, %v5325_v11  ;;  %591 = vrot.lane.b32.xlu1 %v5325_v11, %s4946_s6 }
 0x3f2   :  { %4278 = vmatpush3.bf16.msra.mxu1 %v5368_v27 }
 0x3f3   :  { %666 = vrot.lane.b32.xlu0 %v5332_v14, %s4946_s6  ;;  %4280 = vmatprep.subr.bf16.mxu1 %v5047_v28 }
 0x3f7   :  { %673 = vrot.lane.b32.xlu0 %v5325_v11, %s4947_s8 }
 0x461   :  { %v587_v29 = vpop.permute.xlu0 %586 }
 0x462   :  { %v589_v33 = vadd.f32 %v587_v29, %v580_v9 }
 0x463   :  { %v592_v34 = vpop.permute.xlu1 %591 }
 0x464   :  { %v5375_v36 = vadd.f32 %v592_v34, %v589_v33 }
 0x465   :  { %v667_v39 = vpop.permute.xlu0 %666 }
 0x466   :  { %670 = vrot.lane.b32.xlu1 %v5375_v36, %s4947_s8 }
 0x469   :  { %v674_v42 = vpop.permute.xlu0 %673 }
 0x4d8   :  { %v671_v40 = vpop.permute.xlu1 %670 }
 0x4d9   :  { %v676_v49 = vsel %vm110_vm0, %v667_v39, %v671_v40 }
 0x4da   :  { %v677_v54 = vsel %vm464_vm5, %v676_v49, %v674_v42 }
 0x4db   :  { %4049 = vmatmul.mubr.msk.f32.vlgmr.msra.gmra.mrb[6].mxu1 %vm466_vm6, %v677_v54 }
 0x4dc   :  { %4282 = vmatpush1.bf16.msra.mxu1 %v5063_v41  ;;  %825 = vmatprep.mubr.f32.mxu1 %v4944_v0 }
 0x4dd   :  { %4284 = vmatprep.subr.bf16.mxu1 %v5068_v44 }
 0x4e0   :  { %4286 = vmatpush1.bf16.msra.mxu1 %v5073_v48 }
 0x4e1   :  { %4319 = vmatprep.subr.bf16.mxu1 %v6237_v43 }
 0x5ae   :  { %v753_v56 = vpop.f32.mrb[6].mxu1 }
 0x5af   :  { %v5393_v58 = vadd.f32 %v5390_v50, %v753_v56  ;;  %v4050_v60 = vpop.f32.mrb[7].mxu1 }
 0x5b1   :  { %4770 = vtanh.f32 %v5393_v58 }
 0x5bb   :  { %v4771_v5 = vpop.eup %4770 }
 0x5bc   :  { %3876 = vmatmul.mubr.msk.f32.vlgmr.msra.gmra.mrb[8].mxu1 %vm110_vm0, %v4771_v5 }
 0x5bd   :  { %4321 = vmatpush3.bf16.msra.mxu1 %v5310_v47  ;;  %4075 = vmatprep.mubr.msk.f32.mxu1 %vm4950_vm7, %v4944_v0 }
 0x5be   :  { %4322 = vmatprep.subr.bf16.mxu1 %v6237_v43 }
 0x5c1   :  { %4324 = vmatpush3.bf16.msra.mxu1 %v5316_v51 }
 0x5c2   :  { %4325 = vmatprep.subr.bf16.mxu1 %v6237_v43 }
 0x5c5   :  { %4327 = vmatpush3.bf16.msra.mxu1 %v5329_v13 }
 0x5c6   :  { %4328 = vmatprep.subr.bf16.mxu1 %v6237_v43 }
 0x5c9   :  { %4330 = vmatpush3.bf16.msra.mxu1 %v5346_v17 }
 0x5ca   :  { %4331 = vmatprep.subr.bf16.mxu1 %v6237_v43 }
 0x5cd   :  { %4333 = vmatpush3.bf16.msra.mxu1 %v5358_v22 }
 0x5ce   :  { %4334 = vmatprep.subr.bf16.mxu1 %v6237_v43 }
 0x5d1   :  { %4336 = vmatpush3.bf16.msra.mxu1 %v5368_v27 }
 0x5d2   :  { %4338 = vmatprep.subr.bf16.mxu1 %v5047_v28 }
 0x68f   :  { %v827_v6 = vpop.f32.mrb[8].mxu1 }
 0x690   :  { %v829_v10 = vpop.f32.mrb[9].mxu1 }
 0x691   :  { %v834_v12 = vcombine.low %v827_v6, %v829_v10 }
 0x693   :  { %v841_v16 = vrot.slane %v834_v12, %v5036_v18 }
 0x695   :  { %v5414_v19 = vadd.f32 %v841_v16, %v212_v15 }
 0x697   :  { %v850_v21 = vsel %vm386_vm4, %v5414_v19, -inf  ;;  %v844_v23 = vsel %vm379_vm2, %v5414_v19, -inf  ;;  %v869_v26 = vrot.slane %v5414_v19, %v5036_v18  ;;  %v856_v9 = vsel %vm393_vm1, %v5414_v19, -inf }
 0x698   :  { %851 = vmax.xlane.f32.xlu0 %v850_v21  ;;  %845 = vmax.xlane.f32.xlu1 %v844_v23  ;;  %v875_v5 = vrot.slane %v5414_v19, 2 }
 0x699   :  { %v870_v29 = vcombine.high %v869_v26, %v869_v26 }
 0x69b   :  { %v872_v7 = vsel %vm410_vm3, %v870_v29, -inf }
 0x69c   :  { %857 = vmax.xlane.f32.xlu0 %v856_v9 }
 0x6a0   :  { %873 = vmax.xlane.f32.xlu0 %v872_v7 }
 0x725   :  { %v852_v33 = vpop.xlane.xlu0 %851  ;;  %v846_v34 = vpop.xlane.xlu1 %845 }
 0x726   :  { %v853_v39 = vsub.f32 %v5414_v19, %v852_v33  ;;  %v847_v40 = vsub.f32 %v5414_v19, %v846_v34 }
 0x728   :  { %v854_v42 = vmul.f32 1.442695, %v853_v39  ;;  %v848_v49 = vmul.f32 1.442695, %v847_v40 }
 0x729   :  { %v858_v54 = vpop.xlane.xlu0 %857 }
 0x72a   :  { %4772 = vpow2.f32 %v854_v42  ;;  %v859_v56 = vsub.f32 %v5414_v19, %v858_v54 }
 0x72b   :  { %4774 = vpow2.f32 %v848_v49 }
 0x72c   :  { %v860_v60 = vmul.f32 1.442695, %v859_v56 }
 0x72d   :  { %v874_v6 = vpop.xlane.xlu0 %873 }
 0x72e   :  { %v877_v10 = vsub.f32 %v875_v5, %v874_v6  ;;  %4776 = vpow2.f32 %v860_v60 }
 0x730   :  { %v878_v12 = vmul.f32 1.442695, %v877_v10 }
 0x732   :  { %4778 = vpow2.f32 %v878_v12 }
 0x734   :  { %v4773_v15 = vpop.eup %4772 }
 0x735   :  { %v4775_v16 = vpop.eup %4774  ;;  %v898_v21 = vrot.slane %v4773_v15, %v5036_v18 }
 0x736   :  { %v887_v23 = vrot.slane %v4775_v16, %v5036_v18 }
 0x738   :  { %v4688_v26 = vpack.i.bf16 %v898_v21, %v887_v23  ;;  %v4777_v9 = vpop.eup %4776 }
 0x739   :  { %v909_v7 = vrot.slane %v4777_v9, %v5036_v18 }
 0x73a   :  { %4689 = vrot.lane.b32.xlu1 %v4688_v26, %s4946_s6 }
 0x73c   :  { %v4779_v29 = vpop.eup %4778 }
 0x73d   :  { %v920_v33 = vrot.slane %v4779_v29, %v5036_v18 }
 0x73f   :  { %v4693_v34 = vpack.i.bf16 %v920_v33, %v909_v7 }
 0x741   :  { %4694 = vrot.lane.b32.xlu0 %v4693_v34, %s4946_s6 }
 0x745   :  { %1014 = vrot.lane.b32.xlu0 %v5393_v58, %s4947_s8 }
 0x7ac   :  { %v4690_v39 = vpop.permute.xlu1 %4689 }
 0x7ad   :  { %v4692_v40 = vunpack.i.h.bf16 %v4690_v39  ;;  %v4691_v42 = vunpack.i.l.bf16 %v4690_v39 }
 0x7af   :  { %v924_v60 = vsel %vm110_vm0, %v4691_v42, %v4692_v40 }
 0x7b3   :  { %v4695_v49 = vpop.permute.xlu0 %4694 }
 0x7b4   :  { %v4697_v54 = vunpack.i.h.bf16 %v4695_v49  ;;  %v4696_v56 = vunpack.i.l.bf16 %v4695_v49 }
 0x7b6   :  { %v925_v5 = vsel %vm464_vm5, %v924_v60, %v4696_v56 }
 0x7b7   :  { %v926_v6 = vsel %vm466_vm6, %v925_v5, %v4697_v54  ;;  %v1015_v39 = vpop.permute.xlu0 %1014 }
 0x7b8   :  { %992 = vmatmul.mubr.f32.vlgmr.msra.gmra.mrb[2].mxu0 %v926_v6 }
 0x7b9   :  { %4348 = vmatpush1.bf16.msra.mxu0 %v5137_v24  ;;  %1447 = vmatprep.mubr.f32.mxu0 %v4944_v0 }
 0x7ba   :  { %4350 = vmatprep.subr.bf16.mxu0 %v5139_v25 }
 0x7bd   :  { %4352 = vmatpush1.bf16.msra.mxu0 %v5155_v31 }
 0x7be   :  { %4354 = vmatprep.subr.bf16.mxu0 %v5158_v32 }
 0x7c1   :  { %4356 = vmatpush1.bf16.msra.mxu0 %v5173_v37 }
 0x7c2   :  { %4358 = vmatprep.subr.bf16.mxu0 %v5176_v38 }
 0x7c5   :  { %4360 = vmatpush1.bf16.msra.mxu0 %v5191_v45 }
 0x7c6   :  { %4362 = vmatprep.subr.bf16.mxu0 %v5194_v46 }
 0x7c9   :  { %4364 = vmatpush1.bf16.msra.mxu0 %v5209_v52 }
 0x7ca   :  { %4366 = vmatprep.subr.bf16.mxu0 %v5212_v53 }
 0x7cd   :  { %4368 = vmatpush1.bf16.msra.mxu0 %v5227_v62 }
 0x7ce   :  { %4370 = vmatprep.subr.bf16.mxu0 %v5230_v3 }
 0x7d1   :  { %4372 = vmatpush1.bf16.msra.mxu0 %v5239_v8 }
 0x7d2   :  { %4374 = vmatprep.subr.bf16.mxu0 %v5253_v30 }
 0x7d5   :  { %4376 = vmatpush1.bf16.msra.mxu0 %v5261_v35 }
 0x7d6   :  { %4404 = vmatprep.subr.bf16.mxu0 %v5126_v20 }
 0x88b   :  { %v993_v10 = vpop.f32.mrb[2].mxu0 }
 0x88c   :  { %4780 = vrcp.f32 %v993_v10  ;;  %v995_v12 = vpop.f32.mrb[3].mxu0 }
 0x88d   :  { %4782 = vtanh.f32 %v5414_v19 }
 0x896   :  { %v4781_v15 = vpop.eup %4780 }
 0x897   :  { %v999_v16 = vmul.f32 %v4781_v15, %v995_v12  ;;  %v4783_v23 = vpop.eup %4782 }
 0x898   :  { %v1025_v26 = vrot.slane %v4783_v23, %v5036_v18 }
 0x899   :  { %v1000_v21 = vsub.f32 1.0, %v999_v16 }
 0x89b   :  { %1003 = vrot.lane.b32.xlu1 %v1000_v21, %s4947_s8 }
 0x89f   :  { %1026 = vrot.lane.b32.xlu1 %v1025_v26, %s4946_s6 }
 0x90d   :  { %v1004_v9 = vpop.permute.xlu1 %1003 }
 0x90e   :  { %v1006_v29 = vmul.f32 %v1004_v9, %v999_v16 }
 0x910   :  { %1009 = vrot.lane.b32.xlu1 %v1006_v29, %s4946_s6  ;;  %v1007_v33 = vsub.f32 %v999_v16, %v1006_v29  ;;  %v1017_v49 = vmul.f32 %v1015_v39, %v1006_v29 }
 0x911   :  { %v1027_v7 = vpop.permute.xlu1 %1026 }
 0x912   :  { %v1029_v34 = vmul.f32 %v1027_v7, %v1006_v29  ;;  %v1036_v19 = vmul.f32 %v1027_v7, %v1007_v33  ;;  %v1035_v6 = vmul.f32 %v1015_v39, %v1007_v33 }
 0x914   :  { %1044 = vrot.lane.b32.xlu1 %v1025_v26, %s4948_s9  ;;  %1031 = vrot.lane.b32.xlu0 %v1029_v34, %s4948_s9 }
 0x918   :  { %1038 = vrot.lane.b32.xlu1 %v1036_v19, %s4948_s9 }
 0x982   :  { %v1010_v40 = vpop.permute.xlu1 %1009 }
 0x983   :  { %v1012_v42 = vsub.f32 %v1000_v21, %v1010_v40 }
 0x985   :  { %v1043_v16 = vmul.f32 %v1012_v42, %v5393_v58 }
 0x986   :  { %v1032_v54 = vpop.permute.xlu0 %1031  ;;  %v1045_v56 = vpop.permute.xlu1 %1044 }
 0x987   :  { %v5465_v60 = vadd.f32 %v1032_v54, %v1017_v49  ;;  %v1047_v5 = vmul.f32 %v1045_v56, %v1012_v42 }
 0x989   :  { %1054 = vrot.lane.b32.xlu1 %v5465_v60, %s4946_s6  ;;  %1049 = vrot.lane.b32.xlu0 %v1047_v5, %s4948_s9  ;;  %v5513_v5 = vrot.slane %v197_v59, %v5036_v18 }
 0x98a   :  { %v1039_v10 = vpop.permute.xlu1 %1038 }
 0x98b   :  { %v1041_v12 = vadd.f32 %v1039_v10, %v1035_v6 }
 0x98d   :  { %v5471_v15 = vadd.f32 %v1041_v12, %v5465_v60 }
 0x98f   :  { %1128 = vrot.lane.b32.xlu0 %v5471_v15, %s4946_s6 }
 0x993   :  { %1135 = vrot.lane.b32.xlu0 %v5465_v60, %s4947_s8 }
 0x9fb   :  { %v1050_v21 = vpop.permute.xlu0 %1049  ;;  %v1055_v26 = vpop.permute.xlu1 %1054 }
 0x9fc   :  { %v1052_v23 = vadd.f32 %v1050_v21, %v1043_v16 }
 0x9fe   :  { %v5478_v9 = vadd.f32 %v1055_v26, %v1052_v23 }
 0xa00   :  { %1132 = vrot.lane.b32.xlu1 %v5478_v9, %s4947_s8 }
 0xa01   :  { %v1129_v29 = vpop.permute.xlu0 %1128 }
 0xa05   :  { %v1136_v33 = vpop.permute.xlu0 %1135 }
 0xa72   :  { %v1133_v7 = vpop.permute.xlu1 %1132 }
 0xa73   :  { %v1138_v34 = vsel %vm110_vm0, %v1129_v29, %v1133_v7 }
 0xa74   :  { %v1139_v19 = vsel %vm464_vm5, %v1138_v34, %v1136_v33 }
 0xa75   :  { %4076 = vmatmul.mubr.msk.f32.vlgmr.msra.gmra.mrb[10].mxu1 %vm466_vm6, %v1139_v19 }
 0xa76   :  { %4340 = vmatpush1.bf16.msra.mxu1 %v5063_v41  ;;  %1281 = vmatprep.mubr.f32.mxu1 %v4944_v0 }
 0xa77   :  { %4342 = vmatprep.subr.bf16.mxu1 %v5068_v44 }
 0xa7a   :  { %4344 = vmatpush1.bf16.msra.mxu1 %v5073_v48 }
 0xa7b   :  { %4377 = vmatprep.subr.bf16.mxu1 %v6237_v43 }
 0xb48   :  { %v1209_v58 = vpop.f32.mrb[10].mxu1 }
 0xb49   :  { %v5491_v39 = vadd.f32 %v5390_v50, %v1209_v58  ;;  %v4077_v40 = vpop.f32.mrb[11].mxu1 }
 0xb4b   :  { %4784 = vtanh.f32 %v5491_v39 }
 0xb55   :  { %v4785_v42 = vpop.eup %4784 }
 0xb56   :  { %3882 = vmatmul.mubr.msk.f32.vlgmr.msra.gmra.mrb[12].mxu1 %vm110_vm0, %v4785_v42 }
 0xb57   :  { %4379 = vmatpush3.bf16.msra.mxu1 %v5310_v47  ;;  %4102 = vmatprep.mubr.msk.f32.mxu1 %vm4950_vm7, %v4944_v0 }
 0xb58   :  { %4380 = vmatprep.subr.bf16.mxu1 %v6237_v43 }
 0xb5b   :  { %4382 = vmatpush3.bf16.msra.mxu1 %v5316_v51 }
 0xb5c   :  { %4383 = vmatprep.subr.bf16.mxu1 %v6237_v43 }
 0xb5f   :  { %4385 = vmatpush3.bf16.msra.mxu1 %v5329_v13 }
 0xb60   :  { %4386 = vmatprep.subr.bf16.mxu1 %v6237_v43 }
 0xb63   :  { %4388 = vmatpush3.bf16.msra.mxu1 %v5346_v17 }
 0xb64   :  { %4389 = vmatprep.subr.bf16.mxu1 %v6237_v43 }
 0xb67   :  { %4391 = vmatpush3.bf16.msra.mxu1 %v5358_v22 }
 0xb68   :  { %4392 = vmatprep.subr.bf16.mxu1 %v6237_v43 }
 0xb6b   :  { %4394 = vmatpush3.bf16.msra.mxu1 %v5368_v27 }
 0xb6c   :  { %4396 = vmatprep.subr.bf16.mxu1 %v5047_v28 }
 0xc29   :  { %v1283_v49 = vpop.f32.mrb[12].mxu1 }
 0xc2a   :  { %v1285_v54 = vpop.f32.mrb[13].mxu1 }
 0xc2b   :  { %v1290_v56 = vcombine.low %v1283_v49, %v1285_v54 }
 0xc2d   :  { %v1297_v6 = vrot.slane %v1290_v56, %v5036_v18 }
 0xc2f   :  { %v5517_v10 = vadd.f32 %v1297_v6, %v5513_v5 }
 0xc31   :  { %v1306_v12 = vsel %vm386_vm4, %v5517_v10, -inf  ;;  %v1300_v16 = vsel %vm379_vm2, %v5517_v10, -inf  ;;  %v1325_v21 = vrot.slane %v5517_v10, %v5036_v18  ;;  %v1312_v55 = vsel %vm393_vm1, %v5517_v10, -inf }
 0xc32   :  { %1307 = vmax.xlane.f32.xlu0 %v1306_v12  ;;  %1301 = vmax.xlane.f32.xlu1 %v1300_v16  ;;  %v1331_v42 = vrot.slane %v5517_v10, 2 }
 0xc33   :  { %v1326_v57 = vcombine.high %v1325_v21, %v1325_v21 }
 0xc35   :  { %v1328_v59 = vsel %vm410_vm3, %v1326_v57, -inf }
 0xc36   :  { %1313 = vmax.xlane.f32.xlu0 %v1312_v55 }
 0xc3a   :  { %1329 = vmax.xlane.f32.xlu0 %v1328_v59 }
 0xcbf   :  { %v1308_v23 = vpop.xlane.xlu0 %1307  ;;  %v1302_v26 = vpop.xlane.xlu1 %1301 }
 0xcc0   :  { %v1309_v29 = vsub.f32 %v5517_v10, %v1308_v23  ;;  %v1303_v7 = vsub.f32 %v5517_v10, %v1302_v26 }
 0xcc2   :  { %v1310_v33 = vmul.f32 1.442695, %v1309_v29  ;;  %v1304_v34 = vmul.f32 1.442695, %v1303_v7 }
 0xcc3   :  { %v1314_v19 = vpop.xlane.xlu0 %1313 }
 0xcc4   :  { %4786 = vpow2.f32 %v1310_v33  ;;  %v1315_v58 = vsub.f32 %v5517_v10, %v1314_v19 }
 0xcc5   :  { %4788 = vpow2.f32 %v1304_v34 }
 0xcc6   :  { %v1316_v40 = vmul.f32 1.442695, %v1315_v58 }
 0xcc7   :  { %v1330_v49 = vpop.xlane.xlu0 %1329 }
 0xcc8   :  { %v1333_v54 = vsub.f32 %v1331_v42, %v1330_v49  ;;  %4790 = vpow2.f32 %v1316_v40 }
 0xcca   :  { %v1334_v56 = vmul.f32 1.442695, %v1333_v54 }
 0xccc   :  { %4792 = vpow2.f32 %v1334_v56 }
 0xcce   :  { %v4787_v6 = vpop.eup %4786 }
 0xccf   :  { %v4789_v12 = vpop.eup %4788  ;;  %v1354_v16 = vrot.slane %v4787_v6, %v5036_v18 }
 0xcd0   :  { %v1343_v21 = vrot.slane %v4789_v12, %v5036_v18 }
 0xcd2   :  { %v4698_v55 = vpack.i.bf16 %v1354_v16, %v1343_v21  ;;  %v4791_v57 = vpop.eup %4790 }
 0xcd3   :  { %v1365_v23 = vrot.slane %v4791_v57, %v5036_v18 }
 0xcd4   :  { %4699 = vrot.lane.b32.xlu1 %v4698_v55, %s4946_s6 }
 0xcd6   :  { %v4793_v59 = vpop.eup %4792 }
 0xcd7   :  { %v1376_v26 = vrot.slane %v4793_v59, %v5036_v18 }
 0xcd9   :  { %v4703_v29 = vpack.i.bf16 %v1376_v26, %v1365_v23 }
 0xcdb   :  { %4704 = vrot.lane.b32.xlu0 %v4703_v29, %s4946_s6 }
 0xcdf   :  { %1470 = vrot.lane.b32.xlu0 %v5491_v39, %s4947_s8 }
 0xd46   :  { %v4700_v7 = vpop.permute.xlu1 %4699 }
 0xd47   :  { %v4702_v33 = vunpack.i.h.bf16 %v4700_v7  ;;  %v4701_v34 = vunpack.i.l.bf16 %v4700_v7 }
 0xd49   :  { %v1380_v42 = vsel %vm110_vm0, %v4701_v34, %v4702_v33 }
 0xd4d   :  { %v4705_v19 = vpop.permute.xlu0 %4704 }
 0xd4e   :  { %v4707_v58 = vunpack.i.h.bf16 %v4705_v19  ;;  %v4706_v40 = vunpack.i.l.bf16 %v4705_v19 }
 0xd50   :  { %v1381_v49 = vsel %vm464_vm5, %v1380_v42, %v4706_v40 }
 0xd51   :  { %v1382_v54 = vsel %vm466_vm6, %v1381_v49, %v4707_v58  ;;  %v1471_v33 = vpop.permute.xlu0 %1470 }
 0xd52   :  { %1448 = vmatmul.mubr.f32.vlgmr.msra.gmra.mrb[4].mxu0 %v1382_v54 }
 0xd53   :  { %4406 = vmatpush1.bf16.msra.mxu0 %v5137_v24  ;;  %1903 = vmatprep.mubr.f32.mxu0 %v4944_v0 }
 0xd54   :  { %4408 = vmatprep.subr.bf16.mxu0 %v5139_v25 }
 0xd57   :  { %4410 = vmatpush1.bf16.msra.mxu0 %v5155_v31 }
 0xd58   :  { %4412 = vmatprep.subr.bf16.mxu0 %v5158_v32 }
 0xd5b   :  { %4414 = vmatpush1.bf16.msra.mxu0 %v5173_v37 }
 0xd5c   :  { %4416 = vmatprep.subr.bf16.mxu0 %v5176_v38 }
 0xd5f   :  { %4418 = vmatpush1.bf16.msra.mxu0 %v5191_v45 }
 0xd60   :  { %4420 = vmatprep.subr.bf16.mxu0 %v5194_v46 }
 0xd63   :  { %4422 = vmatpush1.bf16.msra.mxu0 %v5209_v52 }
 0xd64   :  { %4424 = vmatprep.subr.bf16.mxu0 %v5212_v53 }
 0xd67   :  { %4426 = vmatpush1.bf16.msra.mxu0 %v5227_v62 }
 0xd68   :  { %4428 = vmatprep.subr.bf16.mxu0 %v5230_v3 }
 0xd6b   :  { %4430 = vmatpush1.bf16.msra.mxu0 %v5239_v8 }
 0xd6c   :  { %4432 = vmatprep.subr.bf16.mxu0 %v5253_v30 }
 0xd6f   :  { %4434 = vmatpush1.bf16.msra.mxu0 %v5261_v35 }
 0xd70   :  { %4462 = vmatprep.subr.bf16.mxu0 %v5126_v20 }
 0xe25   :  { %v1449_v56 = vpop.f32.mrb[4].mxu0 }
 0xe26   :  { %4794 = vrcp.f32 %v1449_v56  ;;  %v1451_v6 = vpop.f32.mrb[5].mxu0 }
 0xe27   :  { %4796 = vtanh.f32 %v5517_v10 }
 0xe30   :  { %v4795_v12 = vpop.eup %4794 }
 0xe31   :  { %v1455_v16 = vmul.f32 %v4795_v12, %v1451_v6  ;;  %v4797_v55 = vpop.eup %4796 }
 0xe32   :  { %v1481_v57 = vrot.slane %v4797_v55, %v5036_v18 }
 0xe33   :  { %v1456_v21 = vsub.f32 1.0, %v1455_v16 }
 0xe35   :  { %1459 = vrot.lane.b32.xlu1 %v1456_v21, %s4947_s8 }
 0xe39   :  { %1482 = vrot.lane.b32.xlu1 %v1481_v57, %s4946_s6 }
 0xea7   :  { %v1460_v59 = vpop.permute.xlu1 %1459 }
 0xea8   :  { %v1462_v23 = vmul.f32 %v1460_v59, %v1455_v16 }
 0xeaa   :  { %1465 = vrot.lane.b32.xlu1 %v1462_v23, %s4946_s6  ;;  %v1463_v29 = vsub.f32 %v1455_v16, %v1462_v23  ;;  %v1473_v58 = vmul.f32 %v1471_v33, %v1462_v23 }
 0xeab   :  { %v1483_v26 = vpop.permute.xlu1 %1482 }
 0xeac   :  { %v1485_v7 = vmul.f32 %v1483_v26, %v1462_v23  ;;  %v1492_v10 = vmul.f32 %v1483_v26, %v1463_v29  ;;  %v1491_v56 = vmul.f32 %v1471_v33, %v1463_v29 }
 0xeae   :  { %1500 = vrot.lane.b32.xlu1 %v1481_v57, %s4948_s9  ;;  %1487 = vrot.lane.b32.xlu0 %v1485_v7, %s4948_s9 }
 0xeb2   :  { %1494 = vrot.lane.b32.xlu1 %v1492_v10, %s4948_s9 }
 0xf1c   :  { %v1466_v34 = vpop.permute.xlu1 %1465 }
 0xf1d   :  { %v1468_v19 = vsub.f32 %v1456_v21, %v1466_v34 }
 0xf1f   :  { %v1499_v21 = vmul.f32 %v1468_v19, %v5491_v39 }
 0xf20   :  { %v1488_v40 = vpop.permute.xlu0 %1487  ;;  %v1501_v42 = vpop.permute.xlu1 %1500 }
 0xf21   :  { %v5568_v49 = vadd.f32 %v1488_v40, %v1473_v58  ;;  %v1503_v54 = vmul.f32 %v1501_v42, %v1468_v19 }
 0xf23   :  { %1510 = vrot.lane.b32.xlu1 %v5568_v49, %s4946_s6  ;;  %1505 = vrot.lane.b32.xlu0 %v1503_v54, %s4948_s9 }
 0xf24   :  { %v1495_v6 = vpop.permute.xlu1 %1494 }
 0xf25   :  { %v1497_v12 = vadd.f32 %v1495_v6, %v1491_v56  ;;  %v213_v56 = vcombine.high %v5513_v5, %v5513_v5 }
 0xf27   :  { %v5574_v16 = vadd.f32 %v1497_v12, %v5568_v49 }
 0xf29   :  { %1584 = vrot.lane.b32.xlu0 %v5574_v16, %s4946_s6 }
 0xf2d   :  { %1591 = vrot.lane.b32.xlu0 %v5568_v49, %s4947_s8 }
 0xf95   :  { %v1506_v55 = vpop.permute.xlu0 %1505  ;;  %v1511_v59 = vpop.permute.xlu1 %1510 }
 0xf96   :  { %v1508_v57 = vadd.f32 %v1506_v55, %v1499_v21 }
 0xf98   :  { %v5581_v23 = vadd.f32 %v1511_v59, %v1508_v57 }
 0xf9a   :  { %1588 = vrot.lane.b32.xlu1 %v5581_v23, %s4947_s8 }
 0xf9b   :  { %v1585_v26 = vpop.permute.xlu0 %1584 }
 0xf9f   :  { %v1592_v7 = vpop.permute.xlu0 %1591 }
0x100c   :  { %v1589_v29 = vpop.permute.xlu1 %1588 }
0x100d   :  { %v1594_v10 = vsel %vm110_vm0, %v1585_v26, %v1589_v29 }
0x100e   :  { %v1595_v33 = vsel %vm464_vm5, %v1594_v10, %v1592_v7 }
0x100f   :  { %4103 = vmatmul.mubr.msk.f32.vlgmr.msra.gmra.mrb[14].mxu1 %vm466_vm6, %v1595_v33 }
0x1010   :  { %4398 = vmatpush1.bf16.msra.mxu1 %v5063_v41  ;;  %1737 = vmatprep.mubr.f32.mxu1 %v4944_v0 }
0x1011   :  { %4400 = vmatprep.subr.bf16.mxu1 %v5068_v44 }
0x1014   :  { %4402 = vmatpush1.bf16.msra.mxu1 %v5073_v48 }
0x1015   :  { %4435 = vmatprep.subr.bf16.mxu1 %v6237_v43 }
0x10e2   :  { %v1665_v39 = vpop.f32.mrb[14].mxu1 }
0x10e3   :  { %v5594_v34 = vadd.f32 %v5390_v50, %v1665_v39  ;;  %v4104_v19 = vpop.f32.mrb[15].mxu1 }
0x10e5   :  { %4798 = vtanh.f32 %v5594_v34 }
0x10ef   :  { %v4799_v58 = vpop.eup %4798 }
0x10f0   :  { %3888 = vmatmul.mubr.msk.f32.vlgmr.msra.gmra.mrb[16].mxu1 %vm110_vm0, %v4799_v58 }
0x10f1   :  { %4437 = vmatpush3.bf16.msra.mxu1 %v5310_v47  ;;  %4129 = vmatprep.mubr.msk.f32.mxu1 %vm4950_vm7, %v4944_v0 }
0x10f2   :  { %4438 = vmatprep.subr.bf16.mxu1 %v6237_v43 }
0x10f5   :  { %4440 = vmatpush3.bf16.msra.mxu1 %v5316_v51 }
0x10f6   :  { %4441 = vmatprep.subr.bf16.mxu1 %v6237_v43 }
0x10f9   :  { %4443 = vmatpush3.bf16.msra.mxu1 %v5329_v13 }
0x10fa   :  { %4444 = vmatprep.subr.bf16.mxu1 %v6237_v43 }
0x10fd   :  { %4446 = vmatpush3.bf16.msra.mxu1 %v5346_v17 }
0x10fe   :  { %4447 = vmatprep.subr.bf16.mxu1 %v6237_v43 }
0x1101   :  { %4449 = vmatpush3.bf16.msra.mxu1 %v5358_v22 }
0x1102   :  { %4450 = vmatprep.subr.bf16.mxu1 %v6237_v43 }
0x1105   :  { %4452 = vmatpush3.bf16.msra.mxu1 %v5368_v27 }
0x1106   :  { %4454 = vmatprep.subr.bf16.mxu1 %v5047_v28 }
0x11c3   :  { %v1739_v40 = vpop.f32.mrb[16].mxu1 }
0x11c4   :  { %v1741_v42 = vpop.f32.mrb[17].mxu1 }
0x11c5   :  { %v1746_v54 = vcombine.low %v1739_v40, %v1741_v42 }
0x11c7   :  { %v1753_v6 = vrot.slane %v1746_v54, %v5036_v18 }
0x11c9   :  { %v5615_v12 = vadd.f32 %v1753_v6, %v213_v56 }
0x11cb   :  { %v1762_v21 = vsel %vm386_vm4, %v5615_v12, -inf  ;;  %v1756_v55 = vsel %vm379_vm2, %v5615_v12, -inf  ;;  %v1781_v57 = vrot.slane %v5615_v12, %v5036_v18  ;;  %v1768_v59 = vsel %vm393_vm1, %v5615_v12, -inf }
0x11cc   :  { %1763 = vmax.xlane.f32.xlu0 %v1762_v21  ;;  %1757 = vmax.xlane.f32.xlu1 %v1756_v55  ;;  %v1787_v54 = vrot.slane %v5615_v12, 2 }
0x11cd   :  { %v1782_v26 = vcombine.high %v1781_v57, %v1781_v57 }
0x11cf   :  { %v1784_v5 = vsel %vm410_vm3, %v1782_v26, -inf }
0x11d0   :  { %1769 = vmax.xlane.f32.xlu0 %v1768_v59 }
0x11d4   :  { %1785 = vmax.xlane.f32.xlu0 %v1784_v5 }
0x1259   :  { %v1764_v29 = vpop.xlane.xlu0 %1763  ;;  %v1758_v7 = vpop.xlane.xlu1 %1757 }
0x125a   :  { %v1765_v10 = vsub.f32 %v5615_v12, %v1764_v29  ;;  %v1759_v33 = vsub.f32 %v5615_v12, %v1758_v7 }
0x125c   :  { %v1766_v39 = vmul.f32 1.442695, %v1765_v10  ;;  %v1760_v19 = vmul.f32 1.442695, %v1759_v33 }
0x125d   :  { %v1770_v58 = vpop.xlane.xlu0 %1769 }
0x125e   :  { %4800 = vpow2.f32 %v1766_v39  ;;  %v1771_v40 = vsub.f32 %v5615_v12, %v1770_v58 }
0x125f   :  { %4802 = vpow2.f32 %v1760_v19 }
0x1260   :  { %v1772_v42 = vmul.f32 1.442695, %v1771_v40 }
0x1261   :  { %v1786_v56 = vpop.xlane.xlu0 %1785 }
0x1262   :  { %v1789_v6 = vsub.f32 %v1787_v54, %v1786_v56  ;;  %4804 = vpow2.f32 %v1772_v42 }
0x1264   :  { %v1790_v21 = vmul.f32 1.442695, %v1789_v6 }
0x1266   :  { %4806 = vpow2.f32 %v1790_v21 }
0x1268   :  { %v4801_v55 = vpop.eup %4800 }
0x1269   :  { %v4803_v57 = vpop.eup %4802  ;;  %v1810_v59 = vrot.slane %v4801_v55, %v5036_v18 }
0x126a   :  { %v1799_v26 = vrot.slane %v4803_v57, %v5036_v18 }
0x126c   :  { %v4708_v5 = vpack.i.bf16 %v1810_v59, %v1799_v26  ;;  %v4805_v29 = vpop.eup %4804 }
0x126d   :  { %v1821_v10 = vrot.slane %v4805_v29, %v5036_v18 }
0x126e   :  { %4709 = vrot.lane.b32.xlu1 %v4708_v5, %s4946_s6 }
0x1270   :  { %v4807_v7 = vpop.eup %4806 }
0x1271   :  { %v1832_v33 = vrot.slane %v4807_v7, %v5036_v18 }
0x1273   :  { %v4713_v39 = vpack.i.bf16 %v1832_v33, %v1821_v10 }
0x1275   :  { %4714 = vrot.lane.b32.xlu0 %v4713_v39, %s4946_s6 }
0x1279   :  { %1926 = vrot.lane.b32.xlu0 %v5594_v34, %s4947_s8 }
0x12e0   :  { %v4710_v19 = vpop.permute.xlu1 %4709 }
0x12e1   :  { %v4712_v58 = vunpack.i.h.bf16 %v4710_v19  ;;  %v4711_v40 = vunpack.i.l.bf16 %v4710_v19 }
0x12e3   :  { %v1836_v6 = vsel %vm110_vm0, %v4711_v40, %v4712_v58 }
0x12e7   :  { %v4715_v42 = vpop.permute.xlu0 %4714 }
0x12e8   :  { %v4717_v54 = vunpack.i.h.bf16 %v4715_v42  ;;  %v4716_v56 = vunpack.i.l.bf16 %v4715_v42 }
0x12ea   :  { %v1837_v21 = vsel %vm464_vm5, %v1836_v6, %v4716_v56 }
0x12eb   :  { %v1838_v55 = vsel %vm466_vm6, %v1837_v21, %v4717_v54  ;;  %v1927_v42 = vpop.permute.xlu0 %1926 }
0x12ec   :  { %1904 = vmatmul.mubr.f32.vlgmr.msra.gmra.mrb[6].mxu0 %v1838_v55 }
0x12ed   :  { %4464 = vmatpush1.bf16.msra.mxu0 %v5137_v24  ;;  %2359 = vmatprep.mubr.f32.mxu0 %v4944_v0 }
0x12ee   :  { %4466 = vmatprep.subr.bf16.mxu0 %v5139_v25 }
0x12f1   :  { %4468 = vmatpush1.bf16.msra.mxu0 %v5155_v31 }
0x12f2   :  { %4470 = vmatprep.subr.bf16.mxu0 %v5158_v32 }
0x12f5   :  { %4472 = vmatpush1.bf16.msra.mxu0 %v5173_v37 }
0x12f6   :  { %4474 = vmatprep.subr.bf16.mxu0 %v5176_v38 }
0x12f9   :  { %4476 = vmatpush1.bf16.msra.mxu0 %v5191_v45 }
0x12fa   :  { %4478 = vmatprep.subr.bf16.mxu0 %v5194_v46 }
0x12fd   :  { %4480 = vmatpush1.bf16.msra.mxu0 %v5209_v52 }
0x12fe   :  { %4482 = vmatprep.subr.bf16.mxu0 %v5212_v53 }
0x1301   :  { %4484 = vmatpush1.bf16.msra.mxu0 %v5227_v62 }
0x1302   :  { %4486 = vmatprep.subr.bf16.mxu0 %v5230_v3 }
0x1305   :  { %4488 = vmatpush1.bf16.msra.mxu0 %v5239_v8 }
0x1306   :  { %4490 = vmatprep.subr.bf16.mxu0 %v5253_v30 }
0x1309   :  { %4492 = vmatpush1.bf16.msra.mxu0 %v5261_v35 }
0x130a   :  { %4520 = vmatprep.subr.bf16.mxu0 %v5126_v20 }
0x13bf   :  { %v1905_v57 = vpop.f32.mrb[6].mxu0 }
0x13c0   :  { %4808 = vrcp.f32 %v1905_v57  ;;  %v1907_v59 = vpop.f32.mrb[7].mxu0 }
0x13c1   :  { %4810 = vtanh.f32 %v5615_v12 }
0x13ca   :  { %v4809_v26 = vpop.eup %4808 }
0x13cb   :  { %v1911_v5 = vmul.f32 %v4809_v26, %v1907_v59  ;;  %v4811_v7 = vpop.eup %4810 }
0x13cc   :  { %v1937_v10 = vrot.slane %v4811_v7, %v5036_v18 }
0x13cd   :  { %v1912_v29 = vsub.f32 1.0, %v1911_v5 }
0x13cf   :  { %1915 = vrot.lane.b32.xlu1 %v1912_v29, %s4947_s8 }
0x13d3   :  { %1938 = vrot.lane.b32.xlu1 %v1937_v10, %s4946_s6 }
0x1441   :  { %v1916_v33 = vpop.permute.xlu1 %1915 }
0x1442   :  { %v1918_v39 = vmul.f32 %v1916_v33, %v1911_v5 }
0x1444   :  { %1921 = vrot.lane.b32.xlu1 %v1918_v39, %s4946_s6  ;;  %v1919_v58 = vsub.f32 %v1911_v5, %v1918_v39  ;;  %v1929_v6 = vmul.f32 %v1927_v42, %v1918_v39 }
0x1445   :  { %v1939_v19 = vpop.permute.xlu1 %1938 }
0x1446   :  { %v1941_v40 = vmul.f32 %v1939_v19, %v1918_v39  ;;  %v1948_v12 = vmul.f32 %v1939_v19, %v1919_v58  ;;  %v1947_v26 = vmul.f32 %v1927_v42, %v1919_v58 }
0x1448   :  { %1956 = vrot.lane.b32.xlu1 %v1937_v10, %s4948_s9  ;;  %1943 = vrot.lane.b32.xlu0 %v1941_v40, %s4948_s9 }
0x144c   :  { %1950 = vrot.lane.b32.xlu1 %v1948_v12, %s4948_s9 }
0x14b6   :  { %v1922_v54 = vpop.permute.xlu1 %1921 }
0x14b7   :  { %v1924_v56 = vsub.f32 %v1912_v29, %v1922_v54 }
0x14b9   :  { %v1955_v29 = vmul.f32 %v1924_v56, %v5594_v34 }
0x14ba   :  { %v1944_v21 = vpop.permute.xlu0 %1943  ;;  %v1957_v55 = vpop.permute.xlu1 %1956 }
0x14bb   :  { %v5666_v57 = vadd.f32 %v1944_v21, %v1929_v6  ;;  %v1959_v59 = vmul.f32 %v1957_v55, %v1924_v56 }
0x14bd   :  { %1966 = vrot.lane.b32.xlu1 %v5666_v57, %s4946_s6  ;;  %1961 = vrot.lane.b32.xlu0 %v1959_v59, %s4948_s9 }
0x14be   :  { %v1951_v5 = vpop.permute.xlu1 %1950 }
0x14bf   :  { %v1953_v7 = vadd.f32 %v1951_v5, %v1947_v26  ;;  %v5714_v5 = vrot.slane %v214_v1, %v5036_v18 }
0x14c1   :  { %v5672_v10 = vadd.f32 %v1953_v7, %v5666_v57 }
0x14c3   :  { %2040 = vrot.lane.b32.xlu0 %v5672_v10, %s4946_s6 }
0x14c7   :  { %2047 = vrot.lane.b32.xlu0 %v5666_v57, %s4947_s8 }
0x152f   :  { %v1962_v33 = vpop.permute.xlu0 %1961  ;;  %v1967_v19 = vpop.permute.xlu1 %1966 }
0x1530   :  { %v1964_v39 = vadd.f32 %v1962_v33, %v1955_v29 }
0x1532   :  { %v5679_v40 = vadd.f32 %v1967_v19, %v1964_v39 }
0x1534   :  { %2044 = vrot.lane.b32.xlu1 %v5679_v40, %s4947_s8 }
0x1535   :  { %v2041_v58 = vpop.permute.xlu0 %2040 }
0x1539   :  { %v2048_v42 = vpop.permute.xlu0 %2047 }
0x15a6   :  { %v2045_v12 = vpop.permute.xlu1 %2044 }
0x15a7   :  { %v2050_v54 = vsel %vm110_vm0, %v2041_v58, %v2045_v12 }
0x15a8   :  { %v2051_v6 = vsel %vm464_vm5, %v2050_v54, %v2048_v42 }
0x15a9   :  { %4130 = vmatmul.mubr.msk.f32.vlgmr.msra.gmra.mrb[18].mxu1 %vm466_vm6, %v2051_v6 }
0x15aa   :  { %4456 = vmatpush1.bf16.msra.mxu1 %v5063_v41  ;;  %2193 = vmatprep.mubr.f32.mxu1 %v4944_v0 }
0x15ab   :  { %4458 = vmatprep.subr.bf16.mxu1 %v5068_v44 }
0x15ae   :  { %4460 = vmatpush1.bf16.msra.mxu1 %v5073_v48 }
0x15af   :  { %4493 = vmatprep.subr.bf16.mxu1 %v6237_v43 }
0x167c   :  { %v2121_v34 = vpop.f32.mrb[18].mxu1 }
0x167d   :  { %v5692_v56 = vadd.f32 %v5390_v50, %v2121_v34  ;;  %v4131_v21 = vpop.f32.mrb[19].mxu1 }
0x167f   :  { %4812 = vtanh.f32 %v5692_v56 }
0x1689   :  { %v4813_v55 = vpop.eup %4812 }
0x168a   :  { %3894 = vmatmul.mubr.msk.f32.vlgmr.msra.gmra.mrb[20].mxu1 %vm110_vm0, %v4813_v55 }
0x168b   :  { %4495 = vmatpush3.bf16.msra.mxu1 %v5310_v47  ;;  %4156 = vmatprep.mubr.msk.f32.mxu1 %vm4950_vm7, %v4944_v0 }
0x168c   :  { %4496 = vmatprep.subr.bf16.mxu1 %v6237_v43 }
0x168f   :  { %4498 = vmatpush3.bf16.msra.mxu1 %v5316_v51 }
0x1690   :  { %4499 = vmatprep.subr.bf16.mxu1 %v6237_v43 }
0x1693   :  { %4501 = vmatpush3.bf16.msra.mxu1 %v5329_v13 }
0x1694   :  { %4502 = vmatprep.subr.bf16.mxu1 %v6237_v43 }
0x1697   :  { %4504 = vmatpush3.bf16.msra.mxu1 %v5346_v17 }
0x1698   :  { %4505 = vmatprep.subr.bf16.mxu1 %v6237_v43 }
0x169b   :  { %4507 = vmatpush3.bf16.msra.mxu1 %v5358_v22 }
0x169c   :  { %4508 = vmatprep.subr.bf16.mxu1 %v6237_v43 }
0x169f   :  { %4510 = vmatpush3.bf16.msra.mxu1 %v5368_v27 }
0x16a0   :  { %4512 = vmatprep.subr.bf16.mxu1 %v5047_v28 }
0x175d   :  { %v2195_v50 = vpop.f32.mrb[20].mxu1 }
0x175e   :  { %v2197_v59 = vpop.f32.mrb[21].mxu1 }
0x175f   :  { %v2202_v26 = vcombine.low %v2195_v50, %v2197_v59 }
0x1761   :  { %v2209_v7 = vrot.slane %v2202_v26, %v5036_v18 }
0x1763   :  { %v5718_v29 = vadd.f32 %v2209_v7, %v5714_v5 }
0x1765   :  { %v2218_v33 = vsel %vm386_vm4, %v5718_v29, -inf  ;;  %v2212_v39 = vsel %vm379_vm2, %v5718_v29, -inf  ;;  %v2237_v19 = vrot.slane %v5718_v29, %v5036_v18  ;;  %v2224_v1 = vsel %vm393_vm1, %v5718_v29, -inf }
0x1766   :  { %2219 = vmax.xlane.f32.xlu0 %v2218_v33  ;;  %2213 = vmax.xlane.f32.xlu1 %v2212_v39  ;;  %v2243_v7 = vrot.slane %v5718_v29, 2 }
0x1767   :  { %v2238_v58 = vcombine.high %v2237_v19, %v2237_v19 }
0x1769   :  { %v2240_v12 = vsel %vm410_vm3, %v2238_v58, -inf }
0x176a   :  { %2225 = vmax.xlane.f32.xlu0 %v2224_v1 }
0x176e   :  { %2241 = vmax.xlane.f32.xlu0 %v2240_v12 }
0x17f3   :  { %v2220_v42 = vpop.xlane.xlu0 %2219  ;;  %v2214_v54 = vpop.xlane.xlu1 %2213 }
0x17f4   :  { %v2221_v6 = vsub.f32 %v5718_v29, %v2220_v42  ;;  %v2215_v34 = vsub.f32 %v5718_v29, %v2214_v54 }
0x17f6   :  { %v2222_v21 = vmul.f32 1.442695, %v2221_v6  ;;  %v2216_v55 = vmul.f32 1.442695, %v2215_v34 }
0x17f7   :  { %v2226_v50 = vpop.xlane.xlu0 %2225 }
0x17f8   :  { %4814 = vpow2.f32 %v2222_v21  ;;  %v2227_v59 = vsub.f32 %v5718_v29, %v2226_v50 }
0x17f9   :  { %4816 = vpow2.f32 %v2216_v55 }
0x17fa   :  { %v2228_v26 = vmul.f32 1.442695, %v2227_v59 }
0x17fb   :  { %v2242_v33 = vpop.xlane.xlu0 %2241 }
0x17fc   :  { %v2245_v39 = vsub.f32 %v2243_v7, %v2242_v33  ;;  %4818 = vpow2.f32 %v2228_v26 }
0x17fe   :  { %v2246_v19 = vmul.f32 1.442695, %v2245_v39 }
0x1800   :  { %4820 = vpow2.f32 %v2246_v19 }
0x1802   :  { %v4815_v1 = vpop.eup %4814 }
0x1803   :  { %v4817_v58 = vpop.eup %4816  ;;  %v2266_v12 = vrot.slane %v4815_v1, %v5036_v18 }
0x1804   :  { %v2255_v42 = vrot.slane %v4817_v58, %v5036_v18 }
0x1806   :  { %v4718_v54 = vpack.i.bf16 %v2266_v12, %v2255_v42  ;;  %v4819_v6 = vpop.eup %4818 }
0x1807   :  { %v2277_v21 = vrot.slane %v4819_v6, %v5036_v18 }
0x1808   :  { %4719 = vrot.lane.b32.xlu1 %v4718_v54, %s4946_s6 }
0x180a   :  { %v4821_v34 = vpop.eup %4820 }
0x180b   :  { %v2288_v55 = vrot.slane %v4821_v34, %v5036_v18 }
0x180d   :  { %v4723_v50 = vpack.i.bf16 %v2288_v55, %v2277_v21 }
0x180f   :  { %4724 = vrot.lane.b32.xlu0 %v4723_v50, %s4946_s6 }
0x1813   :  { %2382 = vrot.lane.b32.xlu0 %v5692_v56, %s4947_s8 }
0x187a   :  { %v4720_v59 = vpop.permute.xlu1 %4719 }
0x187b   :  { %v4722_v26 = vunpack.i.h.bf16 %v4720_v59  ;;  %v4721_v7 = vunpack.i.l.bf16 %v4720_v59 }
0x187d   :  { %v2292_v1 = vsel %vm110_vm0, %v4721_v7, %v4722_v26 }
0x1881   :  { %v4725_v33 = vpop.permute.xlu0 %4724 }
0x1882   :  { %v4727_v39 = vunpack.i.h.bf16 %v4725_v33  ;;  %v4726_v19 = vunpack.i.l.bf16 %v4725_v33 }
0x1884   :  { %v2293_v58 = vsel %vm464_vm5, %v2292_v1, %v4726_v19 }
0x1885   :  { %v2294_v12 = vsel %vm466_vm6, %v2293_v58, %v4727_v39  ;;  %v2383_v19 = vpop.permute.xlu0 %2382 }
0x1886   :  { %2360 = vmatmul.mubr.f32.vlgmr.msra.gmra.mrb[8].mxu0 %v2294_v12 }
0x1887   :  { %4522 = vmatpush1.bf16.msra.mxu0 %v5137_v24  ;;  %2815 = vmatprep.mubr.f32.mxu0 %v4944_v0 }
0x1888   :  { %4524 = vmatprep.subr.bf16.mxu0 %v5139_v25 }
0x188b   :  { %4526 = vmatpush1.bf16.msra.mxu0 %v5155_v31 }
0x188c   :  { %4528 = vmatprep.subr.bf16.mxu0 %v5158_v32 }
0x188f   :  { %4530 = vmatpush1.bf16.msra.mxu0 %v5173_v37 }
0x1890   :  { %4532 = vmatprep.subr.bf16.mxu0 %v5176_v38 }
0x1893   :  { %4534 = vmatpush1.bf16.msra.mxu0 %v5191_v45 }
0x1894   :  { %4536 = vmatprep.subr.bf16.mxu0 %v5194_v46 }
0x1897   :  { %4538 = vmatpush1.bf16.msra.mxu0 %v5209_v52 }
0x1898   :  { %4540 = vmatprep.subr.bf16.mxu0 %v5212_v53 }
0x189b   :  { %4542 = vmatpush1.bf16.msra.mxu0 %v5227_v62 }
0x189c   :  { %4544 = vmatprep.subr.bf16.mxu0 %v5230_v3 }
0x189f   :  { %4546 = vmatpush1.bf16.msra.mxu0 %v5239_v8 }
0x18a0   :  { %4548 = vmatprep.subr.bf16.mxu0 %v5253_v30 }
0x18a3   :  { %4550 = vmatpush1.bf16.msra.mxu0 %v5261_v35 }
0x18a4   :  { %4578 = vmatprep.subr.bf16.mxu0 %v5126_v20 }
0x1959   :  { %v2361_v42 = vpop.f32.mrb[8].mxu0 }
0x195a   :  { %4822 = vrcp.f32 %v2361_v42  ;;  %v2363_v54 = vpop.f32.mrb[9].mxu0 }
0x195b   :  { %4824 = vtanh.f32 %v5718_v29 }
0x1964   :  { %v4823_v6 = vpop.eup %4822 }
0x1965   :  { %v2367_v34 = vmul.f32 %v4823_v6, %v2363_v54  ;;  %v4825_v55 = vpop.eup %4824 }
0x1966   :  { %v2393_v50 = vrot.slane %v4825_v55, %v5036_v18 }
0x1967   :  { %v2368_v21 = vsub.f32 1.0, %v2367_v34 }
0x1969   :  { %2371 = vrot.lane.b32.xlu1 %v2368_v21, %s4947_s8 }
0x196d   :  { %2394 = vrot.lane.b32.xlu1 %v2393_v50, %s4946_s6 }
0x19db   :  { %v2372_v59 = vpop.permute.xlu1 %2371 }
0x19dc   :  { %v2374_v26 = vmul.f32 %v2372_v59, %v2367_v34 }
0x19de   :  { %2377 = vrot.lane.b32.xlu1 %v2374_v26, %s4946_s6  ;;  %v2375_v33 = vsub.f32 %v2367_v34, %v2374_v26  ;;  %v2385_v12 = vmul.f32 %v2383_v19, %v2374_v26 }
0x19df   :  { %v2395_v7 = vpop.permute.xlu1 %2394 }
0x19e0   :  { %v2397_v39 = vmul.f32 %v2395_v7, %v2374_v26  ;;  %v2404_v29 = vmul.f32 %v2395_v7, %v2375_v33  ;;  %v2403_v34 = vmul.f32 %v2383_v19, %v2375_v33 }
0x19e2   :  { %2412 = vrot.lane.b32.xlu1 %v2393_v50, %s4948_s9  ;;  %2399 = vrot.lane.b32.xlu0 %v2397_v39, %s4948_s9 }
0x19e6   :  { %2406 = vrot.lane.b32.xlu1 %v2404_v29, %s4948_s9 }
0x1a50   :  { %v2378_v1 = vpop.permute.xlu1 %2377 }
0x1a51   :  { %v2380_v58 = vsub.f32 %v2368_v21, %v2378_v1 }
0x1a53   :  { %v2411_v21 = vmul.f32 %v2380_v58, %v5692_v56 }
0x1a54   :  { %v2400_v42 = vpop.permute.xlu0 %2399  ;;  %v2413_v54 = vpop.permute.xlu1 %2412 }
0x1a55   :  { %v5769_v6 = vadd.f32 %v2400_v42, %v2385_v12  ;;  %v2415_v55 = vmul.f32 %v2413_v54, %v2380_v58  ;;  %v5797_v58 = vld [vmem:[%s6234_s5] ss:$0 sm:$0xff] }
0x1a57   :  { %2422 = vrot.lane.b32.xlu1 %v5769_v6, %s4946_s6  ;;  %2417 = vrot.lane.b32.xlu0 %v2415_v55, %s4948_s9 }
0x1a58   :  { %v2407_v50 = vpop.permute.xlu1 %2406 }
0x1a59   :  { %v2409_v59 = vadd.f32 %v2407_v50, %v2403_v34 }
0x1a5b   :  { %v5775_v7 = vadd.f32 %v2409_v59, %v5769_v6 }
0x1a5d   :  { %2496 = vrot.lane.b32.xlu0 %v5775_v7, %s4946_s6 }
0x1a61   :  { %2503 = vrot.lane.b32.xlu0 %v5769_v6, %s4947_s8 }
0x1ac9   :  { %v2418_v26 = vpop.permute.xlu0 %2417  ;;  %v2423_v29 = vpop.permute.xlu1 %2422 }
0x1aca   :  { %v2420_v39 = vadd.f32 %v2418_v26, %v2411_v21 }
0x1acc   :  { %v5782_v1 = vadd.f32 %v2423_v29, %v2420_v39  ;;  %v230_v39 = vcombine.high %v5714_v5, %v5714_v5 }
0x1ace   :  { %2500 = vrot.lane.b32.xlu1 %v5782_v1, %s4947_s8 }
0x1acf   :  { %v2497_v33 = vpop.permute.xlu0 %2496 }
0x1ad3   :  { %v2504_v12 = vpop.permute.xlu0 %2503 }
0x1b40   :  { %v2501_v19 = vpop.permute.xlu1 %2500 }
0x1b41   :  { %v2506_v42 = vsel %vm110_vm0, %v2497_v33, %v2501_v19 }
0x1b42   :  { %v2507_v54 = vsel %vm464_vm5, %v2506_v42, %v2504_v12 }
0x1b43   :  { %4157 = vmatmul.mubr.msk.f32.vlgmr.msra.gmra.mrb[22].mxu1 %vm466_vm6, %v2507_v54 }
0x1b44   :  { %4514 = vmatpush1.bf16.msra.mxu1 %v5063_v41  ;;  %2649 = vmatprep.mubr.f32.mxu1 %v4944_v0 }
0x1b45   :  { %4516 = vmatprep.subr.bf16.mxu1 %v5068_v44 }
0x1b48   :  { %4518 = vmatpush1.bf16.msra.mxu1 %v5073_v48 }
0x1b49   :  { %4551 = vmatprep.subr.bf16.mxu1 %v6237_v43 }
0x1c16   :  { %v2577_v56 = vpop.f32.mrb[22].mxu1 }
0x1c17   :  { %v5800_v55 = vadd.f32 %v5797_v58, %v2577_v56  ;;  %v4158_v34 = vpop.f32.mrb[23].mxu1 }
0x1c19   :  { %4826 = vtanh.f32 %v5800_v55 }
0x1c23   :  { %v4827_v50 = vpop.eup %4826 }
0x1c24   :  { %3900 = vmatmul.mubr.msk.f32.vlgmr.msra.gmra.mrb[24].mxu1 %vm110_vm0, %v4827_v50 }
0x1c25   :  { %4553 = vmatpush3.bf16.msra.mxu1 %v5310_v47  ;;  %4183 = vmatprep.mubr.msk.f32.mxu1 %vm4950_vm7, %v4944_v0 }
0x1c26   :  { %4554 = vmatprep.subr.bf16.mxu1 %v6237_v43 }
0x1c29   :  { %4556 = vmatpush3.bf16.msra.mxu1 %v5316_v51 }
0x1c2a   :  { %4557 = vmatprep.subr.bf16.mxu1 %v6237_v43 }
0x1c2d   :  { %4559 = vmatpush3.bf16.msra.mxu1 %v5329_v13 }
0x1c2e   :  { %4560 = vmatprep.subr.bf16.mxu1 %v6237_v43 }
0x1c31   :  { %4562 = vmatpush3.bf16.msra.mxu1 %v5346_v17 }
0x1c32   :  { %4563 = vmatprep.subr.bf16.mxu1 %v6237_v43 }
0x1c35   :  { %4565 = vmatpush3.bf16.msra.mxu1 %v5358_v22 }
0x1c36   :  { %4566 = vmatprep.subr.bf16.mxu1 %v6237_v43 }
0x1c39   :  { %4568 = vmatpush3.bf16.msra.mxu1 %v5368_v27 }
0x1c3a   :  { %4570 = vmatprep.subr.bf16.mxu1 %v5047_v28 }
0x1cf7   :  { %v2651_v59 = vpop.f32.mrb[24].mxu1 }
0x1cf8   :  { %v2653_v21 = vpop.f32.mrb[25].mxu1 }
0x1cf9   :  { %v2658_v26 = vcombine.low %v2651_v59, %v2653_v21 }
0x1cfb   :  { %v2665_v29 = vrot.slane %v2658_v26, %v5036_v18 }
0x1cfd   :  { %v5821_v33 = vadd.f32 %v2665_v29, %v230_v39 }
0x1cff   :  { %v2674_v19 = vsel %vm386_vm4, %v5821_v33, -inf  ;;  %v2668_v12 = vsel %vm379_vm2, %v5821_v33, -inf  ;;  %v2693_v42 = vrot.slane %v5821_v33, %v5036_v18  ;;  %v2680_v54 = vsel %vm393_vm1, %v5821_v33, -inf }
0x1d00   :  { %2675 = vmax.xlane.f32.xlu0 %v2674_v19  ;;  %2669 = vmax.xlane.f32.xlu1 %v2668_v12 }
0x1d01   :  { %v2694_v56 = vcombine.high %v2693_v42, %v2693_v42  ;;  %v2699_v42 = vrot.slane %v5821_v33, 2 }
0x1d03   :  { %v2696_v5 = vsel %vm410_vm3, %v2694_v56, -inf }
0x1d04   :  { %2681 = vmax.xlane.f32.xlu0 %v2680_v54 }
0x1d08   :  { %2697 = vmax.xlane.f32.xlu0 %v2696_v5 }
0x1d8d   :  { %v2676_v34 = vpop.xlane.xlu0 %2675  ;;  %v2670_v50 = vpop.xlane.xlu1 %2669 }
0x1d8e   :  { %v2677_v59 = vsub.f32 %v5821_v33, %v2676_v34  ;;  %v2671_v21 = vsub.f32 %v5821_v33, %v2670_v50 }
0x1d90   :  { %v2678_v26 = vmul.f32 1.442695, %v2677_v59  ;;  %v2672_v39 = vmul.f32 1.442695, %v2671_v21 }
0x1d91   :  { %v2682_v29 = vpop.xlane.xlu0 %2681 }
0x1d92   :  { %4828 = vpow2.f32 %v2678_v26  ;;  %v2683_v19 = vsub.f32 %v5821_v33, %v2682_v29 }
0x1d93   :  { %4830 = vpow2.f32 %v2672_v39 }
0x1d94   :  { %v2684_v12 = vmul.f32 1.442695, %v2683_v19 }
0x1d95   :  { %v2698_v54 = vpop.xlane.xlu0 %2697 }
0x1d96   :  { %v2701_v2 = vsub.f32 %v2699_v42, %v2698_v54  ;;  %4832 = vpow2.f32 %v2684_v12 }
0x1d98   :  { %v2702_v56 = vmul.f32 1.442695, %v2701_v2 }
0x1d9a   :  { %4834 = vpow2.f32 %v2702_v56 }
0x1d9c   :  { %v4829_v5 = vpop.eup %4828 }
0x1d9d   :  { %v4831_v43 = vpop.eup %4830  ;;  %v2722_v34 = vrot.slane %v4829_v5, %v5036_v18 }
0x1d9e   :  { %v2711_v50 = vrot.slane %v4831_v43, %v5036_v18 }
0x1da0   :  { %v4728_v59 = vpack.i.bf16 %v2722_v34, %v2711_v50  ;;  %v4833_v21 = vpop.eup %4832 }
0x1da1   :  { %v2733_v39 = vrot.slane %v4833_v21, %v5036_v18 }
0x1da2   :  { %4729 = vrot.lane.b32.xlu1 %v4728_v59, %s4946_s6 }
0x1da4   :  { %v4835_v26 = vpop.eup %4834 }
0x1da5   :  { %v2744_v29 = vrot.slane %v4835_v26, %v5036_v18 }
0x1da7   :  { %v4733_v19 = vpack.i.bf16 %v2744_v29, %v2733_v39 }
0x1da9   :  { %4734 = vrot.lane.b32.xlu0 %v4733_v19, %s4946_s6 }
0x1dad   :  { %2838 = vrot.lane.b32.xlu0 %v5800_v55, %s4947_s8 }
0x1e14   :  { %v4730_v2 = vpop.permute.xlu1 %4729 }
0x1e15   :  { %v4732_v12 = vunpack.i.h.bf16 %v4730_v2  ;;  %v4731_v42 = vunpack.i.l.bf16 %v4730_v2 }
0x1e17   :  { %v2748_v5 = vsel %vm110_vm0, %v4731_v42, %v4732_v12 }
0x1e1b   :  { %v4735_v54 = vpop.permute.xlu0 %4734 }
0x1e1c   :  { %v4737_v43 = vunpack.i.h.bf16 %v4735_v54  ;;  %v4736_v56 = vunpack.i.l.bf16 %v4735_v54 }
0x1e1e   :  { %v2749_v34 = vsel %vm464_vm5, %v2748_v5, %v4736_v56 }
0x1e1f   :  { %v2750_v50 = vsel %vm466_vm6, %v2749_v34, %v4737_v43  ;;  %v2839_v56 = vpop.permute.xlu0 %2838 }
0x1e20   :  { %2816 = vmatmul.mubr.f32.vlgmr.msra.gmra.mrb[10].mxu0 %v2750_v50 }
0x1e21   :  { %4580 = vmatpush1.bf16.msra.mxu0 %v5137_v24  ;;  %3271 = vmatprep.mubr.f32.mxu0 %v4944_v0 }
0x1e22   :  { %4582 = vmatprep.subr.bf16.mxu0 %v5139_v25 }
0x1e25   :  { %4584 = vmatpush1.bf16.msra.mxu0 %v5155_v31 }
0x1e26   :  { %4586 = vmatprep.subr.bf16.mxu0 %v5158_v32 }
0x1e29   :  { %4588 = vmatpush1.bf16.msra.mxu0 %v5173_v37 }
0x1e2a   :  { %4590 = vmatprep.subr.bf16.mxu0 %v5176_v38 }
0x1e2d   :  { %4592 = vmatpush1.bf16.msra.mxu0 %v5191_v45 }
0x1e2e   :  { %4594 = vmatprep.subr.bf16.mxu0 %v5194_v46 }
0x1e31   :  { %4596 = vmatpush1.bf16.msra.mxu0 %v5209_v52 }
0x1e32   :  { %4598 = vmatprep.subr.bf16.mxu0 %v5212_v53 }
0x1e35   :  { %4600 = vmatpush1.bf16.msra.mxu0 %v5227_v62 }
0x1e36   :  { %4602 = vmatprep.subr.bf16.mxu0 %v5230_v3 }
0x1e39   :  { %4604 = vmatpush1.bf16.msra.mxu0 %v5239_v8 }
0x1e3a   :  { %4606 = vmatprep.subr.bf16.mxu0 %v5253_v30 }
0x1e3d   :  { %4608 = vmatpush1.bf16.msra.mxu0 %v5261_v35 }
0x1e3e   :  { %4636 = vmatprep.subr.bf16.mxu0 %v5126_v20 }
0x1ef3   :  { %v2817_v59 = vpop.f32.mrb[10].mxu0 }
0x1ef4   :  { %4836 = vrcp.f32 %v2817_v59  ;;  %v2819_v21 = vpop.f32.mrb[11].mxu0 }
0x1ef5   :  { %4838 = vtanh.f32 %v5821_v33 }
0x1efe   :  { %v4837_v26 = vpop.eup %4836 }
0x1eff   :  { %v2823_v39 = vmul.f32 %v4837_v26, %v2819_v21  ;;  %v4839_v19 = vpop.eup %4838 }
0x1f00   :  { %v2849_v2 = vrot.slane %v4839_v19, %v5036_v18 }
0x1f01   :  { %v2824_v29 = vsub.f32 1.0, %v2823_v39 }
0x1f03   :  { %2827 = vrot.lane.b32.xlu1 %v2824_v29, %s4947_s8 }
0x1f07   :  { %2850 = vrot.lane.b32.xlu1 %v2849_v2, %s4946_s6 }
0x1f75   :  { %v2828_v12 = vpop.permute.xlu1 %2827 }
0x1f76   :  { %v2830_v42 = vmul.f32 %v2828_v12, %v2823_v39 }
0x1f78   :  { %2833 = vrot.lane.b32.xlu1 %v2830_v42, %s4946_s6  ;;  %v2831_v54 = vsub.f32 %v2823_v39, %v2830_v42  ;;  %v2841_v50 = vmul.f32 %v2839_v56, %v2830_v42 }
0x1f79   :  { %v2851_v20 = vpop.permute.xlu1 %2850 }
0x1f7a   :  { %v2853_v43 = vmul.f32 %v2851_v20, %v2830_v42  ;;  %v2860_v33 = vmul.f32 %v2851_v20, %v2831_v54  ;;  %v2859_v39 = vmul.f32 %v2839_v56, %v2831_v54 }
0x1f7c   :  { %2868 = vrot.lane.b32.xlu1 %v2849_v2, %s4948_s9  ;;  %2855 = vrot.lane.b32.xlu0 %v2853_v43, %s4948_s9 }
0x1f80   :  { %2862 = vrot.lane.b32.xlu1 %v2860_v33, %s4948_s9 }
0x1fea   :  { %v2834_v5 = vpop.permute.xlu1 %2833 }
0x1feb   :  { %v2836_v34 = vsub.f32 %v2824_v29, %v2834_v5 }
0x1fed   :  { %v2867_v29 = vmul.f32 %v2836_v34, %v5800_v55  ;;  %v6239_v55 = vmov 0.0|0.0  }
0x1fee   :  { %v2856_v59 = vpop.permute.xlu0 %2855  ;;  %v2869_v21 = vpop.permute.xlu1 %2868 }
0x1fef   :  { %v5872_v26 = vadd.f32 %v2856_v59, %v2841_v50  ;;  %v2871_v19 = vmul.f32 %v2869_v21, %v2836_v34 }
0x1ff1   :  { %2878 = vrot.lane.b32.xlu1 %v5872_v26, %s4946_s6  ;;  %2873 = vrot.lane.b32.xlu0 %v2871_v19, %s4948_s9 }
0x1ff2   :  { %v2863_v2 = vpop.permute.xlu1 %2862 }
0x1ff3   :  { %v2865_v12 = vadd.f32 %v2863_v2, %v2859_v39 }
0x1ff5   :  { %v5878_v20 = vadd.f32 %v2865_v12, %v5872_v26 }
0x1ff7   :  { %2952 = vrot.lane.b32.xlu0 %v5878_v20, %s4946_s6 }
0x1ffb   :  { %2959 = vrot.lane.b32.xlu0 %v5872_v26, %s4947_s8 }
0x2063   :  { %v2874_v42 = vpop.permute.xlu0 %2873  ;;  %v2879_v33 = vpop.permute.xlu1 %2878 }
0x2064   :  { %v2876_v43 = vadd.f32 %v2874_v42, %v2867_v29 }
0x2066   :  { %v5885_v5 = vadd.f32 %v2879_v33, %v2876_v43 }
0x2068   :  { %2956 = vrot.lane.b32.xlu1 %v5885_v5, %s4947_s8 }
0x2069   :  { %v2953_v54 = vpop.permute.xlu0 %2952 }
0x206d   :  { %v2960_v50 = vpop.permute.xlu0 %2959 }
0x20da   :  { %v2957_v56 = vpop.permute.xlu1 %2956 }
0x20db   :  { %v2962_v59 = vsel %vm110_vm0, %v2953_v54, %v2957_v56 }
0x20dc   :  { %v2963_v21 = vsel %vm464_vm5, %v2962_v59, %v2960_v50 }
0x20dd   :  { %4184 = vmatmul.mubr.msk.f32.vlgmr.msra.gmra.mrb[26].mxu1 %vm466_vm6, %v2963_v21 }
0x20de   :  { %4572 = vmatpush1.bf16.msra.mxu1 %v5063_v41  ;;  %3105 = vmatprep.mubr.f32.mxu1 %v4944_v0 }
0x20df   :  { %4574 = vmatprep.subr.bf16.mxu1 %v5068_v44 }
0x20e2   :  { %4576 = vmatpush1.bf16.msra.mxu1 %v5073_v48 }
0x20e3   :  { %4609 = vmatprep.subr.bf16.mxu1 %v6239_v55 }
0x21b0   :  { %v3033_v34 = vpop.f32.mrb[26].mxu1 }
0x21b1   :  { %v5898_v19 = vadd.f32 %v5797_v58, %v3033_v34  ;;  %v4185_v39 = vpop.f32.mrb[27].mxu1 }
0x21b3   :  { %4840 = vtanh.f32 %v5898_v19 }
0x21bd   :  { %v4841_v2 = vpop.eup %4840 }
0x21be   :  { %3906 = vmatmul.mubr.msk.f32.vlgmr.msra.gmra.mrb[28].mxu1 %vm110_vm0, %v4841_v2 }
0x21bf   :  { %4611 = vmatpush3.bf16.msra.mxu1 %v5310_v47  ;;  %4210 = vmatprep.mubr.msk.f32.mxu1 %vm4950_vm7, %v4944_v0 }
0x21c0   :  { %4612 = vmatprep.subr.bf16.mxu1 %v6239_v55 }
0x21c3   :  { %4614 = vmatpush3.bf16.msra.mxu1 %v5316_v51 }
0x21c4   :  { %4615 = vmatprep.subr.bf16.mxu1 %v6239_v55 }
0x21c7   :  { %4617 = vmatpush3.bf16.msra.mxu1 %v5329_v13  ;;  %v6240_v13 = vcombine.high %v5093_v61, %v5095_v63 }
0x21c8   :  { %4618 = vmatprep.subr.bf16.mxu1 %v6239_v55 }
0x21c9   :  { %v5920_v29 = vrot.slane %v6240_v13, %v5036_v18 }
0x21cb   :  { %4620 = vmatpush3.bf16.msra.mxu1 %v5346_v17 }
0x21cc   :  { %4621 = vmatprep.subr.bf16.mxu1 %v6239_v55 }
0x21cf   :  { %4623 = vmatpush3.bf16.msra.mxu1 %v5358_v22 }
0x21d0   :  { %4624 = vmatprep.subr.bf16.mxu1 %v6239_v55 }
0x21d3   :  { %4626 = vmatpush3.bf16.msra.mxu1 %v5368_v27 }
0x21d4   :  { %4628 = vmatprep.subr.bf16.mxu1 %v5047_v28 }
0x2291   :  { %v3107_v47 = vpop.f32.mrb[28].mxu1 }
0x2292   :  { %v3109_v51 = vpop.f32.mrb[29].mxu1 }
0x2293   :  { %v3114_v12 = vcombine.low %v3107_v47, %v3109_v51 }
0x2295   :  { %v3121_v17 = vrot.slane %v3114_v12, %v5036_v18 }
0x2297   :  { %v5924_v42 = vadd.f32 %v3121_v17, %v5920_v29 }
0x2299   :  { %v3130_v22 = vsel %vm386_vm4, %v5924_v42, -inf  ;;  %v3124_v28 = vsel %vm379_vm2, %v5924_v42, -inf  ;;  %v3149_v27 = vrot.slane %v5924_v42, %v5036_v18  ;;  %v3136_v61 = vsel %vm393_vm1, %v5924_v42, -inf }
0x229a   :  { %3131 = vmax.xlane.f32.xlu0 %v3130_v22  ;;  %3125 = vmax.xlane.f32.xlu1 %v3124_v28  ;;  %v3155_v2 = vrot.slane %v5924_v42, 2 }
0x229b   :  { %v3150_v63 = vcombine.high %v3149_v27, %v3149_v27 }
0x229d   :  { %v3152_v43 = vsel %vm410_vm3, %v3150_v63, -inf }
0x229e   :  { %3137 = vmax.xlane.f32.xlu0 %v3136_v61 }
0x22a2   :  { %3153 = vmax.xlane.f32.xlu0 %v3152_v43 }
0x2327   :  { %v3132_v33 = vpop.xlane.xlu0 %3131  ;;  %v3126_v54 = vpop.xlane.xlu1 %3125 }
0x2328   :  { %v3133_v56 = vsub.f32 %v5924_v42, %v3132_v33  ;;  %v3127_v50 = vsub.f32 %v5924_v42, %v3126_v54 }
0x232a   :  { %v3134_v59 = vmul.f32 1.442695, %v3133_v56  ;;  %v3128_v21 = vmul.f32 1.442695, %v3127_v50 }
0x232b   :  { %v3138_v55 = vpop.xlane.xlu0 %3137 }
0x232c   :  { %4842 = vpow2.f32 %v3134_v59  ;;  %v3139_v34 = vsub.f32 %v5924_v42, %v3138_v55 }
0x232d   :  { %4844 = vpow2.f32 %v3128_v21 }
0x232e   :  { %v3140_v39 = vmul.f32 1.442695, %v3139_v34 }
0x232f   :  { %v3154_v47 = vpop.xlane.xlu0 %3153 }
0x2330   :  { %v3157_v51 = vsub.f32 %v3155_v2, %v3154_v47  ;;  %4846 = vpow2.f32 %v3140_v39 }
0x2332   :  { %v3158_v12 = vmul.f32 1.442695, %v3157_v51 }
0x2334   :  { %4848 = vpow2.f32 %v3158_v12 }
0x2336   :  { %v4843_v13 = vpop.eup %4842 }
0x2337   :  { %v4845_v17 = vpop.eup %4844  ;;  %v3178_v22 = vrot.slane %v4843_v13, %v5036_v18 }
0x2338   :  { %v3167_v28 = vrot.slane %v4845_v17, %v5036_v18 }
0x233a   :  { %v4738_v27 = vpack.i.bf16 %v3178_v22, %v3167_v28  ;;  %v4847_v61 = vpop.eup %4846 }
0x233b   :  { %v3189_v43 = vrot.slane %v4847_v61, %v5036_v18 }
0x233c   :  { %4739 = vrot.lane.b32.xlu1 %v4738_v27, %s4946_s6 }
0x233e   :  { %v4849_v63 = vpop.eup %4848 }
0x233f   :  { %v3200_v33 = vrot.slane %v4849_v63, %v5036_v18 }
0x2341   :  { %v4743_v54 = vpack.i.bf16 %v3200_v33, %v3189_v43 }
0x2343   :  { %4744 = vrot.lane.b32.xlu0 %v4743_v54, %s4946_s6 }
0x2347   :  { %3294 = vrot.lane.b32.xlu0 %v5898_v19, %s4947_s8 }
0x23ae   :  { %v4740_v56 = vpop.permute.xlu1 %4739 }
0x23af   :  { %v4742_v50 = vunpack.i.h.bf16 %v4740_v56  ;;  %v4741_v59 = vunpack.i.l.bf16 %v4740_v56 }
0x23b1   :  { %v3204_v39 = vsel %vm110_vm0, %v4741_v59, %v4742_v50 }
0x23b5   :  { %v4745_v21 = vpop.permute.xlu0 %4744 }
0x23b6   :  { %v4747_v55 = vunpack.i.h.bf16 %v4745_v21  ;;  %v4746_v34 = vunpack.i.l.bf16 %v4745_v21 }
0x23b8   :  { %v3205_v2 = vsel %vm464_vm5, %v3204_v39, %v4746_v34 }
0x23b9   :  { %v3206_v47 = vsel %vm466_vm6, %v3205_v2, %v4747_v55 }
0x23ba   :  { %3272 = vmatmul.mubr.f32.vlgmr.msra.gmra.mrb[12].mxu0 %v3206_v47 }
0x23bb   :  { %4638 = vmatpush1.bf16.msra.mxu0 %v5137_v24  ;;  %3727 = vmatprep.mubr.f32.mxu0 %v4944_v0 }
0x23bc   :  { %4640 = vmatprep.subr.bf16.mxu0 %v5139_v25 }
0x23bf   :  { %4642 = vmatpush1.bf16.msra.mxu0 %v5155_v31 }
0x23c0   :  { %4644 = vmatprep.subr.bf16.mxu0 %v5158_v32 }
0x23c3   :  { %4646 = vmatpush1.bf16.msra.mxu0 %v5173_v37 }
0x23c4   :  { %4648 = vmatprep.subr.bf16.mxu0 %v5176_v38 }
0x23c7   :  { %4650 = vmatpush1.bf16.msra.mxu0 %v5191_v45 }
0x23c8   :  { %4652 = vmatprep.subr.bf16.mxu0 %v5194_v46 }
0x23cb   :  { %4654 = vmatpush1.bf16.msra.mxu0 %v5209_v52 }
0x23cc   :  { %4656 = vmatprep.subr.bf16.mxu0 %v5212_v53 }
0x23cf   :  { %4658 = vmatpush1.bf16.msra.mxu0 %v5227_v62 }
0x23d0   :  { %4660 = vmatprep.subr.bf16.mxu0 %v5230_v3 }
0x23d3   :  { %4662 = vmatpush1.bf16.msra.mxu0 %v5239_v8 }
0x23d4   :  { %4664 = vmatprep.subr.bf16.mxu0 %v5253_v30  ;;  %v3295_v30 = vpop.permute.xlu0 %3294 }
0x23d7   :  { %4666 = vmatpush1.bf16.msra.mxu0 %v5261_v35 }
0x248d   :  { %v3273_v24 = vpop.f32.mrb[12].mxu0 }
0x248e   :  { %4850 = vrcp.f32 %v3273_v24  ;;  %v3275_v25 = vpop.f32.mrb[13].mxu0 }
0x248f   :  { %4852 = vtanh.f32 %v5924_v42 }
0x2498   :  { %v4851_v31 = vpop.eup %4850 }
0x2499   :  { %v3279_v32 = vmul.f32 %v4851_v31, %v3275_v25  ;;  %v4853_v38 = vpop.eup %4852 }
0x249a   :  { %v3305_v45 = vrot.slane %v4853_v38, %v5036_v18 }
0x249b   :  { %v3280_v37 = vsub.f32 1.0, %v3279_v32 }
0x249d   :  { %3283 = vrot.lane.b32.xlu1 %v3280_v37, %s4947_s8 }
0x24a1   :  { %3306 = vrot.lane.b32.xlu1 %v3305_v45, %s4946_s6 }
0x250f   :  { %v3284_v46 = vpop.permute.xlu1 %3283 }
0x2510   :  { %v3286_v52 = vmul.f32 %v3284_v46, %v3279_v32 }
0x2512   :  { %3289 = vrot.lane.b32.xlu1 %v3286_v52, %s4946_s6  ;;  %v3287_v62 = vsub.f32 %v3279_v32, %v3286_v52  ;;  %v3297_v51 = vmul.f32 %v3295_v30, %v3286_v52 }
0x2513   :  { %v3307_v53 = vpop.permute.xlu1 %3306 }
0x2514   :  { %v3309_v3 = vmul.f32 %v3307_v53, %v3286_v52  ;;  %v3316_v8 = vmul.f32 %v3307_v53, %v3287_v62  ;;  %v3315_v28 = vmul.f32 %v3295_v30, %v3287_v62 }
0x2516   :  { %3324 = vrot.lane.b32.xlu1 %v3305_v45, %s4948_s9  ;;  %3311 = vrot.lane.b32.xlu0 %v3309_v3, %s4948_s9 }
0x251a   :  { %3318 = vrot.lane.b32.xlu1 %v3316_v8, %s4948_s9 }
0x2584   :  { %v3290_v35 = vpop.permute.xlu1 %3289 }
0x2585   :  { %v3292_v42 = vsub.f32 %v3280_v37, %v3290_v35 }
0x2587   :  { %v3323_v43 = vmul.f32 %v3292_v42, %v5898_v19 }
0x2588   :  { %v3312_v12 = vpop.permute.xlu0 %3311  ;;  %v3325_v13 = vpop.permute.xlu1 %3324 }
0x2589   :  { %v5974_v17 = vadd.f32 %v3312_v12, %v3297_v51  ;;  %v3327_v22 = vmul.f32 %v3325_v13, %v3292_v42 }
0x258b   :  { %3334 = vrot.lane.b32.xlu1 %v5974_v17, %s4946_s6  ;;  %3329 = vrot.lane.b32.xlu0 %v3327_v22, %s4948_s9 }
0x258c   :  { %v3319_v27 = vpop.permute.xlu1 %3318 }
0x258d   :  { %v3321_v61 = vadd.f32 %v3319_v27, %v3315_v28 }
0x258f   :  { %v5980_v63 = vadd.f32 %v3321_v61, %v5974_v17 }
0x2591   :  { %3408 = vrot.lane.b32.xlu0 %v5980_v63, %s4946_s6 }
0x2595   :  { %3415 = vrot.lane.b32.xlu0 %v5974_v17, %s4947_s8 }
0x25fd   :  { %v3330_v33 = vpop.permute.xlu0 %3329  ;;  %v3335_v56 = vpop.permute.xlu1 %3334 }
0x25fe   :  { %v3332_v54 = vadd.f32 %v3330_v33, %v3323_v43 }
0x2600   :  { %v5987_v50 = vadd.f32 %v3335_v56, %v3332_v54 }
0x2602   :  { %3412 = vrot.lane.b32.xlu1 %v5987_v50, %s4947_s8 }
0x2603   :  { %v3409_v59 = vpop.permute.xlu0 %3408 }
0x2607   :  { %v3416_v55 = vpop.permute.xlu0 %3415 }
0x2674   :  { %v3413_v21 = vpop.permute.xlu1 %3412 }
0x2675   :  { %v3418_v34 = vsel %vm110_vm0, %v3409_v59, %v3413_v21 }
0x2676   :  { %v3419_v39 = vsel %vm464_vm5, %v3418_v34, %v3416_v55 }
0x2677   :  { %4211 = vmatmul.mubr.msk.f32.vlgmr.msra.gmra.mrb[30].mxu1 %vm466_vm6, %v3419_v39 }
0x2678   :  { %4630 = vmatpush1.bf16.msra.mxu1 %v5063_v41  ;;  %3561 = vmatprep.mubr.f32.mxu1 %v4944_v0  ;;  %v231_v0 = vcombine.high %v5920_v29, %v5920_v29 }
0x2679   :  { %4632 = vmatprep.subr.bf16.mxu1 %v5068_v44 }
0x267c   :  { %4634 = vmatpush1.bf16.msra.mxu1 %v5073_v48 }
0x274a   :  { %v3489_v19 = vpop.f32.mrb[30].mxu1 }
0x274b   :  { %v5999_v2 = vadd.f32 %v5797_v58, %v3489_v19  ;;  %v4212_v47 = vpop.f32.mrb[31].mxu1 }
0x274d   :  { %4854 = vtanh.f32 %v5999_v2 }
0x2757   :  { %v4855_v24 = vpop.eup %4854 }
0x2758   :  { %3912 = vmatmul.mubr.msk.f32.vlgmr.msra.gmra.mrb[32].mxu1 %vm110_vm0, %v4855_v24 }
0x282b   :  { %v3563_v25 = vpop.f32.mrb[32].mxu1 }
0x282c   :  { %v3565_v31 = vpop.f32.mrb[33].mxu1 }
0x282d   :  { %v3570_v32 = vcombine.low %v3563_v25, %v3565_v31 }
0x282f   :  { %v3577_v41 = vrot.slane %v3570_v32, %v5036_v18 }
0x2831   :  { %v3579_v44 = vadd.f32 %v3577_v41, %v231_v0 }
0x2833   :  { %v3586_v48 = vsel %vm386_vm4, %v3579_v44, -inf  ;;  %v3580_v58 = vsel %vm379_vm2, %v3579_v44, -inf  ;;  %v3605_v37 = vrot.slane %v3579_v44, %v5036_v18  ;;  %v3592_v38 = vsel %vm393_vm1, %v3579_v44, -inf }
0x2834   :  { %3587 = vmax.xlane.f32.xlu0 %v3586_v48  ;;  %3581 = vmax.xlane.f32.xlu1 %v3580_v58  ;;  %v3611_v51 = vrot.slane %v3579_v44, 2 }
0x2835   :  { %v3606_v45 = vcombine.high %v3605_v37, %v3605_v37 }
0x2837   :  { %v3608_v46 = vsel %vm410_vm3, %v3606_v45, -inf }
0x2838   :  { %3593 = vmax.xlane.f32.xlu0 %v3592_v38 }
0x283c   :  { %3609 = vmax.xlane.f32.xlu0 %v3608_v46 }
0x28c1   :  { %v3588_v52 = vpop.xlane.xlu0 %3587  ;;  %v3582_v29 = vpop.xlane.xlu1 %3581 }
0x28c2   :  { %v3589_v53 = vsub.f32 %v3579_v44, %v3588_v52  ;;  %v3583_v62 = vsub.f32 %v3579_v44, %v3582_v29 }
0x28c4   :  { %v3590_v3 = vmul.f32 1.442695, %v3589_v53  ;;  %v3584_v8 = vmul.f32 1.442695, %v3583_v62 }
0x28c5   :  { %v3594_v30 = vpop.xlane.xlu0 %3593 }
0x28c6   :  { %4856 = vpow2.f32 %v3590_v3  ;;  %v3595_v35 = vsub.f32 %v3579_v44, %v3594_v30 }
0x28c7   :  { %4858 = vpow2.f32 %v3584_v8 }
0x28c8   :  { %v3596_v42 = vmul.f32 1.442695, %v3595_v35 }
0x28c9   :  { %v3610_v12 = vpop.xlane.xlu0 %3609 }
0x28ca   :  { %v3613_v13 = vsub.f32 %v3611_v51, %v3610_v12  ;;  %4860 = vpow2.f32 %v3596_v42 }
0x28cc   :  { %v3614_v22 = vmul.f32 1.442695, %v3613_v13 }
0x28ce   :  { %4862 = vpow2.f32 %v3614_v22 }
0x28d0   :  { %v4857_v28 = vpop.eup %4856 }
0x28d1   :  { %v4859_v27 = vpop.eup %4858  ;;  %v3634_v61 = vrot.slane %v4857_v28, %v5036_v18  ;;  %v4951_v28 = vmov 1966171168  }
0x28d2   :  { %v3623_v43 = vrot.slane %v4859_v27, %v5036_v18  ;;  %v609_v27 = vunpack.c.l.s4 %v4951_v28 }
0x28d4   :  { %v4748_v33 = vpack.i.bf16 %v3634_v61, %v3623_v43  ;;  %v4861_v54 = vpop.eup %4860  ;;  %v610_v43 = vunpack.c.0.s8 %v609_v27 }
0x28d5   :  { %v3645_v59 = vrot.slane %v4861_v54, %v5036_v18 }
0x28d6   :  { %4749 = vrot.lane.b32.xlu1 %v4748_v33, %s4946_s6 }
0x28d8   :  { %v4863_v56 = vpop.eup %4862 }
0x28d9   :  { %v3656_v21 = vrot.slane %v4863_v56, %v5036_v18 }
0x28db   :  { %v4753_v55 = vpack.i.bf16 %v3656_v21, %v3645_v59  ;;  %v6075_v21 = vsub.s32 %v610_v43, %v5006_v4 }
0x28dd   :  { %4754 = vrot.lane.b32.xlu0 %v4753_v55, %s4946_s6 }
0x28e1   :  { %3750 = vrot.lane.b32.xlu0 %v5999_v2, %s4947_s8 }
0x2948   :  { %v4750_v34 = vpop.permute.xlu1 %4749 }
0x2949   :  { %v4752_v39 = vunpack.i.h.bf16 %v4750_v34  ;;  %v4751_v19 = vunpack.i.l.bf16 %v4750_v34 }
0x294b   :  { %v3660_v31 = vsel %vm110_vm0, %v4751_v19, %v4752_v39 }
0x294f   :  { %v4755_v47 = vpop.permute.xlu0 %4754 }
0x2950   :  { %v4757_v24 = vunpack.i.h.bf16 %v4755_v47  ;;  %v4756_v25 = vunpack.i.l.bf16 %v4755_v47 }
0x2952   :  { %v3661_v32 = vsel %vm464_vm5, %v3660_v31, %v4756_v25 }
0x2953   :  { %v3662_v0 = vsel %vm466_vm6, %v3661_v32, %v4757_v24 }
0x2954   :  { %3728 = vmatmul.mubr.f32.vlgmr.msra.gmra.mrb[14].mxu0 %v3662_v0 }
0x2a27   :  { %v3729_v41 = vpop.f32.mrb[14].mxu0 }
0x2a28   :  { %4864 = vrcp.f32 %v3729_v41  ;;  %v3731_v48 = vpop.f32.mrb[15].mxu0 }
0x2a29   :  { %4866 = vtanh.f32 %v3579_v44  ;;  %v6029_v44 = vpop.permute.xlu0 %3750 }
0x2a2a   :  { %4868 = vtanh.f32 %v5325_v11 }
0x2a2b   :  { %4870 = vtanh.f32 %v5375_v36 }
0x2a2c   :  { %4872 = vtanh.f32 %v5465_v60 }
0x2a2d   :  { %4874 = vtanh.f32 %v5478_v9 }
0x2a2e   :  { %4876 = vtanh.f32 %v5568_v49 }
0x2a2f   :  { %4878 = vtanh.f32 %v5581_v23 }
0x2a30   :  { %4880 = vtanh.f32 %v5666_v57 }
0x2a31   :  { %4882 = vtanh.f32 %v5679_v40 }
0x2a32   :  { %v4865_v58 = vpop.eup %4864  ;;  %4884 = vtanh.f32 %v5769_v6 }
0x2a33   :  { %v3735_v37 = vmul.f32 %v4865_v58, %v3731_v48  ;;  %v4867_v45 = vpop.eup %4866  ;;  %4886 = vtanh.f32 %v5782_v1 }
0x2a34   :  { %v3761_v46 = vrot.slane %v4867_v45, %v5036_v18  ;;  %v4869_v36 = vpop.eup %4868  ;;  %4888 = vtanh.f32 %v5872_v26 }
0x2a35   :  { %v3736_v38 = vsub.f32 1.0, %v3735_v37  ;;  %v4871_v60 = vpop.eup %4870  ;;  %4890 = vtanh.f32 %v5885_v5 }
0x2a36   :  { %v4873_v9 = vpop.eup %4872  ;;  %4892 = vtanh.f32 %v5974_v17 }
0x2a37   :  { %3739 = vrot.lane.b32.xlu1 %v3736_v38, %s4947_s8  ;;  %v4875_v49 = vpop.eup %4874  ;;  %4894 = vtanh.f32 %v5987_v50 }
0x2a38   :  { %v4877_v13 = vpop.eup %4876 }
0x2a39   :  { %v4879_v23 = vpop.eup %4878 }
0x2a3a   :  { %v4881_v57 = vpop.eup %4880 }
0x2a3b   :  { %3762 = vrot.lane.b32.xlu1 %v3761_v46, %s4946_s6  ;;  %v4883_v40 = vpop.eup %4882 }
0x2a3c   :  { %v4885_v6 = vpop.eup %4884 }
0x2a3d   :  { %v4887_v1 = vpop.eup %4886 }
0x2a3e   :  { %v4889_v26 = vpop.eup %4888 }
0x2a3f   :  { %v4891_v5 = vpop.eup %4890 }
0x2a40   :  { %v4893_v22 = vpop.eup %4892 }
0x2a41   :  { %v4895_v17 = vpop.eup %4894 }
0x2aa9   :  { %v3740_v52 = vpop.permute.xlu1 %3739 }
0x2aaa   :  { %v3742_v29 = vmul.f32 %v3740_v52, %v3735_v37 }
0x2aac   :  { %3745 = vrot.lane.b32.xlu1 %v3742_v29, %s4946_s6  ;;  %v3753_v8 = vmul.f32 %v6029_v44, %v3742_v29  ;;  %v6034_v42 = vsub.f32 %v3735_v37, %v3742_v29 }
0x2aad   :  { %v3763_v53 = vpop.permute.xlu1 %3762 }
0x2aae   :  { %v3765_v62 = vmul.f32 %v3763_v53, %v3742_v29  ;;  %v3772_v11 = vmul.f32 %v3763_v53, %v6034_v42  ;;  %v3771_v48 = vmul.f32 %v6029_v44, %v6034_v42 }
0x2ab0   :  { %3780 = vrot.lane.b32.xlu1 %v3761_v46, %s4948_s9  ;;  %3767 = vrot.lane.b32.xlu0 %v3765_v62, %s4948_s9 }
0x2b1e   :  { %v3746_v3 = vpop.permute.xlu1 %3745 }
0x2b1f   :  { %v3748_v18 = vsub.f32 %v3736_v38, %v3746_v3 }
0x2b21   :  { %v3779_v61 = vmul.f32 %v3748_v18, %v5999_v2 }
0x2b22   :  { %v3768_v30 = vpop.permute.xlu0 %3767  ;;  %v3781_v35 = vpop.permute.xlu1 %3780 }
0x2b23   :  { %v6036_v51 = vadd.f32 %v3768_v30, %v3753_v8  ;;  %v3783_v12 = vmul.f32 %v3781_v35, %v3748_v18 }
0x2b25   :  { %3790 = vrot.lane.b32.xlu0 %v6036_v51, %s4946_s6  ;;  %3785 = vrot.lane.b32.xlu1 %v3783_v12, %s4948_s9  ;;  %4896 = vtanh.f32 %v6036_v51 }
0x2b26   :  { %4898 = vtanh.f32 %v5332_v14 }
0x2b27   :  { %4900 = vtanh.f32 %v5471_v15 }
0x2b28   :  { %4902 = vtanh.f32 %v5574_v16 }
0x2b29   :  { %598 = vrot.lane.b32.xlu0 %v4869_v36, %s4946_s6  ;;  %3774 = vrot.lane.b32.xlu1 %v3772_v11, %s4948_s9 }
0x2b2d   :  { %1061 = vrot.lane.b32.xlu0 %v4873_v9, %s4946_s6  ;;  %602 = vrot.lane.b32.xlu1 %v4871_v60, %s4947_s8 }
0x2b2f   :  { %v4897_v50 = vpop.eup %4896 }
0x2b30   :  { %v4899_v55 = vpop.eup %4898 }
0x2b31   :  { %1517 = vrot.lane.b32.xlu0 %v4877_v13, %s4946_s6  ;;  %1065 = vrot.lane.b32.xlu1 %v4875_v49, %s4947_s8  ;;  %v4901_v19 = vpop.eup %4900 }
0x2b32   :  { %v4903_v41 = vpop.eup %4902 }
0x2b35   :  { %1973 = vrot.lane.b32.xlu0 %v4881_v57, %s4946_s6  ;;  %1521 = vrot.lane.b32.xlu1 %v4879_v23, %s4947_s8 }
0x2b39   :  { %2429 = vrot.lane.b32.xlu0 %v4885_v6, %s4946_s6  ;;  %1977 = vrot.lane.b32.xlu1 %v4883_v40, %s4947_s8 }
0x2b3d   :  { %2885 = vrot.lane.b32.xlu0 %v4889_v26, %s4946_s6  ;;  %2433 = vrot.lane.b32.xlu1 %v4887_v1, %s4947_s8 }
0x2b41   :  { %3341 = vrot.lane.b32.xlu0 %v4893_v22, %s4946_s6  ;;  %2889 = vrot.lane.b32.xlu1 %v4891_v5, %s4947_s8 }
0x2b45   :  { %3797 = vrot.lane.b32.xlu0 %v4897_v50, %s4946_s6  ;;  %3345 = vrot.lane.b32.xlu1 %v4895_v17, %s4947_s8 }
0x2b97   :  { %v3791_v33 = vpop.permute.xlu0 %3790  ;;  %v3786_v54 = vpop.permute.xlu1 %3785 }
0x2b98   :  { %v3788_v56 = vadd.f32 %v3786_v54, %v3779_v61 }
0x2b9a   :  { %v3793_v59 = vadd.f32 %v3791_v33, %v3788_v56 }
0x2b9b   :  { %v599_v34 = vpop.permute.xlu0 %598  ;;  %v3775_v39 = vpop.permute.xlu1 %3774 }
0x2b9c   :  { %4904 = vtanh.f32 %v3793_v59  ;;  %v635_v14 = vsel %vm110_vm0, %v599_v34, %v4899_v55  ;;  %v3777_v52 = vadd.f32 %v3775_v39, %v3771_v48 }
0x2b9d   :  { %4906 = vtanh.f32 %v5672_v10  ;;  %v636_v15 = vsel %vm464_vm5, %v635_v14, 0.0 }
0x2b9e   :  { %v644_v2 = vrot.slane %v636_v15, %v6075_v21  ;;  %4908 = vtanh.f32 %v5775_v7  ;;  %v3778_v11 = vadd.f32 %v3777_v52, %v6036_v51 }
0x2b9f   :  { %v1062_v47 = vpop.permute.xlu0 %1061  ;;  %v603_v24 = vpop.permute.xlu1 %602  ;;  %4910 = vtanh.f32 %v5878_v20 }
0x2ba0   :  { %v645_v16 = vcombine.high %v644_v2, %v644_v2  ;;  %3917 = vst.sshfl [vmem:[%s6236_s7 + $0x10] sm:$0x1 pattern:$0x73625140] %v644_v2  ;;  %v1098_v4 = vsel %vm110_vm0, %v1062_v47, %v4901_v19  ;;  %v605_v25 = vsel %vm110_vm0, %v599_v34, %v603_v24  ;;  %4912 = vtanh.f32 %v5980_v63 }
0x2ba1   :  { %v1099_v10 = vsel %vm464_vm5, %v1098_v4, 0.0  ;;  %v606_v31 = vsel %vm464_vm5, %v605_v25, 0.0  ;;  %4914 = vtanh.f32 %v3778_v11 }
0x2ba2   :  { %3918 = vst.sshfl [vmem:[%s6236_s7 + $0x18] sm:$0x1 pattern:$0x73625140] %v645_v16  ;;  %v1107_v32 = vrot.slane %v1099_v10, %v6075_v21  ;;  %v614_v0 = vrot.slane %v606_v31, %v6075_v21 }
0x2ba3   :  { %v1518_v58 = vpop.permute.xlu0 %1517  ;;  %v1066_v37 = vpop.permute.xlu1 %1065 }
0x2ba4   :  { %v1108_v38 = vcombine.high %v1107_v32, %v1107_v32  ;;  %3919 = vst.sshfl [vmem:[%s6236_s7 + $0x11] sm:$0x1 pattern:$0x73625140] %v1107_v32  ;;  %v615_v7 = vcombine.high %v614_v0, %v614_v0  ;;  %v1554_v45 = vsel %vm110_vm0, %v1518_v58, %v4903_v41  ;;  %v1068_v46 = vsel %vm110_vm0, %v1062_v47, %v1066_v37 }
0x2ba5   :  { %3870 = vst.sshfl [vmem:[%s6236_s7] sm:$0x1 pattern:$0x73625140] %v614_v0  ;;  %v1555_v29 = vsel %vm464_vm5, %v1554_v45, 0.0  ;;  %v1069_v53 = vsel %vm464_vm5, %v1068_v46, 0.0 }
0x2ba6   :  { %v4905_v62 = vpop.eup %4904  ;;  %3920 = vst.sshfl [vmem:[%s6236_s7 + $0x19] sm:$0x1 pattern:$0x73625140] %v1108_v38  ;;  %v1563_v44 = vrot.slane %v1555_v29, %v6075_v21  ;;  %v1077_v3 = vrot.slane %v1069_v53, %v6075_v21 }
0x2ba7   :  { %3871 = vst.sshfl [vmem:[%s6236_s7 + $0x8] sm:$0x1 pattern:$0x73625140] %v615_v7  ;;  %v4907_v18 = vpop.eup %4906  ;;  %v1974_v20 = vpop.permute.xlu0 %1973  ;;  %3801 = vrot.lane.b32.xlu1 %v4905_v62, %s4947_s8 }
0x2ba8   :  { %v1522_v8 = vpop.permute.xlu1 %1521  ;;  %v1564_v30 = vcombine.high %v1563_v44, %v1563_v44  ;;  %3921 = vst.sshfl [vmem:[%s6236_s7 + $0x12] sm:$0x1 pattern:$0x73625140] %v1563_v44  ;;  %v1078_v35 = vcombine.high %v1077_v3, %v1077_v3  ;;  %v2010_v42 = vsel %vm110_vm0, %v1974_v20, %v4907_v18  ;;  %v4909_v13 = vpop.eup %4908 }
0x2ba9   :  { %3877 = vst.sshfl [vmem:[%s6236_s7 + $0x1] sm:$0x1 pattern:$0x73625140] %v1077_v3  ;;  %v1524_v12 = vsel %vm110_vm0, %v1518_v58, %v1522_v8  ;;  %v2011_v36 = vsel %vm464_vm5, %v2010_v42, 0.0  ;;  %v4911_v17 = vpop.eup %4910 }
0x2baa   :  { %v1525_v60 = vsel %vm464_vm5, %v1524_v12, 0.0  ;;  %3922 = vst.sshfl [vmem:[%s6236_s7 + $0x1a] sm:$0x1 pattern:$0x73625140] %v1564_v30  ;;  %v2019_v9 = vrot.slane %v2011_v36, %v6075_v21  ;;  %v4913_v34 = vpop.eup %4912 }
0x2bab   :  { %3878 = vst.sshfl [vmem:[%s6236_s7 + $0x9] sm:$0x1 pattern:$0x73625140] %v1078_v35  ;;  %v1533_v49 = vrot.slane %v1525_v60, %v6075_v21  ;;  %v2430_v63 = vpop.permute.xlu0 %2429  ;;  %v4915_v10 = vpop.eup %4914 }
0x2bac   :  { %v1978_v23 = vpop.permute.xlu1 %1977  ;;  %v2020_v51 = vcombine.high %v2019_v9, %v2019_v9  ;;  %3923 = vst.sshfl [vmem:[%s6236_s7 + $0x13] sm:$0x1 pattern:$0x73625140] %v2019_v9  ;;  %v2466_v40 = vsel %vm110_vm0, %v2430_v63, %v4909_v13 }
0x2bad   :  { %v1534_v57 = vcombine.high %v1533_v49, %v1533_v49  ;;  %3883 = vst.sshfl [vmem:[%s6236_s7 + $0x2] sm:$0x1 pattern:$0x73625140] %v1533_v49  ;;  %v1980_v6 = vsel %vm110_vm0, %v1974_v20, %v1978_v23  ;;  %v2467_v1 = vsel %vm464_vm5, %v2466_v40, 0.0 }
0x2bae   :  { %v1981_v26 = vsel %vm464_vm5, %v1980_v6, 0.0  ;;  %3924 = vst.sshfl [vmem:[%s6236_s7 + $0x1b] sm:$0x1 pattern:$0x73625140] %v2020_v51  ;;  %v2475_v5 = vrot.slane %v2467_v1, %v6075_v21 }
0x2baf   :  { %3884 = vst.sshfl [vmem:[%s6236_s7 + $0xa] sm:$0x1 pattern:$0x73625140] %v1534_v57  ;;  %v1989_v22 = vrot.slane %v1981_v26, %v6075_v21  ;;  %v2886_v50 = vpop.permute.xlu0 %2885 }
0x2bb0   :  { %v2434_v28 = vpop.permute.xlu1 %2433  ;;  %v2476_v27 = vcombine.high %v2475_v5, %v2475_v5  ;;  %3925 = vst.sshfl [vmem:[%s6236_s7 + $0x14] sm:$0x1 pattern:$0x73625140] %v2475_v5  ;;  %v2922_v43 = vsel %vm110_vm0, %v2886_v50, %v4911_v17 }
0x2bb1   :  { %v1990_v61 = vcombine.high %v1989_v22, %v1989_v22  ;;  %3889 = vst.sshfl [vmem:[%s6236_s7 + $0x3] sm:$0x1 pattern:$0x73625140] %v1989_v22  ;;  %v2436_v33 = vsel %vm110_vm0, %v2430_v63, %v2434_v28  ;;  %v2923_v54 = vsel %vm464_vm5, %v2922_v43, 0.0 }
0x2bb2   :  { %v2437_v56 = vsel %vm464_vm5, %v2436_v33, 0.0  ;;  %3926 = vst.sshfl [vmem:[%s6236_s7 + $0x1c] sm:$0x1 pattern:$0x73625140] %v2476_v27  ;;  %v2931_v59 = vrot.slane %v2923_v54, %v6075_v21 }
0x2bb3   :  { %3890 = vst.sshfl [vmem:[%s6236_s7 + $0xb] sm:$0x1 pattern:$0x73625140] %v1990_v61  ;;  %v2445_v55 = vrot.slane %v2437_v56, %v6075_v21  ;;  %v3342_v39 = vpop.permute.xlu0 %3341 }
0x2bb4   :  { %v2890_v14 = vpop.permute.xlu1 %2889  ;;  %v2932_v15 = vcombine.high %v2931_v59, %v2931_v59  ;;  %3927 = vst.sshfl [vmem:[%s6236_s7 + $0x15] sm:$0x1 pattern:$0x73625140] %v2931_v59  ;;  %v3378_v19 = vsel %vm110_vm0, %v3342_v39, %v4913_v34 }
0x2bb5   :  { %v2446_v2 = vcombine.high %v2445_v55, %v2445_v55  ;;  %3895 = vst.sshfl [vmem:[%s6236_s7 + $0x4] sm:$0x1 pattern:$0x73625140] %v2445_v55  ;;  %v2892_v47 = vsel %vm110_vm0, %v2886_v50, %v2890_v14  ;;  %v3379_v24 = vsel %vm464_vm5, %v3378_v19, 0.0 }
0x2bb6   :  { %v2893_v16 = vsel %vm464_vm5, %v2892_v47, 0.0  ;;  %3928 = vst.sshfl [vmem:[%s6236_s7 + $0x1d] sm:$0x1 pattern:$0x73625140] %v2932_v15  ;;  %v3387_v4 = vrot.slane %v3379_v24, %v6075_v21 }
0x2bb7   :  { %3896 = vst.sshfl [vmem:[%s6236_s7 + $0xc] sm:$0x1 pattern:$0x73625140] %v2446_v2  ;;  %v2901_v25 = vrot.slane %v2893_v16, %v6075_v21  ;;  %v3798_v31 = vpop.permute.xlu0 %3797 }
0x2bb8   :  { %v3346_v32 = vpop.permute.xlu1 %3345  ;;  %v3388_v0 = vcombine.high %v3387_v4, %v3387_v4  ;;  %3929 = vst.sshfl [vmem:[%s6236_s7 + $0x16] sm:$0x1 pattern:$0x73625140] %v3387_v4  ;;  %v3834_v48 = vsel %vm110_vm0, %v3798_v31, %v4915_v10 }
0x2bb9   :  { %v2902_v41 = vcombine.high %v2901_v25, %v2901_v25  ;;  %3901 = vst.sshfl [vmem:[%s6236_s7 + $0x5] sm:$0x1 pattern:$0x73625140] %v2901_v25  ;;  %v3348_v58 = vsel %vm110_vm0, %v3342_v39, %v3346_v32  ;;  %v3835_v37 = vsel %vm464_vm5, %v3834_v48, 0.0 }
0x2bba   :  { %v3349_v38 = vsel %vm464_vm5, %v3348_v58, 0.0  ;;  %3930 = vst.sshfl [vmem:[%s6236_s7 + $0x1e] sm:$0x1 pattern:$0x73625140] %v3388_v0  ;;  %v3843_v7 = vrot.slane %v3835_v37, %v6075_v21 }
0x2bbb   :  { %3902 = vst.sshfl [vmem:[%s6236_s7 + $0xd] sm:$0x1 pattern:$0x73625140] %v2902_v41  ;;  %v3357_v45 = vrot.slane %v3349_v38, %v6075_v21 }
0x2bbc   :  { %v3844_v46 = vcombine.high %v3843_v7, %v3843_v7  ;;  %3931 = vst.sshfl [vmem:[%s6236_s7 + $0x17] sm:$0x1 pattern:$0x73625140] %v3843_v7 }
0x2bbd   :  { %v3358_v52 = vcombine.high %v3357_v45, %v3357_v45  ;;  %3907 = vst.sshfl [vmem:[%s6236_s7 + $0x6] sm:$0x1 pattern:$0x73625140] %v3357_v45 }
0x2bbe   :  { %3932 = vst.sshfl [vmem:[%s6236_s7 + $0x1f] sm:$0x1 pattern:$0x73625140] %v3844_v46 }
0x2bbf   :  { %3908 = vst.sshfl [vmem:[%s6236_s7 + $0xe] sm:$0x1 pattern:$0x73625140] %v3358_v52 }
0x2c19   :  { %v3802_v29 = vpop.permute.xlu1 %3801 }
0x2c1a   :  { %v3804_v53 = vsel %vm110_vm0, %v3798_v31, %v3802_v29 }
0x2c1b   :  { %v3805_v62 = vsel %vm464_vm5, %v3804_v53, 0.0 }
0x2c1c   :  { %v3813_v44 = vrot.slane %v3805_v62, %v6075_v21 }
0x2c1e   :  { %v3814_v3 = vcombine.high %v3813_v44, %v3813_v44  ;;  %3913 = vst.sshfl [vmem:[%s6236_s7 + $0x7] sm:$0x1 pattern:$0x73625140] %v3813_v44 }
0x2c20   :  { %3914 = vst.sshfl [vmem:[%s6236_s7 + $0xf] sm:$0x1 pattern:$0x73625140] %v3814_v3 }
0x2c21   :  { %3867 = vsyncpa [#allocation3], 1 }

</bundles_post_ra>
